<compile_context>
chip_gen: v5e
topology: v5e:2x2
jax: 0.10.0
libtpu: 0.0.40
codegen_flags: <defaults>
</compile_context>

<pallas_src>
import functools
import math

import jax
import jax.numpy as jnp
from jax.experimental import pallas as pl
from jax.experimental.pallas import tpu as pltpu

EPS = 1e-5
C = 16  # channel width of every conv in the client net


# ----------------------------- fused Pallas kernel ---------------------------

def _fused_client_kernel(p1_ref, mask_ref,
                         w1_ref, s1_ref,
                         w2a_ref, s2a_ref, w2b_ref, s2b_ref,
                         w3a_ref, s3a_ref, w3b_ref, s3b_ref,
                         o_ref, y1_ref, halo_ref, col_ref, *, wpp, margin):
    """Whole client network in one kernel.

    p1_ref   : (9*Mpad, 27) bf16  stem im2col, rows grouped tap-major, positions on the
                                  zero-padded (Hp+2, Wp+2) pool grid, tap indices clamped
    mask_ref : (Mpad, 1)    f32   1 on real positions of the padded grid, 0 on padding
    w1_ref   : (27, C)      bf16  stem weights (BN scale folded)
    w*_ref   : (144, C)     bf16  layer2/3 weights, K-concatenated per-tap (BN folded)
    s*_ref   : (1, C)       f32   folded BN shift (includes conv bias)
    o_ref    : (Mpad, C)    f32   activation on the padded grid (wrapper drops the halo)
    y1_ref   : (9*Mpad, C)  f32   scratch: raw stem matmul result
    halo_ref : (Mpad+2*margin, C) f32 scratch: zero-padded activation for row-shift taps
    col_ref  : (Mpad, 9*C)  bf16  scratch: K-concatenated im2col tile
    """
    mpad, c = o_ref.shape

    # ---- layer1: conv(3->16,s2,p3)+BN+ReLU at every (pool tap, padded position) as one
    # MXU pass, then maxpool(3,s2,p1) as a running max over the 9 tap blocks.  Clamped
    # taps are in-window duplicates, harmless under max; +shift / relu commute with max.
    y1_ref[...] = jnp.dot(p1_ref[...], w1_ref[...],
                          preferred_element_type=jnp.float32)
    x = y1_ref[0:mpad, :]
    for t in range(1, 9):
        x = jnp.maximum(x, y1_ref[t * mpad:(t + 1) * mpad, :])
    x = jnp.maximum(x + s1_ref[...], 0.0)
    # outer F.relu(layer1(x)) is a no-op here (x >= 0 already).

    # Zero only the halo margins (once); the interior is fully rewritten every conv and
    # its padding rows are forced to zero by the interior mask.
    halo_ref[0:margin, :] = jnp.zeros((margin, c), halo_ref.dtype)
    halo_ref[margin + mpad:margin + mpad + margin, :] = jnp.zeros((margin, c),
                                                                  halo_ref.dtype)

    # Tap t=(kh,kw) of a 3x3/s1/p1 conv on the padded grid is a constant row shift.
    offs = [(kh - 1) * wpp + (kw - 1) for kh in range(3) for kw in range(3)]

    def conv3x3_bn(xin, w_ref, s_ref, apply_relu):
        # Re-zero padding rows (one multiply), stage into the halo scratch, build the
        # (Mpad, 144) im2col tile, then ONE K=144 MXU pass + folded-BN epilogue.
        halo_ref[margin:margin + mpad, :] = xin * mask_ref[...]
        for t, off in enumerate(offs):
            col_ref[:, t * c:(t + 1) * c] = (
                halo_ref[margin + off:margin + off + mpad, :].astype(col_ref.dtype))
        acc = jnp.dot(col_ref[...], w_ref[...], preferred_element_type=jnp.float32)
        acc = acc + s_ref[...]
        return jnp.maximum(acc, 0.0) if apply_relu else acc

    x = conv3x3_bn(x, w2a_ref, s2a_ref, True)    # layer2: conv(no bias)+BN+ReLU
    x = conv3x3_bn(x, w2b_ref, s2b_ref, False)   # layer2: conv(+bias)+BN
    x = conv3x3_bn(x, w3a_ref, s3a_ref, True)    # layer3: conv(+bias)+BN+ReLU
    x = conv3x3_bn(x, w3b_ref, s3b_ref, False)   # layer3: conv(+bias)+BN
    o_ref[...] = x.astype(o_ref.dtype)


# ------------------------------- wrapper glue ---------------------------------

def _stem_pool_patches(x_nhwc, Hc, Wc, Hp, Wp):
    """conv1(3x3,s2,p3) im2col evaluated at every (maxpool tap, padded pool position).

    Rows ordered (tap, b, pool_row+halo, pool_col+halo).  Tap coordinates falling into
    the maxpool's zero padding are clamped onto an in-window conv position (a duplicate
    is harmless under max), so the kernel needs no pool-validity mask.
    """
    B, H, W, Cin = x_nhwc.shape
    xp = jnp.pad(x_nhwc, ((0, 0), (3, 3), (3, 3), (0, 0)))
    # full conv-grid im2col, patch element order (kh, kw, cin)
    wins = [xp[:, kh:kh + 2 * Hc:2, kw:kw + 2 * Wc:2, :]
            for kh in range(3) for kw in range(3)]
    pfull = jnp.stack(wins, axis=3).reshape(B, Hc, Wc, 9 * Cin)

    Hpp, Wpp = Hp + 2, Wp + 2
    taps = []
    for i in range(3):
        for j in range(3):
            rr = jnp.clip(2 * (jnp.arange(Hpp) - 1) - 1 + i, 0, Hc - 1)
            cc = jnp.clip(2 * (jnp.arange(Wpp) - 1) - 1 + j, 0, Wc - 1)
            tap = pfull[:, rr][:, :, cc]                       # (B, Hpp, Wpp, 9*Cin)
            taps.append(tap.reshape(B * Hpp * Wpp, 9 * Cin))
    return jnp.concatenate(taps, axis=0)                       # (9*B*Hpp*Wpp, 9*Cin)


def _interior_mask(B, Hp, Wp):
    """1.0 on real (Hp, Wp) positions of the padded (Hp+2, Wp+2) grid, 0.0 on padding."""
    hr = jnp.arange(Hp + 2)
    wc = jnp.arange(Wp + 2)
    m = ((hr[:, None] >= 1) & (hr[:, None] <= Hp)
         & (wc[None, :] >= 1) & (wc[None, :] <= Wp)).astype(jnp.float32)
    m = jnp.broadcast_to(m.reshape(1, (Hp + 2) * (Wp + 2)),
                         (B, (Hp + 2) * (Wp + 2)))
    return m.reshape(B * (Hp + 2) * (Wp + 2), 1)


def resnet18_client_forward(x_nchw, params):
    x = jnp.transpose(x_nchw, (0, 2, 3, 1)).astype(jnp.float32)   # NCHW -> NHWC
    B, H, W, _ = x.shape
    Hc = (H + 2 * 3 - 3) // 2 + 1                                  # conv1 output size
    Wc = (W + 2 * 3 - 3) // 2 + 1
    Hp = (Hc + 2 * 1 - 3) // 2 + 1                                 # pooled output size
    Wp = (Wc + 2 * 1 - 3) // 2 + 1
    Mpad = B * (Hp + 2) * (Wp + 2)
    margin = Wp + 3                    # largest |row shift| of a 3x3/s1 tap on the padded grid

    p1 = _stem_pool_patches(x, Hc, Wc, Hp, Wp).astype(jnp.bfloat16)
    mask = _interior_mask(B, Hp, Wp)

    kernel = functools.partial(_fused_client_kernel, wpp=Wp + 2, margin=margin)
    y = pl.pallas_call(
        kernel,
        out_shape=jax.ShapeDtypeStruct((Mpad, C), jnp.float32),
        scratch_shapes=[
            pltpu.VMEM((9 * Mpad, C), jnp.float32),       # raw stem matmul result
            pltpu.VMEM((Mpad + 2 * margin, C), jnp.float32),  # zero-padded halo activation
            pltpu.VMEM((Mpad, 9 * C), jnp.bfloat16),      # K-concatenated im2col tile
        ],
    )(p1, mask,
      params["l1"]["w"], params["l1"]["shift"],
      params["l2a"]["w"], params["l2a"]["shift"],
      params["l2b"]["w"], params["l2b"]["shift"],
      params["l3a"]["w"], params["l3a"]["shift"],
      params["l3b"]["w"], params["l3b"]["shift"])

    y = y.reshape(B, Hp + 2, Wp + 2, C)[:, 1:-1, 1:-1, :]          # drop halo rows/cols
    return jnp.transpose(y, (0, 3, 1, 2))                          # NHWC -> NCHW


# ------------------------------- parameters -----------------------------------

def _fold_bn(gamma, beta, mean, var, conv_bias):
    scale = gamma / jnp.sqrt(var + EPS)
    shift = beta + (conv_bias - mean) * scale
    return scale, shift


def init_params(key):
    """Deterministic init mirroring the module's __init__:
    Conv weight ~ N(0, sqrt(2/(9*Cout))); Conv bias keeps PyTorch default init;
    BN gamma=1, beta=0, running_mean=0, running_var=1 (inference-form BN, folded)."""
    keys = iter(jax.random.split(key, 16))

    def conv_w(cout, cin):
        n = 3 * 3 * cout
        return jax.random.normal(next(keys), (cout, cin, 3, 3),
                                 jnp.float32) * math.sqrt(2.0 / n)

    def conv_b(cout, cin):
        bound = 1.0 / math.sqrt(cin * 9)
        return jax.random.uniform(next(keys), (cout,), jnp.float32,
                                  minval=-bound, maxval=bound)

    def make(cout, cin, has_bias):
        w = conv_w(cout, cin)
        b = conv_b(cout, cin) if has_bias else jnp.zeros((cout,), jnp.float32)
        gamma = jnp.ones((cout,), jnp.float32)
        beta = jnp.zeros((cout,), jnp.float32)
        mean = jnp.zeros((cout,), jnp.float32)
        var = jnp.ones((cout,), jnp.float32)
        scale, shift = _fold_bn(gamma, beta, mean, var, b)
        w_folded = w * scale[:, None, None, None]              # fold BN scale into weights
        w_hwio = jnp.transpose(w_folded, (2, 3, 1, 0))          # (kh, kw, cin, cout)
        wk = w_hwio.reshape(9 * cin, cout).astype(jnp.bfloat16)  # K-concat MXU operand
        # reference uses the SAME bf16-rounded weights so the check isolates activation rounding
        w_hwio_ref = wk.astype(jnp.float32).reshape(3, 3, cin, cout)
        return {"w": wk, "w_hwio": w_hwio_ref, "shift": shift.reshape(1, cout)}

    return {
        "l1":  make(16, 3,  has_bias=False),    # layer1 conv (bias=False)
        "l2a": make(16, 16, has_bias=False),    # layer2 conv1 (bias=False)
        "l2b": make(16, 16, has_bias=True),     # layer2 conv2 (bias=True)
        "l3a": make(16, 16, has_bias=True),     # layer3 conv1 (bias=True)
        "l3b": make(16, 16, has_bias=True),     # layer3 conv2 (bias=True)
    }
    # TODO(synk): layer4..layer9 (BasicBlock stages) are None for cut_layer=3 and are
    # intentionally not implemented; training-mode (batch-statistics) BN is not modeled.


# --------------------------- pure-JAX reference check --------------------------

def _reference_forward(x_nchw, params):
    """XLA reference (lax.conv + reduce_window) using the same folded parameters."""
    x = jnp.transpose(x_nchw, (0, 2, 3, 1)).astype(jnp.float32)

    def conv_bn(xx, p, stride, padding, apply_relu):
        y = jax.lax.conv_general_dilated(
            xx, p["w_hwio"], (stride, stride), [(padding, padding)] * 2,
            dimension_numbers=("NHWC", "HWIO", "NHWC"),
            precision=jax.lax.Precision.HIGHEST)
        y = y + p["shift"].reshape(1, 1, 1, -1)
        return jnp.maximum(y, 0.0) if apply_relu else y

    y = conv_bn(x, params["l1"], 2, 3, True)
    y = jax.lax.reduce_window(y, -jnp.inf, jax.lax.max,
                              (1, 3, 3, 1), (1, 2, 2, 1),
                              [(0, 0), (1, 1), (1, 1), (0, 0)])
    y = jnp.maximum(y, 0.0)                                   # outer F.relu
    y = conv_bn(y, params["l2a"], 1, 1, True)
    y = conv_bn(y, params["l2b"], 1, 1, False)
    y = conv_bn(y, params["l3a"], 1, 1, True)
    y = conv_bn(y, params["l3b"], 1, 1, False)
    return jnp.transpose(y, (0, 3, 1, 2))


# ------------------------------------ main -------------------------------------

if __name__ == "__main__":
    key = jax.random.PRNGKey(0)
    k_x, k_p = jax.random.split(key)
    x = jax.random.normal(k_x, (2, 3, 16, 16), jnp.float32)   # NCHW, like PyTorch
    params = init_params(k_p)

    fwd = jax.jit(resnet18_client_forward)
    out = fwd(x, params)
    jax.block_until_ready(out)

    assert out.shape == (2, 16, 5, 5), out.shape
    assert out.dtype == jnp.float32

    ref = jax.jit(_reference_forward)(x, params)
    jax.block_until_ready(ref)
    max_err = float(jnp.max(jnp.abs(out - ref)))
    # bf16 MXU operands (activations / stem patches); weights are identically bf16-rounded
    # in the reference, so the residual is activation rounding accumulated over 5 convs.
    assert max_err < 5e-2, f"max abs diff vs reference: {max_err}"

    print("KERNEL_OK")
</pallas_src>

<mosaic_0001>
module attributes {stable_mosaic.version = 11 : i64} {
  func.func @_fused_client_kernel(%arg0: memref<882x27xbf16, #tpu.memory_space<vmem>>, %arg1: memref<98x1xf32, #tpu.memory_space<vmem>>, %arg2: memref<27x16xbf16, #tpu.memory_space<vmem>>, %arg3: memref<1x16xf32, #tpu.memory_space<vmem>>, %arg4: memref<144x16xbf16, #tpu.memory_space<vmem>>, %arg5: memref<1x16xf32, #tpu.memory_space<vmem>>, %arg6: memref<144x16xbf16, #tpu.memory_space<vmem>>, %arg7: memref<1x16xf32, #tpu.memory_space<vmem>>, %arg8: memref<144x16xbf16, #tpu.memory_space<vmem>>, %arg9: memref<1x16xf32, #tpu.memory_space<vmem>>, %arg10: memref<144x16xbf16, #tpu.memory_space<vmem>>, %arg11: memref<1x16xf32, #tpu.memory_space<vmem>>, %arg12: memref<98x16xf32, #tpu.memory_space<vmem>>, %arg13: memref<882x16xf32, #tpu.memory_space<vmem>>, %arg14: memref<114x16xf32, #tpu.memory_space<vmem>>, %arg15: memref<98x144xbf16, #tpu.memory_space<vmem>>) attributes {dimension_semantics = [], scalar_prefetch = 0 : i64, scratch_operands = 3 : i64, tpu.core_type = #tpu.core_type<tc>} {
    %c0 = arith.constant 0 : index
    %c0_0 = arith.constant 0 : index
    %0 = vector.load %arg0[%c0, %c0_0] : memref<882x27xbf16, #tpu.memory_space<vmem>>, vector<882x27xbf16>
    %c0_1 = arith.constant 0 : index
    %c0_2 = arith.constant 0 : index
    %1 = vector.load %arg2[%c0_1, %c0_2] : memref<27x16xbf16, #tpu.memory_space<vmem>>, vector<27x16xbf16>
    %cst = arith.constant dense<0.000000e+00> : vector<882x16xf32>
    %2 = tpu.matmul %0, %1, %cst {dimension_numbers = #tpu.dot_dimension_numbers<[1], [0], [0], [1], [0, 0, 1, 1], [], []>} : vector<882x27xbf16>, vector<27x16xbf16>, vector<882x16xf32> -> vector<882x16xf32>
    %c0_3 = arith.constant 0 : index
    %c0_4 = arith.constant 0 : index
    %3 = vector.load %arg13[%c0_3, %c0_4] : memref<882x16xf32, #tpu.memory_space<vmem>>, vector<882x16xf32>
    tpu.vector_store %arg13[%c0_3, %c0_4], %2 {strides = array<i32>} : memref<882x16xf32, #tpu.memory_space<vmem>>, vector<882x16xf32>,
    %c0_5 = arith.constant 0 : index
    %c0_6 = arith.constant 0 : index
    %4 = vector.load %arg13[%c0_5, %c0_6] : memref<882x16xf32, #tpu.memory_space<vmem>>, vector<98x16xf32>
    %c98 = arith.constant 98 : index
    %c0_7 = arith.constant 0 : index
    %5 = vector.load %arg13[%c98, %c0_7] : memref<882x16xf32, #tpu.memory_space<vmem>>, vector<98x16xf32>
    %6 = arith.maximumf %4, %5 : vector<98x16xf32>
    %c196 = arith.constant 196 : index
    %c0_8 = arith.constant 0 : index
    %7 = vector.load %arg13[%c196, %c0_8] : memref<882x16xf32, #tpu.memory_space<vmem>>, vector<98x16xf32>
    %8 = arith.maximumf %6, %7 : vector<98x16xf32>
    %c294 = arith.constant 294 : index
    %c0_9 = arith.constant 0 : index
    %9 = vector.load %arg13[%c294, %c0_9] : memref<882x16xf32, #tpu.memory_space<vmem>>, vector<98x16xf32>
    %10 = arith.maximumf %8, %9 : vector<98x16xf32>
    %c392 = arith.constant 392 : index
    %c0_10 = arith.constant 0 : index
    %11 = vector.load %arg13[%c392, %c0_10] : memref<882x16xf32, #tpu.memory_space<vmem>>, vector<98x16xf32>
    %12 = arith.maximumf %10, %11 : vector<98x16xf32>
    %c490 = arith.constant 490 : index
    %c0_11 = arith.constant 0 : index
    %13 = vector.load %arg13[%c490, %c0_11] : memref<882x16xf32, #tpu.memory_space<vmem>>, vector<98x16xf32>
    %14 = arith.maximumf %12, %13 : vector<98x16xf32>
    %c588 = arith.constant 588 : index
    %c0_12 = arith.constant 0 : index
    %15 = vector.load %arg13[%c588, %c0_12] : memref<882x16xf32, #tpu.memory_space<vmem>>, vector<98x16xf32>
    %16 = arith.maximumf %14, %15 : vector<98x16xf32>
    %c686 = arith.constant 686 : index
    %c0_13 = arith.constant 0 : index
    %17 = vector.load %arg13[%c686, %c0_13] : memref<882x16xf32, #tpu.memory_space<vmem>>, vector<98x16xf32>
    %18 = arith.maximumf %16, %17 : vector<98x16xf32>
    %c784 = arith.constant 784 : index
    %c0_14 = arith.constant 0 : index
    %19 = vector.load %arg13[%c784, %c0_14] : memref<882x16xf32, #tpu.memory_space<vmem>>, vector<98x16xf32>
    %20 = arith.maximumf %18, %19 : vector<98x16xf32>
    %c0_15 = arith.constant 0 : index
    %c0_16 = arith.constant 0 : index
    %21 = vector.load %arg3[%c0_15, %c0_16] : memref<1x16xf32, #tpu.memory_space<vmem>>, vector<1x16xf32>
    %22 = vector.broadcast %21 : vector<1x16xf32> to vector<98x16xf32>
    %23 = arith.addf %20, %22 : vector<98x16xf32>
    %cst_17 = arith.constant 0.000000e+00 : f32
    %24 = vector.broadcast %cst_17 : f32 to vector<98x16xf32>
    %25 = arith.maximumf %23, %24 : vector<98x16xf32>
    %cst_18 = arith.constant 0.000000e+00 : f32
    %26 = vector.broadcast %cst_18 : f32 to vector<8x16xf32>
    %c0_19 = arith.constant 0 : index
    %c0_20 = arith.constant 0 : index
    %27 = vector.load %arg14[%c0_19, %c0_20] : memref<114x16xf32, #tpu.memory_space<vmem>>, vector<8x16xf32>
    tpu.vector_store %arg14[%c0_19, %c0_20], %26 {strides = array<i32>} : memref<114x16xf32, #tpu.memory_space<vmem>>, vector<8x16xf32>,
    %cst_21 = arith.constant 0.000000e+00 : f32
    %28 = vector.broadcast %cst_21 : f32 to vector<8x16xf32>
    %c106 = arith.constant 106 : index
    %c0_22 = arith.constant 0 : index
    %29 = vector.load %arg14[%c106, %c0_22] : memref<114x16xf32, #tpu.memory_space<vmem>>, vector<8x16xf32>
    tpu.vector_store %arg14[%c106, %c0_22], %28 {strides = array<i32>} : memref<114x16xf32, #tpu.memory_space<vmem>>, vector<8x16xf32>,
    %c0_23 = arith.constant 0 : index
    %c0_24 = arith.constant 0 : index
    %30 = vector.load %arg1[%c0_23, %c0_24] : memref<98x1xf32, #tpu.memory_space<vmem>>, vector<98x1xf32>
    %31 = vector.broadcast %30 : vector<98x1xf32> to vector<98x16xf32>
    %32 = arith.mulf %25, %31 : vector<98x16xf32>
    %c8 = arith.constant 8 : index
    %c0_25 = arith.constant 0 : index
    %33 = vector.load %arg14[%c8, %c0_25] : memref<114x16xf32, #tpu.memory_space<vmem>>, vector<98x16xf32>
    tpu.vector_store %arg14[%c8, %c0_25], %32 {strides = array<i32>} : memref<114x16xf32, #tpu.memory_space<vmem>>, vector<98x16xf32>,
    %c0_26 = arith.constant 0 : index
    %c0_27 = arith.constant 0 : index
    %34 = vector.load %arg14[%c0_26, %c0_27] : memref<114x16xf32, #tpu.memory_space<vmem>>, vector<98x16xf32>
    %35 = arith.truncf %34 : vector<98x16xf32> to vector<98x16xbf16>
    %c0_28 = arith.constant 0 : index
    %c0_29 = arith.constant 0 : index
    %36 = vector.load %arg15[%c0_28, %c0_29] : memref<98x144xbf16, #tpu.memory_space<vmem>>, vector<98x16xbf16>
    tpu.vector_store %arg15[%c0_28, %c0_29], %35 {strides = array<i32>} : memref<98x144xbf16, #tpu.memory_space<vmem>>, vector<98x16xbf16>,
    %c1 = arith.constant 1 : index
    %c0_30 = arith.constant 0 : index
    %37 = vector.load %arg14[%c1, %c0_30] : memref<114x16xf32, #tpu.memory_space<vmem>>, vector<98x16xf32>
    %38 = arith.truncf %37 : vector<98x16xf32> to vector<98x16xbf16>
    %c0_31 = arith.constant 0 : index
    %c16 = arith.constant 16 : index
    %39 = vector.load %arg15[%c0_31, %c16] : memref<98x144xbf16, #tpu.memory_space<vmem>>, vector<98x16xbf16>
    tpu.vector_store %arg15[%c0_31, %c16], %38 {strides = array<i32>} : memref<98x144xbf16, #tpu.memory_space<vmem>>, vector<98x16xbf16>,
    %c2 = arith.constant 2 : index
    %c0_32 = arith.constant 0 : index
    %40 = vector.load %arg14[%c2, %c0_32] : memref<114x16xf32, #tpu.memory_space<vmem>>, vector<98x16xf32>
    %41 = arith.truncf %40 : vector<98x16xf32> to vector<98x16xbf16>
    %c0_33 = arith.constant 0 : index
    %c32 = arith.constant 32 : index
    %42 = vector.load %arg15[%c0_33, %c32] : memref<98x144xbf16, #tpu.memory_space<vmem>>, vector<98x16xbf16>
    tpu.vector_store %arg15[%c0_33, %c32], %41 {strides = array<i32>} : memref<98x144xbf16, #tpu.memory_space<vmem>>, vector<98x16xbf16>,
    %c7 = arith.constant 7 : index
    %c0_34 = arith.constant 0 : index
    %43 = vector.load %arg14[%c7, %c0_34] : memref<114x16xf32, #tpu.memory_space<vmem>>, vector<98x16xf32>
    %44 = arith.truncf %43 : vector<98x16xf32> to vector<98x16xbf16>
    %c0_35 = arith.constant 0 : index
    %c48 = arith.constant 48 : index
    %45 = vector.load %arg15[%c0_35, %c48] : memref<98x144xbf16, #tpu.memory_space<vmem>>, vector<98x16xbf16>
    tpu.vector_store %arg15[%c0_35, %c48], %44 {strides = array<i32>} : memref<98x144xbf16, #tpu.memory_space<vmem>>, vector<98x16xbf16>,
    %c8_36 = arith.constant 8 : index
    %c0_37 = arith.constant 0 : index
    %46 = vector.load %arg14[%c8_36, %c0_37] : memref<114x16xf32, #tpu.memory_space<vmem>>, vector<98x16xf32>
    %47 = arith.truncf %46 : vector<98x16xf32> to vector<98x16xbf16>
    %c0_38 = arith.constant 0 : index
    %c64 = arith.constant 64 : index
    %48 = vector.load %arg15[%c0_38, %c64] : memref<98x144xbf16, #tpu.memory_space<vmem>>, vector<98x16xbf16>
    tpu.vector_store %arg15[%c0_38, %c64], %47 {strides = array<i32>} : memref<98x144xbf16, #tpu.memory_space<vmem>>, vector<98x16xbf16>,
    %c9 = arith.constant 9 : index
    %c0_39 = arith.constant 0 : index
    %49 = vector.load %arg14[%c9, %c0_39] : memref<114x16xf32, #tpu.memory_space<vmem>>, vector<98x16xf32>
    %50 = arith.truncf %49 : vector<98x16xf32> to vector<98x16xbf16>
    %c0_40 = arith.constant 0 : index
    %c80 = arith.constant 80 : index
    %51 = vector.load %arg15[%c0_40, %c80] : memref<98x144xbf16, #tpu.memory_space<vmem>>, vector<98x16xbf16>
    tpu.vector_store %arg15[%c0_40, %c80], %50 {strides = array<i32>} : memref<98x144xbf16, #tpu.memory_space<vmem>>, vector<98x16xbf16>,
    %c14 = arith.constant 14 : index
    %c0_41 = arith.constant 0 : index
    %52 = vector.load %arg14[%c14, %c0_41] : memref<114x16xf32, #tpu.memory_space<vmem>>, vector<98x16xf32>
    %53 = arith.truncf %52 : vector<98x16xf32> to vector<98x16xbf16>
    %c0_42 = arith.constant 0 : index
    %c96 = arith.constant 96 : index
    %54 = vector.load %arg15[%c0_42, %c96] : memref<98x144xbf16, #tpu.memory_space<vmem>>, vector<98x16xbf16>
    tpu.vector_store %arg15[%c0_42, %c96], %53 {strides = array<i32>} : memref<98x144xbf16, #tpu.memory_space<vmem>>, vector<98x16xbf16>,
    %c15 = arith.constant 15 : index
    %c0_43 = arith.constant 0 : index
    %55 = vector.load %arg14[%c15, %c0_43] : memref<114x16xf32, #tpu.memory_space<vmem>>, vector<98x16xf32>
    %56 = arith.truncf %55 : vector<98x16xf32> to vector<98x16xbf16>
    %c0_44 = arith.constant 0 : index
    %c112 = arith.constant 112 : index
    %57 = vector.load %arg15[%c0_44, %c112] : memref<98x144xbf16, #tpu.memory_space<vmem>>, vector<98x16xbf16>
    tpu.vector_store %arg15[%c0_44, %c112], %56 {strides = array<i32>} : memref<98x144xbf16, #tpu.memory_space<vmem>>, vector<98x16xbf16>,
    %c16_45 = arith.constant 16 : index
    %c0_46 = arith.constant 0 : index
    %58 = vector.load %arg14[%c16_45, %c0_46] : memref<114x16xf32, #tpu.memory_space<vmem>>, vector<98x16xf32>
    %59 = arith.truncf %58 : vector<98x16xf32> to vector<98x16xbf16>
    %c0_47 = arith.constant 0 : index
    %c128 = arith.constant 128 : index
    %60 = vector.load %arg15[%c0_47, %c128] : memref<98x144xbf16, #tpu.memory_space<vmem>>, vector<98x16xbf16>
    tpu.vector_store %arg15[%c0_47, %c128], %59 {strides = array<i32>} : memref<98x144xbf16, #tpu.memory_space<vmem>>, vector<98x16xbf16>,
    %c0_48 = arith.constant 0 : index
    %c0_49 = arith.constant 0 : index
    %61 = vector.load %arg15[%c0_48, %c0_49] : memref<98x144xbf16, #tpu.memory_space<vmem>>, vector<98x144xbf16>
    %c0_50 = arith.constant 0 : index
    %c0_51 = arith.constant 0 : index
    %62 = vector.load %arg4[%c0_50, %c0_51] : memref<144x16xbf16, #tpu.memory_space<vmem>>, vector<144x16xbf16>
    %cst_52 = arith.constant dense<0.000000e+00> : vector<98x16xf32>
    %63 = tpu.matmul %61, %62, %cst_52 {dimension_numbers = #tpu.dot_dimension_numbers<[1], [0], [0], [1], [0, 0, 1, 1], [], []>} : vector<98x144xbf16>, vector<144x16xbf16>, vector<98x16xf32> -> vector<98x16xf32>
    %c0_53 = arith.constant 0 : index
    %c0_54 = arith.constant 0 : index
    %64 = vector.load %arg5[%c0_53, %c0_54] : memref<1x16xf32, #tpu.memory_space<vmem>>, vector<1x16xf32>
    %65 = vector.broadcast %64 : vector<1x16xf32> to vector<98x16xf32>
    %66 = arith.addf %63, %65 : vector<98x16xf32>
    %cst_55 = arith.constant 0.000000e+00 : f32
    %67 = vector.broadcast %cst_55 : f32 to vector<98x16xf32>
    %68 = arith.maximumf %66, %67 : vector<98x16xf32>
    %c0_56 = arith.constant 0 : index
    %c0_57 = arith.constant 0 : index
    %69 = vector.load %arg1[%c0_56, %c0_57] : memref<98x1xf32, #tpu.memory_space<vmem>>, vector<98x1xf32>
    %70 = vector.broadcast %69 : vector<98x1xf32> to vector<98x16xf32>
    %71 = arith.mulf %68, %70 : vector<98x16xf32>
    %c8_58 = arith.constant 8 : index
    %c0_59 = arith.constant 0 : index
    %72 = vector.load %arg14[%c8_58, %c0_59] : memref<114x16xf32, #tpu.memory_space<vmem>>, vector<98x16xf32>
    tpu.vector_store %arg14[%c8_58, %c0_59], %71 {strides = array<i32>} : memref<114x16xf32, #tpu.memory_space<vmem>>, vector<98x16xf32>,
    %c0_60 = arith.constant 0 : index
    %c0_61 = arith.constant 0 : index
    %73 = vector.load %arg14[%c0_60, %c0_61] : memref<114x16xf32, #tpu.memory_space<vmem>>, vector<98x16xf32>
    %74 = arith.truncf %73 : vector<98x16xf32> to vector<98x16xbf16>
    %c0_62 = arith.constant 0 : index
    %c0_63 = arith.constant 0 : index
    %75 = vector.load %arg15[%c0_62, %c0_63] : memref<98x144xbf16, #tpu.memory_space<vmem>>, vector<98x16xbf16>
    tpu.vector_store %arg15[%c0_62, %c0_63], %74 {strides = array<i32>} : memref<98x144xbf16, #tpu.memory_space<vmem>>, vector<98x16xbf16>,
    %c1_64 = arith.constant 1 : index
    %c0_65 = arith.constant 0 : index
    %76 = vector.load %arg14[%c1_64, %c0_65] : memref<114x16xf32, #tpu.memory_space<vmem>>, vector<98x16xf32>
    %77 = arith.truncf %76 : vector<98x16xf32> to vector<98x16xbf16>
    %c0_66 = arith.constant 0 : index
    %c16_67 = arith.constant 16 : index
    %78 = vector.load %arg15[%c0_66, %c16_67] : memref<98x144xbf16, #tpu.memory_space<vmem>>, vector<98x16xbf16>
    tpu.vector_store %arg15[%c0_66, %c16_67], %77 {strides = array<i32>} : memref<98x144xbf16, #tpu.memory_space<vmem>>, vector<98x16xbf16>,
    %c2_68 = arith.constant 2 : index
    %c0_69 = arith.constant 0 : index
    %79 = vector.load %arg14[%c2_68, %c0_69] : memref<114x16xf32, #tpu.memory_space<vmem>>, vector<98x16xf32>
    %80 = arith.truncf %79 : vector<98x16xf32> to vector<98x16xbf16>
    %c0_70 = arith.constant 0 : index
    %c32_71 = arith.constant 32 : index
    %81 = vector.load %arg15[%c0_70, %c32_71] : memref<98x144xbf16, #tpu.memory_space<vmem>>, vector<98x16xbf16>
    tpu.vector_store %arg15[%c0_70, %c32_71], %80 {strides = array<i32>} : memref<98x144xbf16, #tpu.memory_space<vmem>>, vector<98x16xbf16>,
    %c7_72 = arith.constant 7 : index
    %c0_73 = arith.constant 0 : index
    %82 = vector.load %arg14[%c7_72, %c0_73] : memref<114x16xf32, #tpu.memory_space<vmem>>, vector<98x16xf32>
    %83 = arith.truncf %82 : vector<98x16xf32> to vector<98x16xbf16>
    %c0_74 = arith.constant 0 : index
    %c48_75 = arith.constant 48 : index
    %84 = vector.load %arg15[%c0_74, %c48_75] : memref<98x144xbf16, #tpu.memory_space<vmem>>, vector<98x16xbf16>
    tpu.vector_store %arg15[%c0_74, %c48_75], %83 {strides = array<i32>} : memref<98x144xbf16, #tpu.memory_space<vmem>>, vector<98x16xbf16>,
    %c8_76 = arith.constant 8 : index
    %c0_77 = arith.constant 0 : index
    %85 = vector.load %arg14[%c8_76, %c0_77] : memref<114x16xf32, #tpu.memory_space<vmem>>, vector<98x16xf32>
    %86 = arith.truncf %85 : vector<98x16xf32> to vector<98x16xbf16>
    %c0_78 = arith.constant 0 : index
    %c64_79 = arith.constant 64 : index
    %87 = vector.load %arg15[%c0_78, %c64_79] : memref<98x144xbf16, #tpu.memory_space<vmem>>, vector<98x16xbf16>
    tpu.vector_store %arg15[%c0_78, %c64_79], %86 {strides = array<i32>} : memref<98x144xbf16, #tpu.memory_space<vmem>>, vector<98x16xbf16>,
    %c9_80 = arith.constant 9 : index
    %c0_81 = arith.constant 0 : index
    %88 = vector.load %arg14[%c9_80, %c0_81] : memref<114x16xf32, #tpu.memory_space<vmem>>, vector<98x16xf32>
    %89 = arith.truncf %88 : vector<98x16xf32> to vector<98x16xbf16>
    %c0_82 = arith.constant 0 : index
    %c80_83 = arith.constant 80 : index
    %90 = vector.load %arg15[%c0_82, %c80_83] : memref<98x144xbf16, #tpu.memory_space<vmem>>, vector<98x16xbf16>
    tpu.vector_store %arg15[%c0_82, %c80_83], %89 {strides = array<i32>} : memref<98x144xbf16, #tpu.memory_space<vmem>>, vector<98x16xbf16>,
    %c14_84 = arith.constant 14 : index
    %c0_85 = arith.constant 0 : index
    %91 = vector.load %arg14[%c14_84, %c0_85] : memref<114x16xf32, #tpu.memory_space<vmem>>, vector<98x16xf32>
    %92 = arith.truncf %91 : vector<98x16xf32> to vector<98x16xbf16>
    %c0_86 = arith.constant 0 : index
    %c96_87 = arith.constant 96 : index
    %93 = vector.load %arg15[%c0_86, %c96_87] : memref<98x144xbf16, #tpu.memory_space<vmem>>, vector<98x16xbf16>
    tpu.vector_store %arg15[%c0_86, %c96_87], %92 {strides = array<i32>} : memref<98x144xbf16, #tpu.memory_space<vmem>>, vector<98x16xbf16>,
    %c15_88 = arith.constant 15 : index
    %c0_89 = arith.constant 0 : index
    %94 = vector.load %arg14[%c15_88, %c0_89] : memref<114x16xf32, #tpu.memory_space<vmem>>, vector<98x16xf32>
    %95 = arith.truncf %94 : vector<98x16xf32> to vector<98x16xbf16>
    %c0_90 = arith.constant 0 : index
    %c112_91 = arith.constant 112 : index
    %96 = vector.load %arg15[%c0_90, %c112_91] : memref<98x144xbf16, #tpu.memory_space<vmem>>, vector<98x16xbf16>
    tpu.vector_store %arg15[%c0_90, %c112_91], %95 {strides = array<i32>} : memref<98x144xbf16, #tpu.memory_space<vmem>>, vector<98x16xbf16>,
    %c16_92 = arith.constant 16 : index
    %c0_93 = arith.constant 0 : index
    %97 = vector.load %arg14[%c16_92, %c0_93] : memref<114x16xf32, #tpu.memory_space<vmem>>, vector<98x16xf32>
    %98 = arith.truncf %97 : vector<98x16xf32> to vector<98x16xbf16>
    %c0_94 = arith.constant 0 : index
    %c128_95 = arith.constant 128 : index
    %99 = vector.load %arg15[%c0_94, %c128_95] : memref<98x144xbf16, #tpu.memory_space<vmem>>, vector<98x16xbf16>
    tpu.vector_store %arg15[%c0_94, %c128_95], %98 {strides = array<i32>} : memref<98x144xbf16, #tpu.memory_space<vmem>>, vector<98x16xbf16>,
    %c0_96 = arith.constant 0 : index
    %c0_97 = arith.constant 0 : index
    %100 = vector.load %arg15[%c0_96, %c0_97] : memref<98x144xbf16, #tpu.memory_space<vmem>>, vector<98x144xbf16>
    %c0_98 = arith.constant 0 : index
    %c0_99 = arith.constant 0 : index
    %101 = vector.load %arg6[%c0_98, %c0_99] : memref<144x16xbf16, #tpu.memory_space<vmem>>, vector<144x16xbf16>
    %cst_100 = arith.constant dense<0.000000e+00> : vector<98x16xf32>
    %102 = tpu.matmul %100, %101, %cst_100 {dimension_numbers = #tpu.dot_dimension_numbers<[1], [0], [0], [1], [0, 0, 1, 1], [], []>} : vector<98x144xbf16>, vector<144x16xbf16>, vector<98x16xf32> -> vector<98x16xf32>
    %c0_101 = arith.constant 0 : index
    %c0_102 = arith.constant 0 : index
    %103 = vector.load %arg7[%c0_101, %c0_102] : memref<1x16xf32, #tpu.memory_space<vmem>>, vector<1x16xf32>
    %104 = vector.broadcast %103 : vector<1x16xf32> to vector<98x16xf32>
    %105 = arith.addf %102, %104 : vector<98x16xf32>
    %c0_103 = arith.constant 0 : index
    %c0_104 = arith.constant 0 : index
    %106 = vector.load %arg1[%c0_103, %c0_104] : memref<98x1xf32, #tpu.memory_space<vmem>>, vector<98x1xf32>
    %107 = vector.broadcast %106 : vector<98x1xf32> to vector<98x16xf32>
    %108 = arith.mulf %105, %107 : vector<98x16xf32>
    %c8_105 = arith.constant 8 : index
    %c0_106 = arith.constant 0 : index
    %109 = vector.load %arg14[%c8_105, %c0_106] : memref<114x16xf32, #tpu.memory_space<vmem>>, vector<98x16xf32>
    tpu.vector_store %arg14[%c8_105, %c0_106], %108 {strides = array<i32>} : memref<114x16xf32, #tpu.memory_space<vmem>>, vector<98x16xf32>,
    %c0_107 = arith.constant 0 : index
    %c0_108 = arith.constant 0 : index
    %110 = vector.load %arg14[%c0_107, %c0_108] : memref<114x16xf32, #tpu.memory_space<vmem>>, vector<98x16xf32>
    %111 = arith.truncf %110 : vector<98x16xf32> to vector<98x16xbf16>
    %c0_109 = arith.constant 0 : index
    %c0_110 = arith.constant 0 : index
    %112 = vector.load %arg15[%c0_109, %c0_110] : memref<98x144xbf16, #tpu.memory_space<vmem>>, vector<98x16xbf16>
    tpu.vector_store %arg15[%c0_109, %c0_110], %111 {strides = array<i32>} : memref<98x144xbf16, #tpu.memory_space<vmem>>, vector<98x16xbf16>,
    %c1_111 = arith.constant 1 : index
    %c0_112 = arith.constant 0 : index
    %113 = vector.load %arg14[%c1_111, %c0_112] : memref<114x16xf32, #tpu.memory_space<vmem>>, vector<98x16xf32>
    %114 = arith.truncf %113 : vector<98x16xf32> to vector<98x16xbf16>
    %c0_113 = arith.constant 0 : index
    %c16_114 = arith.constant 16 : index
    %115 = vector.load %arg15[%c0_113, %c16_114] : memref<98x144xbf16, #tpu.memory_space<vmem>>, vector<98x16xbf16>
    tpu.vector_store %arg15[%c0_113, %c16_114], %114 {strides = array<i32>} : memref<98x144xbf16, #tpu.memory_space<vmem>>, vector<98x16xbf16>,
    %c2_115 = arith.constant 2 : index
    %c0_116 = arith.constant 0 : index
    %116 = vector.load %arg14[%c2_115, %c0_116] : memref<114x16xf32, #tpu.memory_space<vmem>>, vector<98x16xf32>
    %117 = arith.truncf %116 : vector<98x16xf32> to vector<98x16xbf16>
    %c0_117 = arith.constant 0 : index
    %c32_118 = arith.constant 32 : index
    %118 = vector.load %arg15[%c0_117, %c32_118] : memref<98x144xbf16, #tpu.memory_space<vmem>>, vector<98x16xbf16>
    tpu.vector_store %arg15[%c0_117, %c32_118], %117 {strides = array<i32>} : memref<98x144xbf16, #tpu.memory_space<vmem>>, vector<98x16xbf16>,
    %c7_119 = arith.constant 7 : index
    %c0_120 = arith.constant 0 : index
    %119 = vector.load %arg14[%c7_119, %c0_120] : memref<114x16xf32, #tpu.memory_space<vmem>>, vector<98x16xf32>
    %120 = arith.truncf %119 : vector<98x16xf32> to vector<98x16xbf16>
    %c0_121 = arith.constant 0 : index
    %c48_122 = arith.constant 48 : index
    %121 = vector.load %arg15[%c0_121, %c48_122] : memref<98x144xbf16, #tpu.memory_space<vmem>>, vector<98x16xbf16>
    tpu.vector_store %arg15[%c0_121, %c48_122], %120 {strides = array<i32>} : memref<98x144xbf16, #tpu.memory_space<vmem>>, vector<98x16xbf16>,
    %c8_123 = arith.constant 8 : index
    %c0_124 = arith.constant 0 : index
    %122 = vector.load %arg14[%c8_123, %c0_124] : memref<114x16xf32, #tpu.memory_space<vmem>>, vector<98x16xf32>
    %123 = arith.truncf %122 : vector<98x16xf32> to vector<98x16xbf16>
    %c0_125 = arith.constant 0 : index
    %c64_126 = arith.constant 64 : index
    %124 = vector.load %arg15[%c0_125, %c64_126] : memref<98x144xbf16, #tpu.memory_space<vmem>>, vector<98x16xbf16>
    tpu.vector_store %arg15[%c0_125, %c64_126], %123 {strides = array<i32>} : memref<98x144xbf16, #tpu.memory_space<vmem>>, vector<98x16xbf16>,
    %c9_127 = arith.constant 9 : index
    %c0_128 = arith.constant 0 : index
    %125 = vector.load %arg14[%c9_127, %c0_128] : memref<114x16xf32, #tpu.memory_space<vmem>>, vector<98x16xf32>
    %126 = arith.truncf %125 : vector<98x16xf32> to vector<98x16xbf16>
    %c0_129 = arith.constant 0 : index
    %c80_130 = arith.constant 80 : index
    %127 = vector.load %arg15[%c0_129, %c80_130] : memref<98x144xbf16, #tpu.memory_space<vmem>>, vector<98x16xbf16>
    tpu.vector_store %arg15[%c0_129, %c80_130], %126 {strides = array<i32>} : memref<98x144xbf16, #tpu.memory_space<vmem>>, vector<98x16xbf16>,
    %c14_131 = arith.constant 14 : index
    %c0_132 = arith.constant 0 : index
    %128 = vector.load %arg14[%c14_131, %c0_132] : memref<114x16xf32, #tpu.memory_space<vmem>>, vector<98x16xf32>
    %129 = arith.truncf %128 : vector<98x16xf32> to vector<98x16xbf16>
    %c0_133 = arith.constant 0 : index
    %c96_134 = arith.constant 96 : index
    %130 = vector.load %arg15[%c0_133, %c96_134] : memref<98x144xbf16, #tpu.memory_space<vmem>>, vector<98x16xbf16>
    tpu.vector_store %arg15[%c0_133, %c96_134], %129 {strides = array<i32>} : memref<98x144xbf16, #tpu.memory_space<vmem>>, vector<98x16xbf16>,
    %c15_135 = arith.constant 15 : index
    %c0_136 = arith.constant 0 : index
    %131 = vector.load %arg14[%c15_135, %c0_136] : memref<114x16xf32, #tpu.memory_space<vmem>>, vector<98x16xf32>
    %132 = arith.truncf %131 : vector<98x16xf32> to vector<98x16xbf16>
    %c0_137 = arith.constant 0 : index
    %c112_138 = arith.constant 112 : index
    %133 = vector.load %arg15[%c0_137, %c112_138] : memref<98x144xbf16, #tpu.memory_space<vmem>>, vector<98x16xbf16>
    tpu.vector_store %arg15[%c0_137, %c112_138], %132 {strides = array<i32>} : memref<98x144xbf16, #tpu.memory_space<vmem>>, vector<98x16xbf16>,
    %c16_139 = arith.constant 16 : index
    %c0_140 = arith.constant 0 : index
    %134 = vector.load %arg14[%c16_139, %c0_140] : memref<114x16xf32, #tpu.memory_space<vmem>>, vector<98x16xf32>
    %135 = arith.truncf %134 : vector<98x16xf32> to vector<98x16xbf16>
    %c0_141 = arith.constant 0 : index
    %c128_142 = arith.constant 128 : index
    %136 = vector.load %arg15[%c0_141, %c128_142] : memref<98x144xbf16, #tpu.memory_space<vmem>>, vector<98x16xbf16>
    tpu.vector_store %arg15[%c0_141, %c128_142], %135 {strides = array<i32>} : memref<98x144xbf16, #tpu.memory_space<vmem>>, vector<98x16xbf16>,
    %c0_143 = arith.constant 0 : index
    %c0_144 = arith.constant 0 : index
    %137 = vector.load %arg15[%c0_143, %c0_144] : memref<98x144xbf16, #tpu.memory_space<vmem>>, vector<98x144xbf16>
    %c0_145 = arith.constant 0 : index
    %c0_146 = arith.constant 0 : index
    %138 = vector.load %arg8[%c0_145, %c0_146] : memref<144x16xbf16, #tpu.memory_space<vmem>>, vector<144x16xbf16>
    %cst_147 = arith.constant dense<0.000000e+00> : vector<98x16xf32>
    %139 = tpu.matmul %137, %138, %cst_147 {dimension_numbers = #tpu.dot_dimension_numbers<[1], [0], [0], [1], [0, 0, 1, 1], [], []>} : vector<98x144xbf16>, vector<144x16xbf16>, vector<98x16xf32> -> vector<98x16xf32>
    %c0_148 = arith.constant 0 : index
    %c0_149 = arith.constant 0 : index
    %140 = vector.load %arg9[%c0_148, %c0_149] : memref<1x16xf32, #tpu.memory_space<vmem>>, vector<1x16xf32>
    %141 = vector.broadcast %140 : vector<1x16xf32> to vector<98x16xf32>
    %142 = arith.addf %139, %141 : vector<98x16xf32>
    %cst_150 = arith.constant 0.000000e+00 : f32
    %143 = vector.broadcast %cst_150 : f32 to vector<98x16xf32>
    %144 = arith.maximumf %142, %143 : vector<98x16xf32>
    %c0_151 = arith.constant 0 : index
    %c0_152 = arith.constant 0 : index
    %145 = vector.load %arg1[%c0_151, %c0_152] : memref<98x1xf32, #tpu.memory_space<vmem>>, vector<98x1xf32>
    %146 = vector.broadcast %145 : vector<98x1xf32> to vector<98x16xf32>
    %147 = arith.mulf %144, %146 : vector<98x16xf32>
    %c8_153 = arith.constant 8 : index
    %c0_154 = arith.constant 0 : index
    %148 = vector.load %arg14[%c8_153, %c0_154] : memref<114x16xf32, #tpu.memory_space<vmem>>, vector<98x16xf32>
    tpu.vector_store %arg14[%c8_153, %c0_154], %147 {strides = array<i32>} : memref<114x16xf32, #tpu.memory_space<vmem>>, vector<98x16xf32>,
    %c0_155 = arith.constant 0 : index
    %c0_156 = arith.constant 0 : index
    %149 = vector.load %arg14[%c0_155, %c0_156] : memref<114x16xf32, #tpu.memory_space<vmem>>, vector<98x16xf32>
    %150 = arith.truncf %149 : vector<98x16xf32> to vector<98x16xbf16>
    %c0_157 = arith.constant 0 : index
    %c0_158 = arith.constant 0 : index
    %151 = vector.load %arg15[%c0_157, %c0_158] : memref<98x144xbf16, #tpu.memory_space<vmem>>, vector<98x16xbf16>
    tpu.vector_store %arg15[%c0_157, %c0_158], %150 {strides = array<i32>} : memref<98x144xbf16, #tpu.memory_space<vmem>>, vector<98x16xbf16>,
    %c1_159 = arith.constant 1 : index
    %c0_160 = arith.constant 0 : index
    %152 = vector.load %arg14[%c1_159, %c0_160] : memref<114x16xf32, #tpu.memory_space<vmem>>, vector<98x16xf32>
    %153 = arith.truncf %152 : vector<98x16xf32> to vector<98x16xbf16>
    %c0_161 = arith.constant 0 : index
    %c16_162 = arith.constant 16 : index
    %154 = vector.load %arg15[%c0_161, %c16_162] : memref<98x144xbf16, #tpu.memory_space<vmem>>, vector<98x16xbf16>
    tpu.vector_store %arg15[%c0_161, %c16_162], %153 {strides = array<i32>} : memref<98x144xbf16, #tpu.memory_space<vmem>>, vector<98x16xbf16>,
    %c2_163 = arith.constant 2 : index
    %c0_164 = arith.constant 0 : index
    %155 = vector.load %arg14[%c2_163, %c0_164] : memref<114x16xf32, #tpu.memory_space<vmem>>, vector<98x16xf32>
    %156 = arith.truncf %155 : vector<98x16xf32> to vector<98x16xbf16>
    %c0_165 = arith.constant 0 : index
    %c32_166 = arith.constant 32 : index
    %157 = vector.load %arg15[%c0_165, %c32_166] : memref<98x144xbf16, #tpu.memory_space<vmem>>, vector<98x16xbf16>
    tpu.vector_store %arg15[%c0_165, %c32_166], %156 {strides = array<i32>} : memref<98x144xbf16, #tpu.memory_space<vmem>>, vector<98x16xbf16>,
    %c7_167 = arith.constant 7 : index
    %c0_168 = arith.constant 0 : index
    %158 = vector.load %arg14[%c7_167, %c0_168] : memref<114x16xf32, #tpu.memory_space<vmem>>, vector<98x16xf32>
    %159 = arith.truncf %158 : vector<98x16xf32> to vector<98x16xbf16>
    %c0_169 = arith.constant 0 : index
    %c48_170 = arith.constant 48 : index
    %160 = vector.load %arg15[%c0_169, %c48_170] : memref<98x144xbf16, #tpu.memory_space<vmem>>, vector<98x16xbf16>
    tpu.vector_store %arg15[%c0_169, %c48_170], %159 {strides = array<i32>} : memref<98x144xbf16, #tpu.memory_space<vmem>>, vector<98x16xbf16>,
    %c8_171 = arith.constant 8 : index
    %c0_172 = arith.constant 0 : index
    %161 = vector.load %arg14[%c8_171, %c0_172] : memref<114x16xf32, #tpu.memory_space<vmem>>, vector<98x16xf32>
    %162 = arith.truncf %161 : vector<98x16xf32> to vector<98x16xbf16>
    %c0_173 = arith.constant 0 : index
    %c64_174 = arith.constant 64 : index
    %163 = vector.load %arg15[%c0_173, %c64_174] : memref<98x144xbf16, #tpu.memory_space<vmem>>, vector<98x16xbf16>
    tpu.vector_store %arg15[%c0_173, %c64_174], %162 {strides = array<i32>} : memref<98x144xbf16, #tpu.memory_space<vmem>>, vector<98x16xbf16>,
    %c9_175 = arith.constant 9 : index
    %c0_176 = arith.constant 0 : index
    %164 = vector.load %arg14[%c9_175, %c0_176] : memref<114x16xf32, #tpu.memory_space<vmem>>, vector<98x16xf32>
    %165 = arith.truncf %164 : vector<98x16xf32> to vector<98x16xbf16>
    %c0_177 = arith.constant 0 : index
    %c80_178 = arith.constant 80 : index
    %166 = vector.load %arg15[%c0_177, %c80_178] : memref<98x144xbf16, #tpu.memory_space<vmem>>, vector<98x16xbf16>
    tpu.vector_store %arg15[%c0_177, %c80_178], %165 {strides = array<i32>} : memref<98x144xbf16, #tpu.memory_space<vmem>>, vector<98x16xbf16>,
    %c14_179 = arith.constant 14 : index
    %c0_180 = arith.constant 0 : index
    %167 = vector.load %arg14[%c14_179, %c0_180] : memref<114x16xf32, #tpu.memory_space<vmem>>, vector<98x16xf32>
    %168 = arith.truncf %167 : vector<98x16xf32> to vector<98x16xbf16>
    %c0_181 = arith.constant 0 : index
    %c96_182 = arith.constant 96 : index
    %169 = vector.load %arg15[%c0_181, %c96_182] : memref<98x144xbf16, #tpu.memory_space<vmem>>, vector<98x16xbf16>
    tpu.vector_store %arg15[%c0_181, %c96_182], %168 {strides = array<i32>} : memref<98x144xbf16, #tpu.memory_space<vmem>>, vector<98x16xbf16>,
    %c15_183 = arith.constant 15 : index
    %c0_184 = arith.constant 0 : index
    %170 = vector.load %arg14[%c15_183, %c0_184] : memref<114x16xf32, #tpu.memory_space<vmem>>, vector<98x16xf32>
    %171 = arith.truncf %170 : vector<98x16xf32> to vector<98x16xbf16>
    %c0_185 = arith.constant 0 : index
    %c112_186 = arith.constant 112 : index
    %172 = vector.load %arg15[%c0_185, %c112_186] : memref<98x144xbf16, #tpu.memory_space<vmem>>, vector<98x16xbf16>
    tpu.vector_store %arg15[%c0_185, %c112_186], %171 {strides = array<i32>} : memref<98x144xbf16, #tpu.memory_space<vmem>>, vector<98x16xbf16>,
    %c16_187 = arith.constant 16 : index
    %c0_188 = arith.constant 0 : index
    %173 = vector.load %arg14[%c16_187, %c0_188] : memref<114x16xf32, #tpu.memory_space<vmem>>, vector<98x16xf32>
    %174 = arith.truncf %173 : vector<98x16xf32> to vector<98x16xbf16>
    %c0_189 = arith.constant 0 : index
    %c128_190 = arith.constant 128 : index
    %175 = vector.load %arg15[%c0_189, %c128_190] : memref<98x144xbf16, #tpu.memory_space<vmem>>, vector<98x16xbf16>
    tpu.vector_store %arg15[%c0_189, %c128_190], %174 {strides = array<i32>} : memref<98x144xbf16, #tpu.memory_space<vmem>>, vector<98x16xbf16>,
    %c0_191 = arith.constant 0 : index
    %c0_192 = arith.constant 0 : index
    %176 = vector.load %arg15[%c0_191, %c0_192] : memref<98x144xbf16, #tpu.memory_space<vmem>>, vector<98x144xbf16>
    %c0_193 = arith.constant 0 : index
    %c0_194 = arith.constant 0 : index
    %177 = vector.load %arg10[%c0_193, %c0_194] : memref<144x16xbf16, #tpu.memory_space<vmem>>, vector<144x16xbf16>
    %cst_195 = arith.constant dense<0.000000e+00> : vector<98x16xf32>
    %178 = tpu.matmul %176, %177, %cst_195 {dimension_numbers = #tpu.dot_dimension_numbers<[1], [0], [0], [1], [0, 0, 1, 1], [], []>} : vector<98x144xbf16>, vector<144x16xbf16>, vector<98x16xf32> -> vector<98x16xf32>
    %c0_196 = arith.constant 0 : index
    %c0_197 = arith.constant 0 : index
    %179 = vector.load %arg11[%c0_196, %c0_197] : memref<1x16xf32, #tpu.memory_space<vmem>>, vector<1x16xf32>
    %180 = vector.broadcast %179 : vector<1x16xf32> to vector<98x16xf32>
    %181 = arith.addf %178, %180 : vector<98x16xf32>
    %c0_198 = arith.constant 0 : index
    %c0_199 = arith.constant 0 : index
    %182 = vector.load %arg12[%c0_198, %c0_199] : memref<98x16xf32, #tpu.memory_space<vmem>>, vector<98x16xf32>
    tpu.vector_store %arg12[%c0_198, %c0_199], %181 {strides = array<i32>} : memref<98x16xf32, #tpu.memory_space<vmem>>, vector<98x16xf32>,
    return
  }
}

</mosaic_0001>

<bundles_post_ra>
// kernel: resnet18_client_forward.1
= control target key start
LH: loop header
LB: loop body
LE: loop exit
PB: predicated region body
PF: predicated region fallthrough
CT: control target
= control target key end

     0   :  { %vm615_vm0 = vcmask 1044480   ;;  %vm616_vm1 = vcmask 1045504   ;;  %v6448_v2 = vmov 65535   ;;  %vm446_vm2 = vcmask 220160   ;;  %s6451_s27 = smov 96   ;;  %s6452_s28 = smov 112   ;;  %s8496_s2 = inlined_call_operand.vmem [shape: bf16[27,16], index: 2, kind: input, shape index: {}]   ;;  %s8497_s0 = inlined_call_operand.vmem [shape: bf16[882,27], index: 0, kind: input, shape index: {}]   ;;  %s8498_s1 = inlined_call_operand.vmem [shape: f32[98,1], index: 1, kind: input, shape index: {}]   ;;  %s8499_s3 = inlined_call_operand.vmem [shape: f32[1,16], index: 3, kind: input, shape index: {}]   ;;  %s8500_s4 = inlined_call_operand.vmem [shape: bf16[144,16], index: 4, kind: input, shape index: {}]   ;;  %s8501_s5 = inlined_call_operand.vmem [shape: f32[1,16], index: 5, kind: input, shape index: {}]   ;;  %s8502_s6 = inlined_call_operand.vmem [shape: bf16[144,16], index: 6, kind: input, shape index: {}]   ;;  %s8503_s7 = inlined_call_operand.vmem [shape: f32[1,16], index: 7, kind: input, shape index: {}]   ;;  %s8504_s8 = inlined_call_operand.vmem [shape: bf16[144,16], index: 8, kind: input, shape index: {}]   ;;  %s8505_s9 = inlined_call_operand.vmem [shape: f32[1,16], index: 9, kind: input, shape index: {}]   ;;  %s8506_s10 = inlined_call_operand.vmem [shape: bf16[144,16], index: 10, kind: input, shape index: {}]   ;;  %s8507_s11 = inlined_call_operand.vmem [shape: f32[1,16], index: 11, kind: input, shape index: {}]   ;;  %s8508_s12 = inlined_call_operand.vmem [shape: f32[98,16], index: 12, kind: output, shape index: {}]  }
   0x1   :  { %v5861_v0 = vld [vmem:[%s8496_s2 + $0x8] sm:$0xf]  ;;  %v6339_v1 = vld [vmem:[%s8496_s2 + $0x8] sm:$0x30]  ;;  %v617_v3 = vsel %vm615_vm0, 4294967295, %v6448_v2  ;;  %v6338_v7 = vld [vmem:[%s8496_s2] sm:$0xff] }
   0x2   :  { %v5862_v4 = vor.u32 %v6339_v1, %v5861_v0  ;;  %v618_v5 = vsel %vm616_vm1, %v617_v3, 0  ;;  %v6283_v8 = vld [vmem:[%s8497_s0] sm:$0xff]  ;;  %v6317_v9 = vld [vmem:[%s8497_s0 + $0x110] sm:$0xff]  ;;  %v6284_v10 = vld [vmem:[%s8497_s0 + $0x8] sm:$0xff]  ;;  %vm910_vm3 = vcmask 130048   ;;  %v6449_v49 = vmov 0  }
   0x3   :  { %v6318_v11 = vld [vmem:[%s8497_s0 + $0x118] sm:$0xff]  ;;  %v6285_v12 = vld [vmem:[%s8497_s0 + $0x10] sm:$0xff]  ;;  %v6324_v13 = vld [vmem:[%s8497_s0 + $0x148] sm:$0xff]  ;;  %6440 = vset.pattern.permute.xlu0 %v6449_v49  ;;  %6441 = vset.pattern.permute.xlu1 %v6449_v49  ;;  %vm1021_vm4 = vcmask 123904   ;;  %vm1406_vm5 = vcmask 125952   ;;  %s6454_s2 = smov 48  }
   0x4   :  { %v620_v6 = vand.u32 %v5862_v4, %v618_v5  ;;  %v6286_v14 = vld [vmem:[%s8497_s0 + $0x18] sm:$0xff]  ;;  %v6319_v15 = vld [vmem:[%s8497_s0 + $0x120] sm:$0xff]  ;;  %v6325_v16 = vld [vmem:[%s8497_s0 + $0x150] sm:$0xff]  ;;  %6442 = vset.pattern.permute.xlu2 %v6449_v49  ;;  %v6450_v5 = vmov 0.0   ;;  %s6455_s13 = smov 32   ;;  %s6456_s14 = smov 16  }
   0x5   :  { %v6287_v17 = vld [vmem:[%s8497_s0 + $0x20] sm:$0xff]  ;;  %v6320_v18 = vld [vmem:[%s8497_s0 + $0x128] sm:$0xff]  ;;  %v6326_v19 = vld [vmem:[%s8497_s0 + $0x158] sm:$0xff]  ;;  %1274 = vst.msk [vmem:[#allocation3] sm:$0xff] %vm910_vm3, %v6450_v5  ;;  %vm1419_vm6 = vcmask 122880   ;;  %vm1499_vm7 = vcmask 257152  }
   0x6   :  { %628 = vmatpush.bf16.msra.mxu0 %v620_v6  ;;  %6425 = vmatpush.bf16.msra.mxu2 %v620_v6  ;;  %v6288_v20 = vld [vmem:[%s8497_s0 + $0x28] sm:$0xff]  ;;  %v6321_v21 = vld [vmem:[%s8497_s0 + $0x130] sm:$0xff]  ;;  %v6327_v22 = vld [vmem:[%s8497_s0 + $0x160] sm:$0xff]  ;;  %1275 = vst.msk [vmem:[#allocation3 + $0x6a] sm:$0xff] %vm910_vm3, %v6450_v5  ;;  %vm1592_vm8 = vcmask 388352   ;;  %vm1685_vm9 = vcmask 519552  }
   0x7   :  { %6426 = vmatpush.bf16.msra.mxu3 %v620_v6  ;;  %6424 = vmatpush.bf16.msra.mxu1 %v620_v6  ;;  %v6289_v23 = vld [vmem:[%s8497_s0 + $0x30] sm:$0xff]  ;;  %v6322_v24 = vld [vmem:[%s8497_s0 + $0x138] sm:$0xff]  ;;  %v6328_v25 = vld [vmem:[%s8497_s0 + $0x168] sm:$0xff]  ;;  %vm1778_vm10 = vcmask 650752   ;;  %vm1512_vm11 = vcmask 254080   ;;  %vm8512_vm12 = vcmask 385280  }
   0x8   :  { %v6290_v26 = vld [vmem:[%s8497_s0 + $0x38] sm:$0xff]  ;;  %v6323_v27 = vld [vmem:[%s8497_s0 + $0x140] sm:$0xff]  ;;  %v6329_v28 = vld [vmem:[%s8497_s0 + $0x170] sm:$0xff]  ;;  %vm8511_vm13 = vcmask 516480   ;;  %vm1791_vm14 = vcmask 647680   ;;  %vm1884_vm15 = vcmask 778880  }
   0x9   :  { %v6291_v29 = vld [vmem:[%s8497_s0 + $0x40] sm:$0xff]  ;;  %v6330_v31 = vld [vmem:[%s8497_s0 + $0x178] sm:$0xff]  ;;  %v6292_v33 = vld [vmem:[%s8497_s0 + $0x48] sm:$0xff]  ;;  %vm8510_vm0 = vcmask 910080   ;;  %vm8509_vm1 = vcmask 1041280  }
   0xa   :  { %629 = vmatpush.bf16.msra.mxu0 %v6338_v7  ;;  %6428 = vmatpush.bf16.msra.mxu2 %v6338_v7  ;;  %v6293_v38 = vld [vmem:[%s8497_s0 + $0x50] sm:$0xff]  ;;  %v6294_v43 = vld [vmem:[%s8497_s0 + $0x58] sm:$0xff]  ;;  %v6653_v50 = vld [vmem:[%s8498_s1] sm:$0xff] }
   0xb   :  { %6429 = vmatpush.bf16.msra.mxu3 %v6338_v7  ;;  %6427 = vmatpush.bf16.msra.mxu1 %v6338_v7  ;;  %v6295_v52 = vld [vmem:[%s8497_s0 + $0x60] sm:$0xff]  ;;  %v6666_v55 = vld [vmem:[%s8498_s1 + $0x8] sm:$0xff]  ;;  %v6675_v59 = vld [vmem:[%s8498_s1 + $0x30] sm:$0xff] }
   0xc   :  { %1291 = vperm.xlu0 %6440, %v6653_v50   ;;  %v6682_v60 = vld [vmem:[%s8498_s1 + $0x10] sm:$0xff]  ;;  %v6296_v62 = vld [vmem:[%s8497_s0 + $0x68] sm:$0xff]  ;;  %v6701_v2 = vld [vmem:[%s8498_s1 + $0x18] sm:$0xff] }
   0xd   :  { %5863 = vmatmul.msk.bf16.vlgmr.msra.gmra.mxu0 %vm446_vm2, %v6283_v8  ;;  %5897 = vmatmul.msk.bf16.vlgmr.msra.gmra.mxu2 %vm446_vm2, %v6317_v9  ;;  %v6694_v1 = vld [vmem:[%s8498_s1 + $0x48] sm:$0xff]  ;;  %v1288_v7 = vld [vmem:[%s8498_s1 + $0x60] sm:$0x3]  ;;  %v6714_v8 = vld [vmem:[%s8498_s1 + $0x38] sm:$0xff] }
   0xe   :  { %5904 = vmatmul.msk.bf16.vlgmr.msra.gmra.mxu3 %vm446_vm2, %v6324_v13  ;;  %1301 = vperm.xlu1 %6441, %v6682_v60  }
  0x14   :  { %1296 = vperm.xlu0 %6440, %v6666_v55  }
  0x16   :  { %1306 = vperm.xlu1 %6441, %v6701_v2  }
  0x1c   :  { %1321 = vperm.xlu0 %6440, %v6675_v59  }
  0x1d   :  { %5864 = vmatmul.msk.bf16.gmra.mxu0 %vm446_vm2, %v6284_v10  ;;  %5898 = vmatmul.msk.bf16.gmra.mxu2 %vm446_vm2, %v6318_v11  ;;  %v6297_v10 = vld [vmem:[%s8497_s0 + $0x70] sm:$0xff] }
  0x1e   :  { %5905 = vmatmul.msk.bf16.gmra.mxu3 %vm446_vm2, %v6325_v16  ;;  %1326 = vperm.xlu1 %6441, %v6714_v8  }
  0x24   :  { %1336 = vperm.xlu0 %6440, %v6694_v1  }
  0x2c   :  { %1351 = vperm.xlu0 %6440, %v1288_v7  }
  0x2d   :  { %5865 = vmatmul.msk.bf16.gmra.mxu0 %vm446_vm2, %v6285_v12  ;;  %5899 = vmatmul.msk.bf16.gmra.mxu2 %vm446_vm2, %v6319_v15  ;;  %v1898_v12 = vld [vmem:[#allocation3 + $0x6e] sm:$0x3]  ;;  %v6728_v15 = vld [vmem:[%s8498_s1 + $0x50] sm:$0xff] }
  0x2e   :  { %5906 = vmatmul.msk.bf16.gmra.mxu3 %vm446_vm2, %v6326_v19  ;;  %1341 = vperm.xlu1 %6441, %v6728_v15  }
  0x3d   :  { %5866 = vmatmul.msk.bf16.gmra.mxu0 %vm446_vm2, %v6286_v14  ;;  %5900 = vmatmul.msk.bf16.gmra.mxu2 %vm446_vm2, %v6320_v18  ;;  %v1911_v14 = vpack.c.bf16 %v1898_v12, %v1898_v12  ;;  %v1991_v18 = vld [vmem:[#allocation3 + $0x6f] sm:$0x3]  ;;  %v4555_v12 = vld [vmem:[%s8498_s1 + $0x60] sm:$0x3] }
  0x3e   :  { %5907 = vmatmul.msk.bf16.gmra.mxu3 %vm446_vm2, %v6327_v22  ;;  %v6331_v22 = vld [vmem:[%s8497_s0 + $0x180] sm:$0xff] }
  0x3f   :  { %1949 = vrot.lane.b32.xlu0 %v1911_v14, %s6451_s27 }
  0x47   :  { %2400 = vperm.xlu0 %6440, %v6666_v55  }
  0x4d   :  { %5867 = vmatmul.msk.bf16.gmra.mxu0 %vm446_vm2, %v6287_v17  ;;  %5901 = vmatmul.msk.bf16.gmra.mxu2 %vm446_vm2, %v6321_v21 }
  0x4e   :  { %5908 = vmatmul.msk.bf16.gmra.mxu3 %vm446_vm2, %v6328_v25 }
  0x5d   :  { %5868 = vmatmul.msk.bf16.gmra.mxu0 %vm446_vm2, %v6288_v20  ;;  %5902 = vmatmul.msk.bf16.gmra.mxu2 %vm446_vm2, %v6322_v24  ;;  %v2004_v20 = vpack.c.bf16 %v1991_v18, %v1991_v18  ;;  %v6298_v24 = vld [vmem:[%s8497_s0 + $0x78] sm:$0xff] }
  0x5e   :  { %5909 = vmatmul.msk.bf16.gmra.mxu3 %vm446_vm2, %v6329_v28 }
  0x5f   :  { %2042 = vrot.lane.b32.xlu1 %v2004_v20, %s6452_s28 }
  0x67   :  { %2405 = vperm.xlu1 %6441, %v6682_v60  }
  0x6d   :  { %5869 = vmatmul.msk.bf16.gmra.mxu0 %vm446_vm2, %v6289_v23  ;;  %5903 = vmatmul.msk.bf16.gmra.mxu2 %vm446_vm2, %v6323_v27  ;;  %v6312_v23 = vld [vmem:[%s8497_s0 + $0xe8] sm:$0xff]  ;;  %v6754_v27 = vld [vmem:[%s8498_s1 + $0x20] sm:$0xff] }
  0x6e   :  { %5910 = vmatmul.msk.bf16.gmra.mxu3 %vm446_vm2, %v6330_v31  ;;  %5892 = vmatmul.msk.bf16.vlgmr.msra.gmra.mxu1 %vm446_vm2, %v6312_v23  ;;  %v6766_v31 = vld [vmem:[%s8498_s1 + $0x28] sm:$0xff] }
  0x6f   :  { %1311 = vperm.xlu2 %6442, %v6754_v27   ;;  %2415 = vperm.xlu0 %6440, %v6754_v27  }
  0x70   :  { %2420 = vperm.xlu1 %6441, %v6766_v31  }
  0x77   :  { %2430 = vperm.xlu0 %6440, %v6714_v8   ;;  %1316 = vperm.xlu2 %6442, %v6766_v31  }
  0x7d   :  { %5870 = vmatmul.msk.bf16.gmra.mxu0 %vm446_vm2, %v6290_v26 }
  0x7e   :  { %5911 = vmatmul.msk.bf16.gmra.mxu3 %vm446_vm2, %v6331_v22  ;;  %v6306_v22 = vld [vmem:[%s8497_s0 + $0xb8] sm:$0xff] }
  0x7f   :  { %2445 = vperm.xlu0 %6440, %v6728_v15  }
  0x8a   :  { %v631_v30 = vpop.f32.mrf.mxu0 }
  0x8b   :  { %911 = vst.msk [vmem:[#allocation2] sm:$0xff] %vm910_vm3, %v631_v30 }
  0x8d   :  { %5871 = vmatmul.msk.bf16.gmra.mxu0 %vm446_vm2, %v6291_v29 }
  0x90   :  { %v801_v35 = vpop.f32.mrf.mxu2 }
  0x91   :  { %979 = vst.msk [vmem:[#allocation2 + $0x220] sm:$0xff] %vm910_vm3, %v801_v35  ;;  %v836_v42 = vpop.f32.mrf.mxu3 }
  0x92   :  { %v633_v32 = vpop.f32.mrf.mxu0  ;;  %993 = vst.msk [vmem:[#allocation2 + $0x290] sm:$0xff] %vm910_vm3, %v836_v42 }
  0x93   :  { %912 = vst.msk [vmem:[#allocation2 + $0x8] sm:$0xff] %vm910_vm3, %v633_v32 }
  0x98   :  { %v803_v37 = vpop.f32.mrf.mxu2 }
  0x99   :  { %980 = vst.msk [vmem:[#allocation2 + $0x228] sm:$0xff] %vm910_vm3, %v803_v37  ;;  %v838_v46 = vpop.f32.mrf.mxu3  ;;  %v6785_v37 = vld [vmem:[%s8498_s1 + $0x40] sm:$0xff] }
  0x9a   :  { %v636_v34 = vpop.f32.mrf.mxu0  ;;  %994 = vst.msk [vmem:[#allocation2 + $0x298] sm:$0xff] %vm910_vm3, %v838_v46  ;;  %2435 = vperm.xlu1 %6441, %v6785_v37   ;;  %1331 = vperm.xlu2 %6442, %v6785_v37   ;;  %v6300_v46 = vld [vmem:[%s8497_s0 + $0x88] sm:$0xff] }
  0x9b   :  { %913 = vst.msk [vmem:[#allocation2 + $0x10] sm:$0xff] %vm910_vm3, %v636_v34  ;;  %v6299_v34 = vld [vmem:[%s8497_s0 + $0x80] sm:$0xff] }
  0x9d   :  { %5872 = vmatmul.msk.bf16.gmra.mxu0 %vm446_vm2, %v6292_v33  ;;  %v6313_v33 = vld [vmem:[%s8497_s0 + $0xf0] sm:$0xff] }
  0x9e   :  { %5893 = vmatmul.msk.bf16.gmra.mxu1 %vm446_vm2, %v6313_v33 }
  0xa0   :  { %v806_v40 = vpop.f32.mrf.mxu2 }
  0xa1   :  { %981 = vst.msk [vmem:[#allocation2 + $0x230] sm:$0xff] %vm910_vm3, %v806_v40  ;;  %v841_v51 = vpop.f32.mrf.mxu3 }
  0xa2   :  { %v638_v36 = vpop.f32.mrf.mxu0  ;;  %995 = vst.msk [vmem:[#allocation2 + $0x2a0] sm:$0xff] %vm910_vm3, %v841_v51  ;;  %v6315_v51 = vld [vmem:[%s8497_s0 + $0x100] sm:$0xff] }
  0xa3   :  { %914 = vst.msk [vmem:[#allocation2 + $0x18] sm:$0xff] %vm910_vm3, %v638_v36 }
  0xa8   :  { %v808_v45 = vpop.f32.mrf.mxu2 }
  0xa9   :  { %982 = vst.msk [vmem:[#allocation2 + $0x238] sm:$0xff] %vm910_vm3, %v808_v45  ;;  %v843_v56 = vpop.f32.mrf.mxu3  ;;  %v6314_v45 = vld [vmem:[%s8497_s0 + $0xf8] sm:$0xff] }
  0xaa   :  { %v641_v39 = vpop.f32.mrf.mxu0  ;;  %996 = vst.msk [vmem:[#allocation2 + $0x2a8] sm:$0xff] %vm910_vm3, %v843_v56 }
  0xab   :  { %915 = vst.msk [vmem:[#allocation2 + $0x20] sm:$0xff] %vm910_vm3, %v641_v39  ;;  %v6332_v39 = vld [vmem:[%s8497_s0 + $0x188] sm:$0xff] }
  0xac   :  { %5912 = vmatmul.msk.bf16.gmra.mxu3 %vm446_vm2, %v6332_v39 }
  0xad   :  { %5873 = vmatmul.msk.bf16.gmra.mxu0 %vm446_vm2, %v6293_v38 }
  0xae   :  { %5894 = vmatmul.msk.bf16.gmra.mxu1 %vm446_vm2, %v6314_v45 }
  0xb0   :  { %v811_v48 = vpop.f32.mrf.mxu2 }
  0xb1   :  { %983 = vst.msk [vmem:[#allocation2 + $0x240] sm:$0xff] %vm910_vm3, %v811_v48  ;;  %v846_v61 = vpop.f32.mrf.mxu3  ;;  %v6333_v48 = vld [vmem:[%s8497_s0 + $0x190] sm:$0xff] }
  0xb2   :  { %v643_v41 = vpop.f32.mrf.mxu0  ;;  %997 = vst.msk [vmem:[#allocation2 + $0x2b0] sm:$0xff] %vm910_vm3, %v846_v61 }
  0xb3   :  { %916 = vst.msk [vmem:[#allocation2 + $0x28] sm:$0xff] %vm910_vm3, %v643_v41  ;;  %v3081_v41 = vld [vmem:[#allocation3 + $0x6f] sm:$0x3] }
  0xb4   :  { %v3094_v42 = vpack.c.bf16 %v3081_v41, %v3081_v41  ;;  %v6309_v41 = vld [vmem:[%s8497_s0 + $0xd0] sm:$0xff] }
  0xb6   :  { %3132 = vrot.lane.b32.xlu0 %v3094_v42, %s6452_s28 }
  0xb8   :  { %v813_v54 = vpop.f32.mrf.mxu2 }
  0xb9   :  { %984 = vst.msk [vmem:[#allocation2 + $0x248] sm:$0xff] %vm910_vm3, %v813_v54  ;;  %v848_v3 = vpop.f32.mrf.mxu3  ;;  %v6334_v54 = vld [vmem:[%s8497_s0 + $0x198] sm:$0xff] }
  0xba   :  { %v646_v44 = vpop.f32.mrf.mxu0  ;;  %998 = vst.msk [vmem:[#allocation2 + $0x2b8] sm:$0xff] %vm910_vm3, %v848_v3 }
  0xbb   :  { %917 = vst.msk [vmem:[#allocation2 + $0x30] sm:$0xff] %vm910_vm3, %v646_v44 }
  0xbc   :  { %5913 = vmatmul.msk.bf16.gmra.mxu3 %vm446_vm2, %v6333_v48  ;;  %v6310_v48 = vld [vmem:[%s8497_s0 + $0xd8] sm:$0xff] }
  0xbd   :  { %5874 = vmatmul.msk.bf16.gmra.mxu0 %vm446_vm2, %v6294_v43  ;;  %v6799_v43 = vld [vmem:[%s8498_s1 + $0x58] sm:$0xff] }
  0xbe   :  { %2450 = vperm.xlu1 %6441, %v6799_v43   ;;  %1346 = vperm.xlu2 %6442, %v6799_v43  }
  0xbf   :  { %3480 = vperm.xlu0 %6440, %v6682_v60   ;;  %5895 = vmatmul.msk.bf16.gmra.mxu1 %vm446_vm2, %v6315_v51 }
  0xc0   :  { %v816_v58 = vpop.f32.mrf.mxu2 }
  0xc1   :  { %985 = vst.msk [vmem:[#allocation2 + $0x250] sm:$0xff] %vm910_vm3, %v816_v58  ;;  %v851_v9 = vpop.f32.mrf.mxu3  ;;  %v6302_v58 = vld [vmem:[%s8497_s0 + $0x98] sm:$0xff] }
  0xc2   :  { %v648_v47 = vpop.f32.mrf.mxu0  ;;  %999 = vst.msk [vmem:[#allocation2 + $0x2c0] sm:$0xff] %vm910_vm3, %v851_v9 }
  0xc3   :  { %918 = vst.msk [vmem:[#allocation2 + $0x38] sm:$0xff] %vm910_vm3, %v648_v47 }
  0xc6   :  { %3470 = vperm.xlu1 %6441, %v6653_v50   ;;  %2395 = vperm.xlu2 %6442, %v6653_v50  }
  0xc7   :  { %3495 = vperm.xlu0 %6440, %v6766_v31  }
  0xc8   :  { %v818_v0 = vpop.f32.mrf.mxu2 }
  0xc9   :  { %986 = vst.msk [vmem:[#allocation2 + $0x258] sm:$0xff] %vm910_vm3, %v818_v0  ;;  %v853_v16 = vpop.f32.mrf.mxu3  ;;  %v6335_v0 = vld [vmem:[%s8497_s0 + $0x1a0] sm:$0xff] }
  0xca   :  { %v651_v53 = vpop.f32.mrf.mxu0  ;;  %1000 = vst.msk [vmem:[#allocation2 + $0x2c8] sm:$0xff] %vm910_vm3, %v853_v16  ;;  %v4156_v16 = vld [vmem:[#allocation3 + $0x6f] sm:$0x3] }
  0xcb   :  { %919 = vst.msk [vmem:[#allocation2 + $0x40] sm:$0xff] %vm910_vm3, %v651_v53  ;;  %v4169_v18 = vpack.c.bf16 %v4156_v16, %v4156_v16 }
  0xcc   :  { %5914 = vmatmul.msk.bf16.gmra.mxu3 %vm446_vm2, %v6334_v54 }
  0xcd   :  { %5875 = vmatmul.msk.bf16.gmra.mxu0 %vm446_vm2, %v6295_v52  ;;  %v6301_v52 = vld [vmem:[%s8497_s0 + $0x90] sm:$0xff] }
  0xce   :  { %3485 = vperm.xlu1 %6441, %v6701_v2   ;;  %2410 = vperm.xlu2 %6442, %v6701_v2  }
  0xcf   :  { %3510 = vperm.xlu0 %6440, %v6785_v37  }
  0xd0   :  { %v821_v6 = vpop.f32.mrf.mxu2 }
  0xd1   :  { %987 = vst.msk [vmem:[#allocation2 + $0x260] sm:$0xff] %vm910_vm3, %v821_v6  ;;  %v856_v21 = vpop.f32.mrf.mxu3  ;;  %v2990_v6 = vld [vmem:[#allocation3 + $0x6e] sm:$0x3] }
  0xd2   :  { %v653_v57 = vpop.f32.mrf.mxu0  ;;  %1001 = vst.msk [vmem:[#allocation2 + $0x2d0] sm:$0xff] %vm910_vm3, %v856_v21  ;;  %v3003_v7 = vpack.c.bf16 %v2990_v6, %v2990_v6 }
  0xd3   :  { %920 = vst.msk [vmem:[#allocation2 + $0x48] sm:$0xff] %vm910_vm3, %v653_v57  ;;  %v6316_v57 = vld [vmem:[%s8497_s0 + $0x108] sm:$0xff] }
  0xd4   :  { %5896 = vmatmul.msk.bf16.gmra.mxu1 %vm446_vm2, %v6316_v57  ;;  %v6311_v57 = vld [vmem:[%s8497_s0 + $0xe0] sm:$0xff] }
  0xd6   :  { %3500 = vperm.xlu1 %6441, %v6675_v59   ;;  %2425 = vperm.xlu2 %6442, %v6675_v59  }
  0xd7   :  { %3525 = vperm.xlu0 %6440, %v6799_v43  }
  0xd8   :  { %v823_v13 = vpop.f32.mrf.mxu2 }
  0xd9   :  { %988 = vst.msk [vmem:[#allocation2 + $0x268] sm:$0xff] %vm910_vm3, %v823_v13  ;;  %v858_v28 = vpop.f32.mrf.mxu3  ;;  %v6305_v13 = vld [vmem:[%s8497_s0 + $0xb0] sm:$0xff] }
  0xda   :  { %v656_v63 = vpop.f32.mrf.mxu0  ;;  %1002 = vst.msk [vmem:[#allocation2 + $0x2d8] sm:$0xff] %vm910_vm3, %v858_v28 }
  0xdb   :  { %921 = vst.msk [vmem:[#allocation2 + $0x50] sm:$0xff] %vm910_vm3, %v656_v63  ;;  %v2392_v63 = vld [vmem:[%s8498_s1 + $0x60] sm:$0x3] }
  0xdc   :  { %5915 = vmatmul.msk.bf16.gmra.mxu3 %vm446_vm2, %v6335_v0 }
  0xdd   :  { %5876 = vmatmul.msk.bf16.gmra.mxu0 %vm446_vm2, %v6296_v62  ;;  %v3467_v62 = vld [vmem:[%s8498_s1 + $0x60] sm:$0x3]  ;;  %s6457_s1 = smov 80  }
  0xde   :  { %3515 = vperm.xlu1 %6441, %v6694_v1   ;;  %2440 = vperm.xlu2 %6442, %v6694_v1  }
  0xdf   :  { %4558 = vperm.xlu0 %6440, %v6653_v50   ;;  %v6303_v50 = vld [vmem:[%s8497_s0 + $0xa0] sm:$0xff] }
  0xe0   :  { %v826_v19 = vpop.f32.mrf.mxu2 }
  0xe1   :  { %989 = vst.msk [vmem:[#allocation2 + $0x270] sm:$0xff] %vm910_vm3, %v826_v19  ;;  %v861_v32 = vpop.f32.mrf.mxu3 }
  0xe2   :  { %v658_v4 = vpop.f32.mrf.mxu0  ;;  %1003 = vst.msk [vmem:[#allocation2 + $0x2e0] sm:$0xff] %vm910_vm3, %v861_v32 }
  0xe3   :  { %922 = vst.msk [vmem:[#allocation2 + $0x58] sm:$0xff] %vm910_vm3, %v658_v4  ;;  %v4065_v4 = vld [vmem:[#allocation3 + $0x6e] sm:$0x3] }
  0xe4   :  { %v4078_v5 = vpack.c.bf16 %v4065_v4, %v4065_v4  ;;  %v6980_v4 = vpop.permute.xlu1 %1301 }
  0xe6   :  { %3530 = vperm.xlu1 %6441, %v3467_v62   ;;  %2455 = vperm.xlu2 %6442, %v2392_v63   ;;  %v6975_v62 = vpop.permute.xlu2 %1311 }
  0xe7   :  { %4573 = vperm.xlu0 %6440, %v6701_v2   ;;  %v6336_v2 = vld [vmem:[%s8497_s0 + $0x1a8] sm:$0xff] }
  0xe8   :  { %v828_v26 = vpop.f32.mrf.mxu2 }
  0xe9   :  { %990 = vst.msk [vmem:[#allocation2 + $0x278] sm:$0xff] %vm910_vm3, %v828_v26  ;;  %v863_v38 = vpop.f32.mrf.mxu3 }
  0xea   :  { %v661_v11 = vpop.f32.mrf.mxu0  ;;  %1004 = vst.msk [vmem:[#allocation2 + $0x2e8] sm:$0xff] %vm910_vm3, %v863_v38 }
  0xeb   :  { %923 = vst.msk [vmem:[#allocation2 + $0x60] sm:$0xff] %vm910_vm3, %v661_v11  ;;  %v776_v21 = vpop.f32.mrf.mxu1 }
  0xec   :  { %5916 = vmatmul.msk.bf16.gmra.mxu3 %vm446_vm2, %v6336_v2  ;;  %969 = vst.msk [vmem:[#allocation2 + $0x1d0] sm:$0xff] %vm910_vm3, %v776_v21 }
  0xed   :  { %5877 = vmatmul.msk.bf16.gmra.mxu0 %vm446_vm2, %v6297_v10 }
  0xee   :  { %4116 = vrot.lane.b32.xlu1 %v4078_v5, %s6451_s27  ;;  %3041 = vrot.lane.b32.xlu2 %v3003_v7, %s6451_s27  ;;  %v6983_v5 = vpop.permute.xlu2 %1316 }
  0xef   :  { %4588 = vperm.xlu0 %6440, %v6675_v59   ;;  %v6304_v59 = vld [vmem:[%s8497_s0 + $0xa8] sm:$0xff] }
  0xf0   :  { %v831_v30 = vpop.f32.mrf.mxu2 }
  0xf1   :  { %991 = vst.msk [vmem:[#allocation2 + $0x280] sm:$0xff] %vm910_vm3, %v831_v30  ;;  %v866_v44 = vpop.f32.mrf.mxu3 }
  0xf2   :  { %v663_v17 = vpop.f32.mrf.mxu0  ;;  %1005 = vst.msk [vmem:[#allocation2 + $0x2f0] sm:$0xff] %vm910_vm3, %v866_v44 }
  0xf3   :  { %924 = vst.msk [vmem:[#allocation2 + $0x68] sm:$0xff] %vm910_vm3, %v663_v17 }
  0xf6   :  { %4563 = vperm.xlu1 %6441, %v6666_v55   ;;  %3475 = vperm.xlu2 %6442, %v6666_v55   ;;  %v6337_v55 = vld [vmem:[%s8497_s0 + $0x1b0] sm:$0xff] }
  0xf7   :  { %4603 = vperm.xlu0 %6440, %v6694_v1  }
  0xf8   :  { %v833_v36 = vpop.f32.mrf.mxu2 }
  0xf9   :  { %992 = vst.msk [vmem:[#allocation2 + $0x288] sm:$0xff] %vm910_vm3, %v833_v36  ;;  %v868_v20 = vpop.f32.mrf.mxu3 }
  0xfa   :  { %v666_v25 = vpop.f32.mrf.mxu0  ;;  %1006 = vst.msk [vmem:[#allocation2 + $0x2f8] sm:$0xff] %vm910_vm3, %v868_v20 }
  0xfb   :  { %925 = vst.msk [vmem:[#allocation2 + $0x70] sm:$0xff] %vm910_vm3, %v666_v25  ;;  %v778_v25 = vpop.f32.mrf.mxu1 }
  0xfc   :  { %5917 = vmatmul.msk.bf16.gmra.mxu3 %vm446_vm2, %v6337_v55  ;;  %970 = vst.msk [vmem:[#allocation2 + $0x1d8] sm:$0xff] %vm910_vm3, %v778_v25 }
  0xfd   :  { %5878 = vmatmul.msk.bf16.gmra.mxu0 %vm446_vm2, %v6298_v24 }
  0xfe   :  { %4578 = vperm.xlu1 %6441, %v6754_v27   ;;  %3490 = vperm.xlu2 %6442, %v6754_v27   ;;  %v6307_v27 = vld [vmem:[%s8497_s0 + $0xc0] sm:$0xff] }
  0xff   :  { %4613 = vperm.xlu0 %6440, %v6799_v43  }
 0x101   :  { %v871_v24 = vpop.f32.mrf.mxu3 }
 0x102   :  { %v668_v29 = vpop.f32.mrf.mxu0  ;;  %1007 = vst.msk [vmem:[#allocation2 + $0x300] sm:$0xff] %vm910_vm3, %v871_v24 }
 0x103   :  { %926 = vst.msk [vmem:[#allocation2 + $0x78] sm:$0xff] %vm910_vm3, %v668_v29 }
 0x106   :  { %4593 = vperm.xlu1 %6441, %v6714_v8   ;;  %3505 = vperm.xlu2 %6442, %v6714_v8   ;;  %v152_v8 = vld [vmem:[%s8497_s0 + $0x1b8] sm:$0x1] }
 0x107   :  { %4618 = vperm.xlu0 %6440, %v4555_v12   ;;  %v378_v17 = vunpack.c.l.b16 %v152_v8 }
 0x109   :  { %v434_v19 = vpack.c.b16 %v378_v17, %v378_v17  ;;  %v873_v29 = vpop.f32.mrf.mxu3 }
 0x10a   :  { %v671_v35 = vpop.f32.mrf.mxu0  ;;  %1008 = vst.msk [vmem:[#allocation2 + $0x308] sm:$0xff] %vm910_vm3, %v873_v29 }
 0x10b   :  { %927 = vst.msk [vmem:[#allocation2 + $0x80] sm:$0xff] %vm910_vm3, %v671_v35 }
 0x10c   :  { %5918 = vmatmul.msk.bf16.gmra.mxu3 %vm446_vm2, %v434_v19 }
 0x10d   :  { %5879 = vmatmul.msk.bf16.gmra.mxu0 %vm446_vm2, %v6299_v34  ;;  %v6308_v34 = vld [vmem:[%s8497_s0 + $0xc8] sm:$0xff] }
 0x10e   :  { %4608 = vperm.xlu1 %6441, %v6728_v15   ;;  %3520 = vperm.xlu2 %6442, %v6728_v15  }
 0x112   :  { %v673_v40 = vpop.f32.mrf.mxu0 }
 0x113   :  { %928 = vst.msk [vmem:[#allocation2 + $0x88] sm:$0xff] %vm910_vm3, %v673_v40 }
 0x116   :  { %4207 = vrot.lane.b32.xlu2 %v4169_v18, %s6452_s28 }
 0x11a   :  { %v676_v47 = vpop.f32.mrf.mxu0 }
 0x11b   :  { %929 = vst.msk [vmem:[#allocation2 + $0x90] sm:$0xff] %vm910_vm3, %v676_v47 }
 0x11d   :  { %5880 = vmatmul.msk.bf16.gmra.mxu0 %vm446_vm2, %v6300_v46 }
 0x11e   :  { %4568 = vperm.xlu2 %6442, %v6682_v60   ;;  %v781_v60 = vpop.f32.mrf.mxu1 }
 0x11f   :  { %971 = vst.msk [vmem:[#allocation2 + $0x1e0] sm:$0xff] %vm910_vm3, %v781_v60  ;;  %v1036_v60 = vld [vmem:[#allocation2 + $0x62] sm:$0xff] }
 0x122   :  { %v678_v49 = vpop.f32.mrf.mxu0 }
 0x123   :  { %930 = vst.msk [vmem:[#allocation2 + $0x98] sm:$0xff] %vm910_vm3, %v678_v49 }
 0x126   :  { %4583 = vperm.xlu2 %6442, %v6766_v31   ;;  %v783_v30 = vpop.f32.mrf.mxu1 }
 0x127   :  { %972 = vst.msk [vmem:[#allocation2 + $0x1e8] sm:$0xff] %vm910_vm3, %v783_v30 }
 0x12a   :  { %v681_v53 = vpop.f32.mrf.mxu0 }
 0x12b   :  { %931 = vst.msk [vmem:[#allocation2 + $0xa0] sm:$0xff] %vm910_vm3, %v681_v53 }
 0x12d   :  { %5881 = vmatmul.msk.bf16.gmra.mxu0 %vm446_vm2, %v6301_v52 }
 0x12e   :  { %4598 = vperm.xlu2 %6442, %v6785_v37   ;;  %v786_v33 = vpop.f32.mrf.mxu1 }
 0x12f   :  { %v876_v32 = vpop.f32.mrf.mxu3  ;;  %973 = vst.msk [vmem:[#allocation2 + $0x1f0] sm:$0xff] %vm910_vm3, %v786_v33 }
 0x130   :  { %1009 = vst.msk [vmem:[#allocation2 + $0x310] sm:$0xff] %vm910_vm3, %v876_v32  ;;  %v1023_v32 = vld [vmem:[#allocation2] sm:$0xff] }
 0x132   :  { %v683_v56 = vpop.f32.mrf.mxu0 }
 0x133   :  { %932 = vst.msk [vmem:[#allocation2 + $0xa8] sm:$0xff] %vm910_vm3, %v683_v56  ;;  %v6967_v56 = vpop.permute.xlu0 %1291 }
 0x136   :  { %v788_v37 = vpop.f32.mrf.mxu1 }
 0x137   :  { %v878_v36 = vpop.f32.mrf.mxu3  ;;  %974 = vst.msk [vmem:[#allocation2 + $0x1f8] sm:$0xff] %vm910_vm3, %v788_v37 }
 0x138   :  { %1010 = vst.msk [vmem:[#allocation2 + $0x318] sm:$0xff] %vm910_vm3, %v878_v36 }
 0x13a   :  { %v686_v61 = vpop.f32.mrf.mxu0 }
 0x13b   :  { %933 = vst.msk [vmem:[#allocation2 + $0xb0] sm:$0xff] %vm910_vm3, %v686_v61  ;;  %v6977_v0 = vpop.permute.xlu0 %1296 }
 0x13d   :  { %5882 = vmatmul.msk.bf16.gmra.mxu0 %vm446_vm2, %v6302_v58 }
 0x13e   :  { %v791_v40 = vpop.f32.mrf.mxu1 }
 0x13f   :  { %v881_v39 = vpop.f32.mrf.mxu3  ;;  %975 = vst.msk [vmem:[#allocation2 + $0x200] sm:$0xff] %vm910_vm3, %v791_v40 }
 0x140   :  { %1011 = vst.msk [vmem:[#allocation2 + $0x320] sm:$0xff] %vm910_vm3, %v881_v39  ;;  %v1166_v39 = vld [vmem:[#allocation2 + $0x24c] sm:$0xff] }
 0x142   :  { %v688_v3 = vpop.f32.mrf.mxu0  ;;  %v1045_v20 = vld [vmem:[#allocation2 + $0xaa] sm:$0xff] }
 0x143   :  { %934 = vst.msk [vmem:[#allocation2 + $0xb8] sm:$0xff] %vm910_vm3, %v688_v3 }
 0x146   :  { %v793_v44 = vpop.f32.mrf.mxu1 }
 0x147   :  { %v883_v43 = vpop.f32.mrf.mxu3  ;;  %976 = vst.msk [vmem:[#allocation2 + $0x208] sm:$0xff] %vm910_vm3, %v793_v44  ;;  %v1175_v44 = vld [vmem:[#allocation2 + $0x294] sm:$0xff] }
 0x148   :  { %1012 = vst.msk [vmem:[#allocation2 + $0x328] sm:$0xff] %vm910_vm3, %v883_v43 }
 0x14a   :  { %v691_v9 = vpop.f32.mrf.mxu0  ;;  %v1046_v33 = vld [vmem:[#allocation2 + $0xb2] sm:$0xff] }
 0x14b   :  { %935 = vst.msk [vmem:[#allocation2 + $0xc0] sm:$0xff] %vm910_vm3, %v691_v9  ;;  %v6989_v9 = vpop.permute.xlu1 %1306 }
 0x14d   :  { %5883 = vmatmul.msk.bf16.gmra.mxu0 %vm446_vm2, %v6303_v50  ;;  %v6986_v50 = vpop.permute.xlu0 %1321 }
 0x14f   :  { %v886_v46 = vpop.f32.mrf.mxu3 }
 0x150   :  { %1013 = vst.msk [vmem:[#allocation2 + $0x330] sm:$0xff] %vm910_vm3, %v886_v46  ;;  %v1037_v46 = vld [vmem:[#allocation2 + $0x6a] sm:$0xff] }
 0x151   :  { %v796_v47 = vpop.f32.mrf.mxu1 }
 0x152   :  { %v693_v10 = vpop.f32.mrf.mxu0  ;;  %977 = vst.msk [vmem:[#allocation2 + $0x210] sm:$0xff] %vm910_vm3, %v796_v47 }
 0x153   :  { %936 = vst.msk [vmem:[#allocation2 + $0xc8] sm:$0xff] %vm910_vm3, %v693_v10  ;;  %v6992_v10 = vpop.permute.xlu2 %1331  ;;  %v6997_v55 = vpop.permute.xlu1 %1326 }
 0x157   :  { %v888_v51 = vpop.f32.mrf.mxu3 }
 0x158   :  { %1014 = vst.msk [vmem:[#allocation2 + $0x338] sm:$0xff] %vm910_vm3, %v888_v51  ;;  %v1192_v51 = vld [vmem:[#allocation2 + $0x2ae] sm:$0xff] }
 0x159   :  { %v798_v52 = vpop.f32.mrf.mxu1 }
 0x15a   :  { %v696_v11 = vpop.f32.mrf.mxu0  ;;  %978 = vst.msk [vmem:[#allocation2 + $0x218] sm:$0xff] %vm910_vm3, %v798_v52  ;;  %v1201_v52 = vld [vmem:[#allocation2 + $0x2f6] sm:$0xff] }
 0x15b   :  { %937 = vst.msk [vmem:[#allocation2 + $0xd0] sm:$0xff] %vm910_vm3, %v696_v11  ;;  %v6995_v11 = vpop.permute.xlu0 %1336  ;;  %v7005_v16 = vpop.permute.xlu1 %1341 }
 0x15d   :  { %5884 = vmatmul.msk.bf16.gmra.mxu0 %vm446_vm2, %v6304_v59 }
 0x15f   :  { %v891_v54 = vpop.f32.mrf.mxu3 }
 0x160   :  { %1015 = vst.msk [vmem:[#allocation2 + $0x340] sm:$0xff] %vm910_vm3, %v891_v54 }
 0x162   :  { %v698_v1 = vpop.f32.mrf.mxu0 }
 0x163   :  { %938 = vst.msk [vmem:[#allocation2 + $0xd8] sm:$0xff] %vm910_vm3, %v698_v1 }
 0x167   :  { %v893_v61 = vpop.f32.mrf.mxu3 }
 0x168   :  { %1016 = vst.msk [vmem:[#allocation2 + $0x348] sm:$0xff] %vm910_vm3, %v893_v61 }
 0x16a   :  { %v701_v14 = vpop.f32.mrf.mxu0 }
 0x16b   :  { %939 = vst.msk [vmem:[#allocation2 + $0xe0] sm:$0xff] %vm910_vm3, %v701_v14  ;;  %v7003_v14 = vpop.permute.xlu0 %1351 }
 0x16d   :  { %5885 = vmatmul.msk.bf16.gmra.mxu0 %vm446_vm2, %v6305_v13  ;;  %v7001_v13 = vpop.permute.xlu2 %1346 }
 0x16f   :  { %v896_v3 = vpop.f32.mrf.mxu3 }
 0x170   :  { %1017 = vst.msk [vmem:[#allocation2 + $0x350] sm:$0xff] %vm910_vm3, %v896_v3 }
 0x172   :  { %v703_v15 = vpop.f32.mrf.mxu0 }
 0x173   :  { %940 = vst.msk [vmem:[#allocation2 + $0xe8] sm:$0xff] %vm910_vm3, %v703_v15  ;;  %v7011_v15 = vpop.permute.xlu0 %1949 }
 0x175   :  { %v7009_v18 = vpop.permute.xlu2 %2395 }
 0x177   :  { %v898_v7 = vpop.f32.mrf.mxu3 }
 0x178   :  { %1018 = vst.msk [vmem:[#allocation2 + $0x358] sm:$0xff] %vm910_vm3, %v898_v7 }
 0x17a   :  { %v706_v23 = vpop.f32.mrf.mxu0 }
 0x17b   :  { %941 = vst.msk [vmem:[#allocation2 + $0xf0] sm:$0xff] %vm910_vm3, %v706_v23  ;;  %v1032_v23 = vld [vmem:[#allocation2 + $0x48] sm:$0xff]  ;;  %v7019_v36 = vpop.permute.xlu0 %2400 }
 0x17c   :  { %v1058_v25 = vmax.f32 %v1032_v23, %v1045_v20 }
 0x17d   :  { %5886 = vmatmul.msk.bf16.gmra.mxu0 %vm446_vm2, %v6306_v22  ;;  %v7014_v22 = vpop.permute.xlu1 %2042 }
 0x17f   :  { %v901_v59 = vpop.f32.mrf.mxu3 }
 0x180   :  { %1019 = vst.msk [vmem:[#allocation2 + $0x360] sm:$0xff] %vm910_vm3, %v901_v59  ;;  %v1124_v59 = vld [vmem:[#allocation2 + $0x1d8] sm:$0xff] }
 0x182   :  { %v708_v26 = vpop.f32.mrf.mxu0 }
 0x183   :  { %942 = vst.msk [vmem:[#allocation2 + $0xf8] sm:$0xff] %vm910_vm3, %v708_v26 }
 0x187   :  { %v903_v12 = vpop.f32.mrf.mxu3 }
 0x188   :  { %1020 = vst.msk [vmem:[#allocation2 + $0x368] sm:$0xff] %vm910_vm3, %v903_v12  ;;  %v1227_v12 = vld [vmem:[#allocation2 + $0x358] sm:$0xff] }
 0x18a   :  { %v711_v28 = vpop.f32.mrf.mxu0 }
 0x18b   :  { %943 = vst.msk [vmem:[#allocation2 + $0x100] sm:$0xff] %vm910_vm3, %v711_v28  ;;  %v7016_v28 = vpop.permute.xlu2 %2410 }
 0x18d   :  { %5887 = vmatmul.msk.bf16.gmra.mxu0 %vm446_vm2, %v6307_v27  ;;  %v1123_v27 = vld [vmem:[#allocation2 + $0x1d0] sm:$0xff] }
 0x18f   :  { %v906_v17 = vpop.f32.mrf.mxu3 }
 0x190   :  { %1022 = vst.msk [vmem:[#allocation2 + $0x370] sm:$0x3] %vm1021_vm4, %v906_v17  ;;  %v1167_v17 = vld [vmem:[#allocation2 + $0x254] sm:$0xff] }
 0x192   :  { %v713_v31 = vpop.f32.mrf.mxu0 }
 0x193   :  { %944 = vst.msk [vmem:[#allocation2 + $0x108] sm:$0xff] %vm910_vm3, %v713_v31 }
 0x197   :  { %v908_v21 = vpop.f32.mrf.mxu3 }
 0x19a   :  { %v716_v35 = vpop.f32.mrf.mxu0 }
 0x19b   :  { %945 = vst.msk [vmem:[#allocation2 + $0x110] sm:$0xff] %vm910_vm3, %v716_v35  ;;  %v1049_v35 = vmax.f32 %v1023_v32, %v1036_v60 }
 0x19d   :  { %5888 = vmatmul.msk.bf16.gmra.mxu0 %vm446_vm2, %v6308_v34  ;;  %v1149_v34 = vld [vmem:[#allocation2 + $0x232] sm:$0xff]  ;;  %v1075_v47 = vmax.f32 %v1049_v35, %v1166_v39 }
 0x1a2   :  { %v718_v38 = vpop.f32.mrf.mxu0  ;;  %v1071_v24 = vld [vmem:[#allocation2 + $0x10c] sm:$0xff] }
 0x1a3   :  { %946 = vst.msk [vmem:[#allocation2 + $0x118] sm:$0xff] %vm910_vm3, %v718_v38  ;;  %v1084_v26 = vmax.f32 %v1058_v25, %v1071_v24  ;;  %v1033_v38 = vld [vmem:[#allocation2 + $0x50] sm:$0xff]  ;;  %v1035_v24 = vld [vmem:[#allocation2 + $0x60] sm:$0x3] }
 0x1aa   :  { %v721_v42 = vpop.f32.mrf.mxu0  ;;  %v1072_v40 = vld [vmem:[#allocation2 + $0x114] sm:$0xff] }
 0x1ab   :  { %947 = vst.msk [vmem:[#allocation2 + $0x120] sm:$0xff] %vm910_vm3, %v721_v42  ;;  %v7021_v42 = vpop.permute.xlu1 %2405 }
 0x1ad   :  { %5889 = vmatmul.msk.bf16.gmra.mxu0 %vm446_vm2, %v6309_v41  ;;  %v1059_v41 = vmax.f32 %v1033_v38, %v1046_v33  ;;  %v1202_v38 = vld [vmem:[#allocation2 + $0x2fe] sm:$0xff] }
 0x1b2   :  { %v723_v45 = vpop.f32.mrf.mxu0  ;;  %v1073_v20 = vld [vmem:[#allocation2 + $0x11c] sm:$0xff] }
 0x1b3   :  { %948 = vst.msk [vmem:[#allocation2 + $0x128] sm:$0xff] %vm910_vm3, %v723_v45  ;;  %v1024_v45 = vld [vmem:[#allocation2 + $0x8] sm:$0xff] }
 0x1b4   :  { %v1050_v7 = vmax.f32 %v1024_v45, %v1037_v46  ;;  %v1218_v45 = vld [vmem:[#allocation2 + $0x310] sm:$0xff]  ;;  %v1126_v46 = vld [vmem:[#allocation2 + $0x1e8] sm:$0x3] }
 0x1b6   :  { %v1076_v35 = vmax.f32 %v1050_v7, %v1167_v17 }
 0x1ba   :  { %v726_v49 = vpop.f32.mrf.mxu0  ;;  %v1088_v60 = vld [vmem:[#allocation2 + $0x126] sm:$0xff] }
 0x1bb   :  { %949 = vst.msk [vmem:[#allocation2 + $0x130] sm:$0xff] %vm910_vm3, %v726_v49 }
 0x1bd   :  { %5890 = vmatmul.msk.bf16.gmra.mxu0 %vm446_vm2, %v6310_v48  ;;  %v1085_v48 = vmax.f32 %v1059_v41, %v1072_v40  ;;  %v7034_v40 = vpop.permute.xlu1 %2420 }
 0x1c2   :  { %v728_v53 = vpop.f32.mrf.mxu0 }
 0x1c3   :  { %950 = vst.msk [vmem:[#allocation2 + $0x138] sm:$0xff] %vm910_vm3, %v728_v53 }
 0x1ca   :  { %v731_v58 = vpop.f32.mrf.mxu0 }
 0x1cb   :  { %951 = vst.msk [vmem:[#allocation2 + $0x140] sm:$0xff] %vm910_vm3, %v731_v58  ;;  %v1048_v58 = vld [vmem:[#allocation2 + $0xc2] sm:$0x3] }
 0x1cd   :  { %5891 = vmatmul.msk.bf16.gmra.mxu0 %vm446_vm2, %v6311_v57  ;;  %v1047_v57 = vld [vmem:[#allocation2 + $0xba] sm:$0xff]  ;;  %vm1871_vm2 = vcmask 781952  }
 0x1d2   :  { %v733_v63 = vpop.f32.mrf.mxu0 }
 0x1d3   :  { %952 = vst.msk [vmem:[#allocation2 + $0x148] sm:$0xff] %vm910_vm3, %v733_v63  ;;  %v7026_v63 = vld [vmem:[%s8499_s3] ss:$0 sm:$0xff]  ;;  %s6453_s3 = smov 64  }
 0x1da   :  { %v736_v6 = vpop.f32.mrf.mxu0 }
 0x1db   :  { %953 = vst.msk [vmem:[#allocation2 + $0x150] sm:$0xff] %vm910_vm3, %v736_v6  ;;  %v1150_v6 = vld [vmem:[#allocation2 + $0x23a] sm:$0xff] }
 0x1e2   :  { %v738_v2 = vpop.f32.mrf.mxu0 }
 0x1e3   :  { %954 = vst.msk [vmem:[#allocation2 + $0x158] sm:$0xff] %vm910_vm3, %v738_v2  ;;  %v1062_v2 = vld [vmem:[#allocation2 + $0xc4] sm:$0xff] }
 0x1ea   :  { %v741_v1 = vpop.f32.mrf.mxu0 }
 0x1eb   :  { %955 = vst.msk [vmem:[#allocation2 + $0x160] sm:$0xff] %vm910_vm3, %v741_v1  ;;  %v7029_v1 = vpop.permute.xlu2 %2425 }
 0x1f2   :  { %v743_v8 = vpop.f32.mrf.mxu0 }
 0x1f3   :  { %956 = vst.msk [vmem:[#allocation2 + $0x168] sm:$0xff] %vm910_vm3, %v743_v8  ;;  %v1034_v8 = vld [vmem:[#allocation2 + $0x58] sm:$0xff] }
 0x1f4   :  { %v1060_v25 = vmax.f32 %v1034_v8, %v1047_v57  ;;  %v1063_v57 = vld [vmem:[#allocation2 + $0xcc] sm:$0xff] }
 0x1f5   :  { %v1089_v8 = vld [vmem:[#allocation2 + $0x12e] sm:$0xff] }
 0x1f6   :  { %v1086_v39 = vmax.f32 %v1060_v25, %v1073_v20  ;;  %v1140_v25 = vld [vmem:[#allocation2 + $0x1ea] sm:$0xff] }
 0x1fa   :  { %v746_v19 = vpop.f32.mrf.mxu0 }
 0x1fb   :  { %957 = vst.msk [vmem:[#allocation2 + $0x170] sm:$0xff] %vm910_vm3, %v746_v19  ;;  %v1101_v19 = vmax.f32 %v1075_v47, %v1192_v51 }
 0x202   :  { %v1097_v29 = vld [vmem:[#allocation2 + $0x16e] sm:$0xff]  ;;  %v748_v30 = vpop.f32.mrf.mxu0 }
 0x203   :  { %v1110_v31 = vmax.f32 %v1084_v26, %v1097_v29  ;;  %958 = vst.msk [vmem:[#allocation2 + $0x178] sm:$0xff] %vm910_vm3, %v748_v30  ;;  %v1074_v26 = vld [vmem:[#allocation2 + $0x124] sm:$0x3]  ;;  %v1127_v29 = vmax.f32 %v1101_v19, %v1062_v2  ;;  %v1193_v30 = vld [vmem:[#allocation2 + $0x2b6] sm:$0xff] }
 0x204   :  { %v1102_v2 = vmax.f32 %v1076_v35, %v1193_v30  ;;  %v1177_v30 = vld [vmem:[#allocation2 + $0x2a4] sm:$0xff] }
 0x205   :  { %v1136_v37 = vmax.f32 %v1110_v31, %v1123_v27  ;;  %v1061_v27 = vmax.f32 %v1035_v24, %v1048_v58  ;;  %v7031_v31 = vpop.permute.xlu0 %2415  ;;  %v7039_v24 = vpop.permute.xlu2 %2440 }
 0x207   :  { %v1162_v43 = vmax.f32 %v1136_v37, %v1149_v34  ;;  %v1038_v34 = vld [vmem:[#allocation2 + $0x72] sm:$0xff]  ;;  %v1176_v37 = vld [vmem:[#allocation2 + $0x29c] sm:$0xff]  ;;  %v1087_v41 = vmax.f32 %v1061_v27, %v1074_v26  ;;  %v1152_v26 = vld [vmem:[#allocation2 + $0x24a] sm:$0x3] }
 0x209   :  { %v1188_v49 = vmax.f32 %v1162_v43, %v1175_v44  ;;  %v1125_v43 = vld [vmem:[#allocation2 + $0x1e0] sm:$0xff]  ;;  %v1153_v44 = vmax.f32 %v1127_v29, %v1088_v60 }
 0x20a   :  { %v1098_v53 = vld [vmem:[#allocation2 + $0x176] sm:$0xff]  ;;  %v751_v54 = vpop.f32.mrf.mxu0 }
 0x20b   :  { %v1214_v61 = vmax.f32 %v1188_v49, %v1201_v52  ;;  %v1111_v3 = vmax.f32 %v1085_v48, %v1098_v53  ;;  %959 = vst.msk [vmem:[#allocation2 + $0x180] sm:$0xff] %vm910_vm3, %v751_v54  ;;  %v1228_v49 = vld [vmem:[#allocation2 + $0x360] sm:$0xff]  ;;  %v1025_v54 = vld [vmem:[#allocation2 + $0x10] sm:$0xff] }
 0x20c   :  { %v1051_v7 = vmax.f32 %v1025_v54, %v1038_v34  ;;  %v1194_v34 = vld [vmem:[#allocation2 + $0x2be] sm:$0xff] }
 0x20d   :  { %v1240_v21 = vmax.f32 %v1214_v61, %v1227_v12  ;;  %v1137_v23 = vmax.f32 %v1111_v3, %v1124_v59  ;;  %v1168_v59 = vld [vmem:[#allocation2 + $0x25c] sm:$0xff]  ;;  %v1179_v12 = vmax.f32 %v1153_v44, %v1218_v45  ;;  %v7042_v35 = vpop.permute.xlu0 %2430 }
 0x20e   :  { %v1077_v29 = vmax.f32 %v1051_v7, %v1168_v59  ;;  %v1090_v59 = vld [vmem:[#allocation2 + $0x136] sm:$0xff] }
 0x20f   :  { %v1257_v32 = vadd.f32 %v7026_v63, %v1240_v21  ;;  %v1163_v33 = vmax.f32 %v1137_v23, %v1150_v6  ;;  %v1151_v21 = vld [vmem:[#allocation2 + $0x242] sm:$0xff]  ;;  %v1128_v23 = vmax.f32 %v1102_v2, %v1063_v57  ;;  %v1026_v2 = vld [vmem:[#allocation2 + $0x18] sm:$0xff] }
 0x211   :  { %v1270_v47 = vmax.f32 %v1257_v32, 0.0  ;;  %v1189_v48 = vmax.f32 %v1163_v33, %v1176_v37  ;;  %v1154_v32 = vmax.f32 %v1128_v23, %v1089_v8  ;;  %v1178_v33 = vld [vmem:[#allocation2 + $0x2ac] sm:$0x3]  ;;  %v1169_v23 = vld [vmem:[#allocation2 + $0x264] sm:$0xff] }
 0x212   :  { %v1099_v51 = vld [vmem:[#allocation2 + $0x17e] sm:$0xff]  ;;  %v1100_v52 = vld [vmem:[#allocation2 + $0x186] sm:$0x3]  ;;  %v753_v53 = vpop.f32.mrf.mxu0 }
 0x213   :  { %v1215_v58 = vmax.f32 %v1189_v48, %v1202_v38  ;;  %v1112_v61 = vmax.f32 %v1086_v39, %v1099_v51  ;;  %v1113_v3 = vmax.f32 %v1087_v41, %v1100_v52  ;;  %960 = vst.msk [vmem:[#allocation2 + $0x188] sm:$0xff] %vm910_vm3, %v753_v53  ;;  %v1363_v6 = vmul.f32 %v6995_v11, %v1270_v47  ;;  %v1203_v37 = vld [vmem:[#allocation2 + $0x306] sm:$0xff]  ;;  %v1219_v38 = vld [vmem:[#allocation2 + $0x318] sm:$0xff]  ;;  %v1230_v47 = vld [vmem:[#allocation2 + $0x370] sm:$0x3]  ;;  %v7044_v52 = vpop.permute.xlu1 %2435 }
 0x214   :  { %v1205_v39 = vmax.f32 %v1179_v12, %v1140_v25  ;;  %v1064_v51 = vld [vmem:[#allocation2 + $0xd4] sm:$0xff] }
 0x215   :  { %v1241_v17 = vmax.f32 %v1215_v58, %v1228_v49  ;;  %v1138_v19 = vmax.f32 %v1112_v61, %v1125_v43  ;;  %v1139_v20 = vmax.f32 %v1113_v3, %v1126_v46  ;;  %1376 = vst.msk [vmem:[#allocation3 + $0x50] sm:$0xff] %vm910_vm3, %v1363_v6  ;;  %v1204_v46 = vld [vmem:[#allocation2 + $0x30e] sm:$0x3]  ;;  %v1039_v49 = vld [vmem:[#allocation2 + $0x7a] sm:$0xff]  ;;  %v1103_v61 = vmax.f32 %v1077_v29, %v1194_v34 }
 0x216   :  { %v1180_v3 = vmax.f32 %v1154_v32, %v1219_v38  ;;  %v1229_v6 = vld [vmem:[#allocation2 + $0x368] sm:$0xff]  ;;  %v1220_v29 = vld [vmem:[#allocation2 + $0x320] sm:$0xff] }
 0x217   :  { %v1258_v60 = vadd.f32 %v7026_v63, %v1241_v17  ;;  %v1164_v27 = vmax.f32 %v1138_v19, %v1151_v21  ;;  %v1165_v11 = vmax.f32 %v1139_v20, %v1152_v26  ;;  %v1129_v20 = vmax.f32 %v1103_v61, %v1064_v51  ;;  %v1141_v21 = vld [vmem:[#allocation2 + $0x1f2] sm:$0xff] }
 0x219   :  { %v1271_v41 = vmax.f32 %v1258_v60, 0.0  ;;  %v1190_v43 = vmax.f32 %v1164_v27, %v1177_v30  ;;  %v1191_v44 = vmax.f32 %v1165_v11, %v1178_v33  ;;  %v7054_v27 = vpop.permute.xlu2 %2455  ;;  %v1155_v11 = vmax.f32 %v1129_v20, %v1090_v59  ;;  %v1142_v59 = vld [vmem:[#allocation2 + $0x1fa] sm:$0xff] }
 0x21a   :  { %v1114_v45 = vld [vmem:[#allocation2 + $0x188] sm:$0xff]  ;;  %v756_v48 = vpop.f32.mrf.mxu0  ;;  %v1206_v30 = vmax.f32 %v1180_v3, %v1141_v21 }
 0x21b   :  { %v1364_v53 = vmul.f32 %v7005_v16, %v1271_v41  ;;  %v1216_v54 = vmax.f32 %v1190_v43, %v1203_v37  ;;  %v1231_v57 = vmax.f32 %v1205_v39, %v1114_v45  ;;  %v1217_v58 = vmax.f32 %v1191_v44, %v1204_v46  ;;  %961 = vst.msk [vmem:[#allocation2 + $0x190] sm:$0xff] %vm910_vm3, %v756_v48  ;;  %v1027_v41 = vld [vmem:[#allocation2 + $0x20] sm:$0xff]  ;;  %v7058_v45 = vpop.permute.xlu0 %2445 }
 0x21c   :  { %v1709_v7 = vld [vmem:[#allocation3 + $0x50] sm:$0xff]  ;;  %v1052_v16 = vmax.f32 %v1026_v2, %v1039_v49  ;;  %v1181_v49 = vmax.f32 %v1155_v11, %v1220_v29 }
 0x21d   :  { %1377 = vst.msk [vmem:[#allocation3 + $0x58] sm:$0xff] %vm910_vm3, %v1364_v53  ;;  %v1242_v12 = vmax.f32 %v1216_v54, %v1229_v6  ;;  %v1248_v8 = vadd.f32 %v7026_v63, %v1231_v57  ;;  %v1243_v17 = vmax.f32 %v1217_v58, %v1230_v47  ;;  %v1722_v19 = vpack.c.bf16 %v1709_v7, %v1709_v7  ;;  %v1040_v43 = vld [vmem:[#allocation2 + $0x82] sm:$0xff]  ;;  %v7064_v57 = vpop.permute.xlu1 %2450 }
 0x21e   :  { %v1078_v37 = vmax.f32 %v1052_v16, %v1169_v23  ;;  %v1195_v44 = vld [vmem:[#allocation2 + $0x2c6] sm:$0xff]  ;;  %v1053_v7 = vmax.f32 %v1027_v41, %v1040_v43  ;;  %v1207_v20 = vmax.f32 %v1181_v49, %v1142_v59 }
 0x21f   :  { %v1259_v25 = vadd.f32 %v7026_v63, %v1242_v12  ;;  %v1260_v26 = vadd.f32 %v7026_v63, %v1243_v17  ;;  %1757 = vrot.lane.b32.xlu1 %v1722_v19, %s6453_s3  ;;  %v1261_v60 = vmax.f32 %v1248_v8, 0.0  ;;  %1417 = vst.msk [vmem:[#allocation4 + $0x50] sm:$0xf] %vm1406_vm5, %v1722_v19  ;;  %v6360_v6 = vld [vmem:[%s8500_s4 + $0x40] sm:$0xff]  ;;  %v1170_v8 = vld [vmem:[#allocation2 + $0x26c] sm:$0xff] }
 0x220   :  { %2106 = vst.msk [vmem:[#allocation4 + $0x44] sm:$0xf] %vm1406_vm5, %v1722_v19  ;;  %v1104_v2 = vmax.f32 %v1078_v37, %v1195_v44  ;;  %v1091_v17 = vld [vmem:[#allocation2 + $0x13e] sm:$0xff]  ;;  %2331 = vmatpush.bf16.msrb.mxu2 %v6360_v6  ;;  %v1041_v23 = vld [vmem:[#allocation2 + $0x8a] sm:$0xff]  ;;  %v1171_v44 = vld [vmem:[#allocation2 + $0x274] sm:$0xff] }
 0x221   :  { %v1272_v32 = vmax.f32 %v1259_v25, 0.0  ;;  %v1273_v33 = vmax.f32 %v1260_v26, 0.0  ;;  %v1354_v34 = vmul.f32 %v6967_v56, %v1261_v60  ;;  %v1065_v56 = vld [vmem:[#allocation2 + $0xdc] sm:$0xff]  ;;  %v1079_v25 = vmax.f32 %v1053_v7, %v1170_v8  ;;  %v7081_v26 = vpop.permute.xlu2 %3041  ;;  %v1028_v37 = vld [vmem:[#allocation2 + $0x28] sm:$0xff] }
 0x222   :  { %v1115_v38 = vld [vmem:[#allocation2 + $0x190] sm:$0xff]  ;;  %v758_v39 = vpop.f32.mrf.mxu0  ;;  %v1130_v16 = vmax.f32 %v1104_v2, %v1065_v56 }
 0x223   :  { %v1365_v46 = vmul.f32 %v7001_v13, %v1272_v32  ;;  %v1366_v47 = vmul.f32 %v7003_v14, %v1273_v33  ;;  %v1232_v48 = vmax.f32 %v1206_v30, %v1115_v38  ;;  %962 = vst.msk [vmem:[#allocation2 + $0x198] sm:$0xff] %vm910_vm3, %v758_v39  ;;  %v1196_v32 = vld [vmem:[#allocation2 + $0x2ce] sm:$0xff]  ;;  %v1054_v38 = vmax.f32 %v1028_v37, %v1041_v23  ;;  %v7085_v39 = vpop.permute.xlu0 %3132 }
 0x224   :  { %v1617_v51 = vld [vmem:[#allocation3 + $0x57] sm:$0xff]  ;;  %1367 = vst.msk [vmem:[#allocation3 + $0x8] sm:$0xff] %vm910_vm3, %v1354_v34  ;;  %v1156_v60 = vmax.f32 %v1130_v16, %v1091_v17 }
 0x225   :  { %v1524_v53 = vld [vmem:[#allocation3 + $0x52] sm:$0xff]  ;;  %1378 = vst.msk [vmem:[#allocation3 + $0x60] sm:$0xff] %vm910_vm3, %v1365_v46  ;;  %v1249_v58 = vadd.f32 %v7026_v63, %v1232_v48  ;;  %v1630_v61 = vpack.c.bf16 %v1617_v51, %v1617_v51  ;;  %v1105_v46 = vmax.f32 %v1079_v25, %v1196_v32  ;;  %v7088_v49 = vpop.permute.xlu1 %3470  ;;  %v1080_v6 = vmax.f32 %v1054_v38, %v1171_v44 }
 0x226   :  { %v1431_v54 = vld [vmem:[#allocation3 + $0x51] sm:$0xff]  ;;  %v1537_v13 = vpack.c.bf16 %v1524_v53, %v1524_v53  ;;  %1379 = vst.msk [vmem:[#allocation3 + $0x68] sm:$0x3] %vm1021_vm4, %v1366_v47 }
 0x227   :  { %v7068_v3 = vpack.c.bf16 %v1431_v54, %v1431_v54  ;;  %v1710_v14 = vld [vmem:[#allocation3 + $0x58] sm:$0xff]  ;;  %v1262_v19 = vmax.f32 %v1249_v58, 0.0  ;;  %1666 = vrot.lane.b32.xlu1 %v1630_v61, %s6454_s2  ;;  %v1221_v33 = vld [vmem:[#allocation2 + $0x328] sm:$0xff] }
 0x228   :  { %v1723_v12 = vpack.c.bf16 %v1710_v14, %v1710_v14  ;;  %1573 = vrot.lane.b32.xlu0 %v1537_v13, %s6455_s13  ;;  %v1895_v30 = vld [vmem:[#allocation3 + $0x56] sm:$0xff]  ;;  %v1182_v47 = vmax.f32 %v1156_v60, %v1221_v33  ;;  %v1092_v51 = vld [vmem:[#allocation2 + $0x146] sm:$0xff]  ;;  %v1197_v14 = vld [vmem:[#allocation2 + $0x2d6] sm:$0xff] }
 0x229   :  { %1480 = vrot.lane.b32.xlu2 %v7068_v3, %s6456_s14  ;;  %v1355_v21 = vmul.f32 %v6977_v0, %v1262_v19  ;;  %v1066_v0 = vld [vmem:[#allocation2 + $0xe4] sm:$0xff]  ;;  %v1908_v43 = vpack.c.bf16 %v1895_v30, %v1895_v30  ;;  %v1042_v58 = vld [vmem:[#allocation2 + $0x92] sm:$0xff]  ;;  %v7101_v30 = vpop.permute.xlu2 %3475  ;;  %v1106_v37 = vmax.f32 %v1080_v6, %v1197_v14 }
 0x22a   :  { %2107 = vst.msk [vmem:[#allocation4 + $0x4c] sm:$0xf] %vm1406_vm5, %v1723_v12  ;;  %v1116_v11 = vld [vmem:[#allocation2 + $0x198] sm:$0xff]  ;;  %v761_v29 = vpop.f32.mrf.mxu0  ;;  %v1143_v53 = vld [vmem:[#allocation2 + $0x202] sm:$0xff]  ;;  %v1131_v13 = vmax.f32 %v1105_v46, %v1066_v0  ;;  %v1222_v25 = vld [vmem:[#allocation2 + $0x330] sm:$0xff] }
 0x22b   :  { %1418 = vst.msk [vmem:[#allocation4 + $0x58] sm:$0xf] %vm1406_vm5, %v1723_v12  ;;  %v1233_v34 = vmax.f32 %v1207_v20, %v1116_v11  ;;  %v1700_v2 = vld [vmem:[#allocation3 + $0x8] sm:$0xff]  ;;  %v1029_v11 = vld [vmem:[#allocation2 + $0x30] sm:$0xff]  ;;  %v1223_v6 = vld [vmem:[#allocation2 + $0x338] sm:$0xff] }
 0x22c   :  { %1368 = vst.msk [vmem:[#allocation3 + $0x10] sm:$0xff] %vm910_vm3, %v1355_v21  ;;  %v1711_v48 = vld [vmem:[#allocation3 + $0x60] sm:$0xff]  ;;  %v1157_v17 = vmax.f32 %v1131_v13, %v1092_v51  ;;  %v7104_v33 = vpack.c.bf16 %v1700_v2, %v1700_v2  ;;  %v1093_v44 = vld [vmem:[#allocation2 + $0x14e] sm:$0xff] }
 0x22d   :  { %963 = vst.msk [vmem:[#allocation2 + $0x1a0] sm:$0xff] %vm910_vm3, %v761_v29  ;;  %v1250_v41 = vadd.f32 %v7026_v63, %v1233_v34  ;;  %v7092_v56 = vpack.c.bf16 %v1711_v48, %v1711_v48  ;;  %v2083_v59 = vld [vmem:[#allocation3 + $0x68] sm:$0xff]  ;;  %v1392_v8 = vld [vmem:[#allocation3 + $0x60] sm:$0x3]  ;;  %v1067_v29 = vld [vmem:[#allocation2 + $0xec] sm:$0xff]  ;;  %v1055_v34 = vmax.f32 %v1029_v11, %v1042_v58  ;;  %v7112_v48 = vpop.permute.xlu0 %3480  ;;  %v7122_v13 = vpop.permute.xlu1 %3485 }
 0x22e   :  { %v1433_v16 = vld [vmem:[#allocation3 + $0x61] sm:$0x3]  ;;  %v1432_v20 = vld [vmem:[#allocation3 + $0x59] sm:$0xff]  ;;  %v2096_v23 = vpack.c.bf16 %v2083_v59, %v2083_v59  ;;  %1408 = vst.msk [vmem:[#allocation4 + $0x8] sm:$0xf] %vm1406_vm5, %v7104_v33  ;;  %v1198_v58 = vld [vmem:[#allocation2 + $0x2de] sm:$0xff] }
 0x22f   :  { %v1263_v54 = vmax.f32 %v1250_v41, 0.0  ;;  %2036 = vrot.lane.b32.xlu1 %v1630_v61, %s6452_s28  ;;  %2108 = vst.msk [vmem:[#allocation4 + $0x54] sm:$0xf] %vm1406_vm5, %v7092_v56  ;;  %v1208_v61 = vmax.f32 %v1182_v47, %v1143_v53  ;;  %v1446_v38 = vpack.c.bf16 %v1433_v16, %v1433_v16  ;;  %v7106_v0 = vpack.c.bf16 %v1432_v20, %v1432_v20  ;;  %v1172_v41 = vld [vmem:[#allocation2 + $0x27c] sm:$0xff]  ;;  %v1144_v51 = vld [vmem:[#allocation2 + $0x20a] sm:$0xff]  ;;  %v1068_v20 = vld [vmem:[#allocation2 + $0xf4] sm:$0xff] }
 0x230   :  { %1943 = vrot.lane.b32.xlu0 %v1908_v43, %s6451_s27  ;;  %v1183_v43 = vmax.f32 %v1157_v17, %v1222_v25  ;;  %2109 = vst.msk [vmem:[#allocation4 + $0x5c] sm:$0xf] %vm1406_vm5, %v2096_v23  ;;  %v1132_v47 = vmax.f32 %v1106_v37, %v1067_v29  ;;  %v1619_v17 = vld [vmem:[#allocation3 + $0x67] sm:$0x3]  ;;  %v1147_v25 = vld [vmem:[#allocation2 + $0x222] sm:$0xff] }
 0x231   :  { %1759 = vrot.lane.b32.xlu2 %v1723_v12, %s6453_s3  ;;  %v1356_v7 = vmul.f32 %v6980_v4, %v1263_v54  ;;  %v1405_v4 = vpack.c.bf16 %v1392_v8, %v1392_v8  ;;  %v1081_v54 = vmax.f32 %v1055_v34, %v1172_v41  ;;  %v1525_v8 = vld [vmem:[#allocation3 + $0x5a] sm:$0xff]  ;;  %v7133_v29 = vpop.permute.xlu2 %3490  ;;  %v1043_v41 = vld [vmem:[#allocation2 + $0x9a] sm:$0xff] }
 0x232   :  { %v763_v19 = vpop.f32.mrf.mxu0  ;;  %v1158_v14 = vmax.f32 %v1132_v47, %v1093_v44  ;;  %v1030_v23 = vld [vmem:[#allocation2 + $0x38] sm:$0xff]  ;;  %v1538_v11 = vpack.c.bf16 %v1525_v8, %v1525_v8 }
 0x233   :  { %v2072_v21 = vld [vmem:[#allocation3 + $0x10] sm:$0xff]  ;;  %1369 = vst.msk [vmem:[#allocation3 + $0x18] sm:$0xff] %vm910_vm3, %v1356_v7  ;;  %v1209_v7 = vmax.f32 %v1183_v43, %v1144_v51  ;;  %v1145_v34 = vld [vmem:[#allocation2 + $0x212] sm:$0xff]  ;;  %v1056_v44 = vmax.f32 %v1030_v23, %v1147_v25  ;;  %v1031_v23 = vld [vmem:[#allocation2 + $0x40] sm:$0xff] }
 0x234   :  { %v1117_v12 = vld [vmem:[#allocation2 + $0x1a0] sm:$0xff]  ;;  %v7099_v60 = vpack.c.bf16 %v2072_v21, %v2072_v21  ;;  %964 = vst.msk [vmem:[#allocation2 + $0x1a8] sm:$0xff] %vm910_vm3, %v763_v19  ;;  %v1526_v19 = vld [vmem:[#allocation3 + $0x62] sm:$0x3]  ;;  %v1148_v25 = vld [vmem:[#allocation2 + $0x22a] sm:$0xff] }
 0x235   :  { %v1234_v32 = vmax.f32 %v1208_v61, %v1117_v12  ;;  %1420 = vst.msk [vmem:[#allocation4 + $0x60] sm:$0x1] %vm1419_vm6, %v1405_v4  ;;  %v1107_v12 = vmax.f32 %v1081_v54, %v1198_v58  ;;  %v1184_v4 = vmax.f32 %v1158_v14, %v1223_v6  ;;  %v7141_v47 = vpop.permute.xlu0 %3495  ;;  %v1082_v54 = vmax.f32 %v1056_v44, %v1043_v41  ;;  %v1224_v58 = vld [vmem:[#allocation2 + $0x340] sm:$0xff]  ;;  %v7144_v8 = vpop.permute.xlu1 %3500 }
 0x236   :  { %2098 = vst.msk [vmem:[#allocation4 + $0x4] sm:$0xf] %vm1406_vm5, %v7099_v60 }
 0x237   :  { %v1251_v46 = vadd.f32 %v7026_v63, %v1234_v32  ;;  %1484 = vrot.lane.b32.xlu1 %v1446_v38, %s6456_s14  ;;  %1409 = vst.msk [vmem:[#allocation4 + $0x10] sm:$0xf] %vm1406_vm5, %v7099_v60  ;;  %v1094_v32 = vld [vmem:[#allocation2 + $0x156] sm:$0xff]  ;;  %v1539_v38 = vpack.c.bf16 %v1526_v19, %v1526_v19  ;;  %v1133_v43 = vmax.f32 %v1107_v12, %v1068_v20 }
 0x238   :  { %1482 = vrot.lane.b32.xlu0 %v7106_v0, %s6456_s14 }
 0x239   :  { %v1264_v53 = vmax.f32 %v1251_v46, 0.0  ;;  %1850 = vrot.lane.b32.xlu2 %v7068_v3, %s6457_s1  ;;  %v1159_v51 = vmax.f32 %v1133_v43, %v1094_v32  ;;  %v1146_v32 = vld [vmem:[#allocation2 + $0x21a] sm:$0xff]  ;;  %v1057_v43 = vmax.f32 %v1031_v23, %v1148_v25  ;;  %v7160_v44 = vpop.permute.xlu2 %3505 }
 0x23a   :  { %v766_v59 = vpop.f32.mrf.mxu0  ;;  %v2073_v61 = vld [vmem:[#allocation3 + $0x18] sm:$0xff] }
 0x23b   :  { %v1357_v2 = vmul.f32 %v6989_v9, %v1264_v53  ;;  %v1118_v3 = vld [vmem:[#allocation2 + $0x1a8] sm:$0xff]  ;;  %965 = vst.msk [vmem:[#allocation2 + $0x1b0] sm:$0xff] %vm910_vm3, %v766_v59  ;;  %v7128_v16 = vpack.c.bf16 %v2073_v61, %v2073_v61  ;;  %v1632_v9 = vpack.c.bf16 %v1619_v17, %v1619_v17  ;;  %v1210_v53 = vmax.f32 %v1184_v4, %v1145_v34  ;;  %v1618_v61 = vld [vmem:[#allocation3 + $0x5f] sm:$0xff] }
 0x23c   :  { %v1235_v21 = vmax.f32 %v1209_v7, %v1118_v3  ;;  %v1173_v59 = vld [vmem:[#allocation2 + $0x284] sm:$0xff]  ;;  %v7151_v34 = vpack.c.bf16 %v1618_v61, %v1618_v61  ;;  %v1805_v61 = vld [vmem:[#allocation3 + $0x69] sm:$0x3] }
 0x23d   :  { %1370 = vst.msk [vmem:[#allocation3 + $0x20] sm:$0xff] %vm910_vm3, %v1357_v2  ;;  %v1712_v2 = vld [vmem:[#allocation3 + $0x68] sm:$0x3]  ;;  %v6340_v19 = vld [vmem:[#allocation4 + $0x4] sm:$0xf] }
 0x23e   :  { %2099 = vst.msk [vmem:[#allocation4 + $0xc] sm:$0xf] %vm1406_vm5, %v7128_v16  ;;  %v1252_v37 = vadd.f32 %v7026_v63, %v1235_v21  ;;  %v1725_v4 = vpack.c.bf16 %v1712_v2, %v1712_v2  ;;  %v7166_v2 = vpop.permute.xlu0 %3510 }
 0x23f   :  { %1410 = vst.msk [vmem:[#allocation4 + $0x18] sm:$0xf] %vm1406_vm5, %v7128_v16  ;;  %1575 = vrot.lane.b32.xlu1 %v1538_v11, %s6455_s13 }
 0x240   :  { %1670 = vrot.lane.b32.xlu0 %v1632_v9, %s6454_s2  ;;  %v1265_v46 = vmax.f32 %v1252_v37, 0.0  ;;  %v1108_v9 = vmax.f32 %v1082_v54, %v1173_v59  ;;  %v1044_v37 = vld [vmem:[#allocation2 + $0xa2] sm:$0xff] }
 0x241   :  { %1577 = vrot.lane.b32.xlu2 %v1539_v38, %s6455_s13  ;;  %v1199_v38 = vld [vmem:[#allocation2 + $0x2e6] sm:$0xff]  ;;  %v1083_v54 = vmax.f32 %v1057_v43, %v1044_v37  ;;  %v1095_v59 = vld [vmem:[#allocation2 + $0x15e] sm:$0xff]  ;;  %v7184_v43 = vpop.permute.xlu2 %3520 }
 0x242   :  { %v1358_v14 = vmul.f32 %v6975_v62, %v1265_v46  ;;  %v1119_v6 = vld [vmem:[#allocation2 + $0x1b0] sm:$0xff]  ;;  %v768_v7 = vpop.f32.mrf.mxu0  ;;  %v1185_v62 = vmax.f32 %v1159_v51, %v1224_v58  ;;  %v1069_v46 = vld [vmem:[#allocation2 + $0xfc] sm:$0xff]  ;;  %v1070_v37 = vld [vmem:[#allocation2 + $0x104] sm:$0xff] }
 0x243   :  { %v1236_v17 = vmax.f32 %v1210_v53, %v1119_v6  ;;  %966 = vst.msk [vmem:[#allocation2 + $0x1b8] sm:$0xff] %vm910_vm3, %v768_v7  ;;  %v1174_v58 = vld [vmem:[#allocation2 + $0x28c] sm:$0xff]  ;;  %v1804_v7 = vld [vmem:[#allocation3 + $0x61] sm:$0xff] }
 0x244   :  { %v2074_v3 = vld [vmem:[#allocation3 + $0x20] sm:$0xff]  ;;  %1371 = vst.msk [vmem:[#allocation3 + $0x28] sm:$0xff] %vm910_vm3, %v1358_v14  ;;  %v1211_v51 = vmax.f32 %v1185_v62, %v1146_v32  ;;  %v1134_v14 = vmax.f32 %v1108_v9, %v1199_v38  ;;  %v1817_v25 = vpack.c.bf16 %v1804_v7, %v1804_v7  ;;  %v1109_v62 = vmax.f32 %v1083_v54, %v1174_v58  ;;  %v1225_v9 = vld [vmem:[#allocation2 + $0x348] sm:$0xff] }
 0x245   :  { %v5923_v20 = vld [vmem:[#allocation4 + $0x8] sm:$0xf0]  ;;  %v7148_v21 = vpack.c.bf16 %v2074_v3, %v2074_v3  ;;  %v1253_v12 = vadd.f32 %v7026_v63, %v1236_v17 }
 0x246   :  { %v5926_v11 = vor.u32 %v6340_v19, %v5923_v20  ;;  %v1160_v19 = vmax.f32 %v1134_v14, %v1069_v46  ;;  %v1990_v54 = vld [vmem:[#allocation3 + $0x67] sm:$0xff] }
 0x247   :  { %2100 = vst.msk [vmem:[#allocation4 + $0x14] sm:$0xf] %vm1406_vm5, %v7148_v21  ;;  %v1266_v41 = vmax.f32 %v1253_v12, 0.0  ;;  %1763 = vrot.lane.b32.xlu1 %v1725_v4, %s6453_s3  ;;  %v1818_v4 = vpack.c.bf16 %v1805_v61, %v1805_v61  ;;  %v1096_v14 = vld [vmem:[#allocation2 + $0x166] sm:$0xff]  ;;  %v2003_v61 = vpack.c.bf16 %v1990_v54, %v1990_v54 }
 0x248   :  { %1761 = vrot.lane.b32.xlu0 %v7092_v56, %s6453_s3  ;;  %1411 = vst.msk [vmem:[#allocation4 + $0x20] sm:$0xf] %vm1406_vm5, %v7148_v21  ;;  %6003 = vmatmul.msk.bf16.vlgmr.msrb.gmra.mxu2 %vm910_vm3, %v5926_v11  ;;  %v1186_v12 = vmax.f32 %v1160_v19, %v1095_v59  ;;  %v1200_v11 = vld [vmem:[#allocation2 + $0x2ee] sm:$0xff] }
 0x249   :  { %1668 = vrot.lane.b32.xlu2 %v7151_v34, %s6454_s2  ;;  %v1359_v53 = vmul.f32 %v6983_v5, %v1266_v41  ;;  %v7172_v5 = vpop.permute.xlu1 %3515  ;;  %v1135_v41 = vmax.f32 %v1109_v62, %v1200_v11  ;;  %v1226_v11 = vld [vmem:[#allocation2 + $0x350] sm:$0xff]  ;;  %v7206_v54 = vpop.permute.xlu2 %4207 }
 0x24a   :  { %v1120_v6 = vld [vmem:[#allocation2 + $0x1b8] sm:$0xff]  ;;  %v771_v56 = vpop.f32.mrf.mxu0  ;;  %v1212_v46 = vmax.f32 %v1186_v12, %v1225_v9 }
 0x24b   :  { %1372 = vst.msk [vmem:[#allocation3 + $0x30] sm:$0xff] %vm910_vm3, %v1359_v53  ;;  %v1237_v17 = vmax.f32 %v1211_v51, %v1120_v6  ;;  %v2075_v3 = vld [vmem:[#allocation3 + $0x28] sm:$0xff]  ;;  %v1896_v53 = vld [vmem:[#allocation3 + $0x5e] sm:$0xff]  ;;  %v1161_v7 = vmax.f32 %v1135_v41, %v1070_v37 }
 0x24c   :  { %967 = vst.msk [vmem:[#allocation2 + $0x1c0] sm:$0xff] %vm910_vm3, %v771_v56  ;;  %v7170_v20 = vpack.c.bf16 %v2075_v3, %v2075_v3  ;;  %v1897_v6 = vld [vmem:[#allocation3 + $0x66] sm:$0xff] }
 0x24d   :  { %v1254_v23 = vadd.f32 %v7026_v63, %v1237_v17  ;;  %v1909_v17 = vpack.c.bf16 %v1896_v53, %v1896_v53  ;;  %v1910_v62 = vpack.c.bf16 %v1897_v6, %v1897_v6  ;;  %v1421_v41 = vld [vmem:[#allocation3 + $0x1] sm:$0xff] }
 0x24e   :  { %2101 = vst.msk [vmem:[#allocation4 + $0x1c] sm:$0xf] %vm1406_vm5, %v7170_v20  ;;  %v6342_v3 = vld [vmem:[#allocation4 + $0x14] sm:$0xf] }
 0x24f   :  { %v1267_v32 = vmax.f32 %v1254_v23, 0.0  ;;  %1854 = vrot.lane.b32.xlu1 %v1817_v25, %s6457_s1  ;;  %1412 = vst.msk [vmem:[#allocation4 + $0x28] sm:$0xf] %vm1406_vm5, %v7170_v20  ;;  %v1187_v23 = vmax.f32 %v1161_v7, %v1096_v14 }
 0x250   :  { %1852 = vrot.lane.b32.xlu0 %v7106_v0, %s6457_s1 }
 0x251   :  { %1856 = vrot.lane.b32.xlu2 %v1818_v4, %s6457_s1  ;;  %v1360_v38 = vmul.f32 %v6986_v50, %v1267_v32  ;;  %v7190_v50 = vpop.permute.xlu0 %3525  ;;  %v7197_v4 = vpop.permute.xlu1 %3530  ;;  %v1213_v32 = vmax.f32 %v1187_v23, %v1226_v11 }
 0x252   :  { %v773_v51 = vpop.f32.mrf.mxu0  ;;  %v2076_v58 = vld [vmem:[#allocation3 + $0x30] sm:$0xff]  ;;  %v7226_v11 = vpop.permute.xlu2 %4568 }
 0x253   :  { %1373 = vst.msk [vmem:[#allocation3 + $0x38] sm:$0xff] %vm910_vm3, %v1360_v38  ;;  %v1121_v0 = vld [vmem:[#allocation2 + $0x1c0] sm:$0xff]  ;;  %v7187_v56 = vpack.c.bf16 %v2076_v58, %v2076_v58 }
 0x254   :  { %v1238_v59 = vmax.f32 %v1212_v46, %v1121_v0  ;;  %968 = vst.msk [vmem:[#allocation2 + $0x1c8] sm:$0xff] %vm910_vm3, %v773_v51  ;;  %v1607_v38 = vld [vmem:[#allocation3 + $0x7] sm:$0xff]  ;;  %v1434_v0 = vpack.c.bf16 %v1421_v41, %v1421_v41 }
 0x255   :  { %v5931_v19 = vld [vmem:[#allocation4 + $0x18] sm:$0xf0]  ;;  %2102 = vst.msk [vmem:[#allocation4 + $0x24] sm:$0xf] %vm1406_vm5, %v7187_v56  ;;  %v1620_v14 = vpack.c.bf16 %v1607_v38, %v1607_v38  ;;  %v1422_v38 = vld [vmem:[#allocation3 + $0x9] sm:$0xff] }
 0x256   :  { %v1255_v25 = vadd.f32 %v7026_v63, %v1238_v59  ;;  %v5934_v12 = vor.u32 %v6342_v3, %v5931_v19  ;;  %1413 = vst.msk [vmem:[#allocation4 + $0x30] sm:$0xf] %vm1406_vm5, %v7187_v56  ;;  %v1514_v3 = vld [vmem:[#allocation3 + $0x2] sm:$0xff] }
 0x257   :  { %1945 = vrot.lane.b32.xlu1 %v1909_v17, %s6451_s27 }
 0x258   :  { %2040 = vrot.lane.b32.xlu0 %v2003_v61, %s6452_s28  ;;  %v1268_v9 = vmax.f32 %v1255_v25, 0.0  ;;  %6004 = vmatmul.msk.bf16.gmra.mxu2 %vm910_vm3, %v5934_v12  ;;  %v1515_v61 = vld [vmem:[#allocation3 + $0xa] sm:$0xff] }
 0x259   :  { %1947 = vrot.lane.b32.xlu2 %v1910_v62, %s6451_s27  ;;  %v7220_v59 = vpop.permute.xlu1 %4116  ;;  %v1528_v62 = vpack.c.bf16 %v1515_v61, %v1515_v61 }
 0x25a   :  { %v1361_v37 = vmul.f32 %v6997_v55, %v1268_v9  ;;  %v2077_v46 = vld [vmem:[#allocation3 + $0x38] sm:$0xff]  ;;  %v7214_v55 = vpop.permute.xlu0 %4558  ;;  %v1527_v9 = vpack.c.bf16 %v1514_v3, %v1514_v3 }
 0x25b   :  { %v1122_v51 = vld [vmem:[#allocation2 + $0x1c8] sm:$0xff]  ;;  %v7204_v53 = vpack.c.bf16 %v2077_v46, %v2077_v46 }
 0x25c   :  { %1374 = vst.msk [vmem:[#allocation3 + $0x40] sm:$0xff] %vm910_vm3, %v1361_v37  ;;  %v1239_v58 = vmax.f32 %v1213_v32, %v1122_v51  ;;  %v6344_v19 = vld [vmem:[#allocation4 + $0x24] sm:$0xf]  ;;  %v1886_v32 = vld [vmem:[#allocation3 + $0xe] sm:$0xff] }
 0x25d   :  { %2103 = vst.msk [vmem:[#allocation4 + $0x2c] sm:$0xf] %vm1406_vm5, %v7204_v53  ;;  %v1899_v51 = vpack.c.bf16 %v1886_v32, %v1886_v32  ;;  %v1609_v32 = vld [vmem:[#allocation3 + $0x17] sm:$0xff] }
 0x25e   :  { %v1256_v6 = vadd.f32 %v7026_v63, %v1239_v58  ;;  %1414 = vst.msk [vmem:[#allocation4 + $0x38] sm:$0xf] %vm1406_vm5, %v7204_v53  ;;  %v1435_v58 = vpack.c.bf16 %v1422_v38, %v1422_v38  ;;  %v5955_v38 = vld [vmem:[#allocation4 + $0x48] sm:$0xf0] }
 0x25f   :  { %1460 = vrot.lane.b32.xlu1 %v1434_v0, %s6456_s14  ;;  %v1423_v0 = vld [vmem:[#allocation3 + $0x11] sm:$0xff] }
 0x260   :  { %1646 = vrot.lane.b32.xlu0 %v1620_v14, %s6454_s2  ;;  %v1269_v7 = vmax.f32 %v1256_v6, 0.0  ;;  %v7249_v14 = vpop.permute.xlu2 %4583 }
 0x261   :  { %2038 = vrot.lane.b32.xlu2 %v7151_v34, %s6452_s28  ;;  %v1608_v34 = vld [vmem:[#allocation3 + $0xf] sm:$0xff]  ;;  %v7239_v37 = vpop.permute.xlu1 %4563  ;;  %8513 = vst [vmem:[#allocation5_spill] sm:$0xff] %v7249_v14 }
 0x262   :  { %v1362_v17 = vmul.f32 %v6992_v10, %v1269_v7  ;;  %v7237_v10 = vpop.permute.xlu0 %4573 }
 0x263   :  { %v2078_v63 = vld [vmem:[#allocation3 + $0x40] sm:$0xff] }
 0x264   :  { %1375 = vst.msk [vmem:[#allocation3 + $0x48] sm:$0xff] %vm910_vm3, %v1362_v17  ;;  %v5939_v23 = vld [vmem:[#allocation4 + $0x28] sm:$0xf0]  ;;  %v7224_v25 = vpack.c.bf16 %v2078_v63, %v2078_v63  ;;  %v1436_v17 = vpack.c.bf16 %v1423_v0, %v1423_v0 }
 0x265   :  { %v5942_v12 = vor.u32 %v6344_v19, %v5939_v23  ;;  %v1516_v23 = vld [vmem:[#allocation3 + $0x12] sm:$0xff] }
 0x266   :  { %2104 = vst.msk [vmem:[#allocation4 + $0x34] sm:$0xf] %vm1406_vm5, %v7224_v25 }
 0x267   :  { %1739 = vrot.lane.b32.xlu1 %v7104_v33, %s6453_s3  ;;  %1415 = vst.msk [vmem:[#allocation4 + $0x40] sm:$0xf] %vm1406_vm5, %v7224_v25  ;;  %v1621_v33 = vpack.c.bf16 %v1608_v34, %v1608_v34 }
 0x268   :  { %1555 = vrot.lane.b32.xlu0 %v1528_v62, %s6455_s13  ;;  %6005 = vmatmul.msk.bf16.gmra.mxu2 %vm910_vm3, %v5942_v12  ;;  %v7261_v19 = vpop.permute.xlu2 %4598  ;;  %v1529_v12 = vpack.c.bf16 %v1516_v23, %v1516_v23  ;;  %v2084_v23 = vld [vmem:[#allocation3 + $0x70] sm:$0x3] }
 0x269   :  { %1553 = vrot.lane.b32.xlu2 %v1527_v9, %s6455_s13  ;;  %v7254_v7 = vpop.permute.xlu1 %4578  ;;  %8516 = vst [vmem:[#allocation8_spill] sm:$0xff] %v7261_v19 }
 0x26a   :  { %v7252_v6 = vpop.permute.xlu0 %4588  ;;  %8515 = vst [vmem:[#allocation7_spill] sm:$0xff] %v7254_v7 }
 0x26b   :  { %v2079_v41 = vld [vmem:[#allocation3 + $0x48] sm:$0xff]  ;;  %8514 = vst [vmem:[#allocation6_spill] sm:$0xff] %v7252_v6 }
 0x26c   :  { %v7241_v46 = vpack.c.bf16 %v2079_v41, %v2079_v41  ;;  %v1615_v19 = vld [vmem:[#allocation3 + $0x47] sm:$0xff] }
 0x26d   :  { %v6346_v61 = vld [vmem:[#allocation4 + $0x34] sm:$0xf] }
 0x26e   :  { %2105 = vst.msk [vmem:[#allocation4 + $0x3c] sm:$0xf] %vm1406_vm5, %v7241_v46 }
 0x26f   :  { %1648 = vrot.lane.b32.xlu1 %v1621_v33, %s6454_s2  ;;  %1416 = vst.msk [vmem:[#allocation4 + $0x48] sm:$0xf] %vm1406_vm5, %v7241_v46 }
 0x270   :  { %1925 = vrot.lane.b32.xlu0 %v1899_v51, %s6451_s27  ;;  %v1622_v51 = vpack.c.bf16 %v1609_v32, %v1609_v32 }
 0x271   :  { %1462 = vrot.lane.b32.xlu2 %v1435_v58, %s6456_s14  ;;  %v7265_v9 = vpop.permute.xlu1 %4593 }
 0x272   :  { %v7263_v62 = vpop.permute.xlu0 %4603  ;;  %8518 = vst [vmem:[#allocation10_spill] sm:$0xff] %v7265_v9 }
 0x273   :  { %8517 = vst [vmem:[#allocation9_spill] sm:$0xff] %v7263_v62 }
 0x275   :  { %v5947_v3 = vld [vmem:[#allocation4 + $0x38] sm:$0xf0] }
 0x276   :  { %v5950_v63 = vor.u32 %v6346_v61, %v5947_v3  ;;  %v1610_v3 = vld [vmem:[#allocation3 + $0x1f] sm:$0xff] }
 0x277   :  { %2018 = vrot.lane.b32.xlu1 %v1621_v33, %s6452_s28  ;;  %v6348_v33 = vld [vmem:[#allocation4 + $0x44] sm:$0xf] }
 0x278   :  { %1464 = vrot.lane.b32.xlu0 %v1436_v17, %s6456_s14  ;;  %6006 = vmatmul.msk.bf16.gmra.mxu2 %vm910_vm3, %v5950_v63  ;;  %v5958_v0 = vor.u32 %v6348_v33, %v5955_v38  ;;  %v1424_v63 = vld [vmem:[#allocation3 + $0x19] sm:$0xff]  ;;  %v6350_v33 = vld [vmem:[#allocation4 + $0x54] sm:$0xf] }
 0x279   :  { %1741 = vrot.lane.b32.xlu2 %v7099_v60, %s6453_s3  ;;  %v1887_v60 = vld [vmem:[#allocation3 + $0x16] sm:$0xff] }
 0x27a   :  { %v1900_v41 = vpack.c.bf16 %v1887_v60, %v1887_v60  ;;  %v7272_v61 = vpop.permute.xlu0 %4613  ;;  %v1437_v60 = vpack.c.bf16 %v1424_v63, %v1424_v63 }
 0x27b   :  { %8519 = vst [vmem:[#allocation11_spill] sm:$0xff] %v7272_v61  ;;  %v1425_v61 = vld [vmem:[#allocation3 + $0x21] sm:$0xff] }
 0x27c   :  { %v1438_v62 = vpack.c.bf16 %v1425_v61, %v1425_v61 }
 0x27f   :  { %1557 = vrot.lane.b32.xlu1 %v1529_v12, %s6455_s13  ;;  %v2097_v12 = vpack.c.bf16 %v2084_v23, %v2084_v23 }
 0x280   :  { %1743 = vrot.lane.b32.xlu0 %v7128_v16, %s6453_s3  ;;  %v7278_v16 = vpop.permute.xlu1 %4608 }
 0x281   :  { %1832 = vrot.lane.b32.xlu2 %v1435_v58, %s6457_s1  ;;  %8520 = vst [vmem:[#allocation12_spill] sm:$0xff] %v7278_v16 }
 0x282   :  { %2110 = vst.msk [vmem:[#allocation4 + $0x64] sm:$0x1] %vm1419_vm6, %v2097_v12 }
 0x283   :  { %v1481_v34 = vpop.permute.xlu2 %1480 }
 0x284   :  { %1510 = vst.msk [vmem:[#allocation4 + $0x50] sm:$0xf] %vm1499_vm7, %v1481_v34  ;;  %v1623_v34 = vpack.c.bf16 %v1610_v3, %v1610_v3 }
 0x287   :  { %1927 = vrot.lane.b32.xlu1 %v1900_v41, %s6451_s27  ;;  %v1517_v41 = vld [vmem:[#allocation3 + $0x1a] sm:$0xff] }
 0x288   :  { %1834 = vrot.lane.b32.xlu0 %v1436_v17, %s6457_s1  ;;  %6007 = vmatmul.msk.bf16.gmra.mxu2 %vm910_vm3, %v5958_v0  ;;  %v7284_v17 = vpop.permute.xlu0 %4618  ;;  %v5963_v0 = vld [vmem:[#allocation4 + $0x58] sm:$0xf0]  ;;  %v1530_v23 = vpack.c.bf16 %v1517_v41, %v1517_v41  ;;  %v1888_v41 = vld [vmem:[#allocation3 + $0x1e] sm:$0xff] }
 0x289   :  { %1650 = vrot.lane.b32.xlu2 %v1622_v51, %s6454_s2  ;;  %8521 = vst [vmem:[#allocation13_spill] sm:$0xff] %v7284_v17  ;;  %v5966_v3 = vor.u32 %v6350_v33, %v5963_v0  ;;  %v1518_v17 = vld [vmem:[#allocation3 + $0x22] sm:$0xff] }
 0x28b   :  { %v1760_v58 = vpop.permute.xlu2 %1759 }
 0x28f   :  { %1466 = vrot.lane.b32.xlu1 %v1437_v60, %s6456_s14 }
 0x290   :  { %1652 = vrot.lane.b32.xlu0 %v1623_v34, %s6454_s2 }
 0x291   :  { %2020 = vrot.lane.b32.xlu2 %v1622_v51, %s6452_s28  ;;  %v7286_v32 = vpop.permute.xlu1 %1757 }
 0x293   :  { %v7288_v38 = vpop.permute.xlu2 %1850 }
 0x297   :  { %1745 = vrot.lane.b32.xlu1 %v7148_v21, %s6453_s3  ;;  %v1901_v21 = vpack.c.bf16 %v1888_v41, %v1888_v41  ;;  %v1426_v41 = vld [vmem:[#allocation3 + $0x29] sm:$0xff] }
 0x298   :  { %2022 = vrot.lane.b32.xlu0 %v1623_v34, %s6452_s28  ;;  %6008 = vmatmul.msk.bf16.gmra.mxu2 %vm910_vm3, %v5966_v3  ;;  %v1531_v34 = vpack.c.bf16 %v1518_v17, %v1518_v17  ;;  %v1611_v3 = vld [vmem:[#allocation3 + $0x27] sm:$0xff] }
 0x299   :  { %1559 = vrot.lane.b32.xlu2 %v1530_v23, %s6455_s13  ;;  %v1667_v51 = vpop.permute.xlu1 %1666 }
 0x29a   :  { %v1574_v63 = vpop.permute.xlu0 %1573 }
 0x29b   :  { %1603 = vst.msk [vmem:[#allocation4 + $0x50] sm:$0xf] %vm1592_vm8, %v1574_v63  ;;  %v1578_v12 = vpop.permute.xlu2 %1577  ;;  %v1889_v63 = vld [vmem:[#allocation3 + $0x26] sm:$0xff] }
 0x29c   :  { %1696 = vst.msk [vmem:[#allocation4 + $0x50] sm:$0xf] %vm1685_vm9, %v1667_v51  ;;  %v1624_v51 = vpack.c.bf16 %v1611_v3, %v1611_v3  ;;  %v1902_v16 = vpack.c.bf16 %v1889_v63, %v1889_v63  ;;  %v1519_v3 = vld [vmem:[#allocation3 + $0x2a] sm:$0xff]  ;;  %v1380_v63 = vld [vmem:[#allocation3] sm:$0xff] }
 0x29d   :  { %1789 = vst.msk [vmem:[#allocation4 + $0x50] sm:$0xf] %vm1778_vm10, %v1760_v58 }
 0x29f   :  { %1836 = vrot.lane.b32.xlu1 %v1437_v60, %s6457_s1 }
 0x2a0   :  { %1561 = vrot.lane.b32.xlu0 %v1531_v34, %s6455_s13  ;;  %v1439_v34 = vpack.c.bf16 %v1426_v41, %v1426_v41 }
 0x2a1   :  { %1929 = vrot.lane.b32.xlu2 %v1901_v21, %s6451_s27  ;;  %v7301_v33 = vpop.permute.xlu1 %2036 }
 0x2a2   :  { %v7303_v0 = vpop.permute.xlu0 %1943 }
 0x2a3   :  { %v1669_v23 = vpop.permute.xlu2 %1668 }
 0x2a7   :  { %1654 = vrot.lane.b32.xlu1 %v1624_v51, %s6454_s2 }
 0x2a8   :  { %1931 = vrot.lane.b32.xlu0 %v1902_v16, %s6451_s27 }
 0x2a9   :  { %1468 = vrot.lane.b32.xlu2 %v1438_v62, %s6456_s14  ;;  %v1485_v58 = vpop.permute.xlu1 %1484 }
 0x2aa   :  { %v1483_v60 = vpop.permute.xlu0 %1482  ;;  %1513 = vst.msk [vmem:[#allocation4 + $0x60] sm:$0x1] %vm1512_vm11, %v1485_v58  ;;  %v1532_v58 = vpack.c.bf16 %v1519_v3, %v1519_v3 }
 0x2ab   :  { %v1857_v17 = vpop.permute.xlu2 %1856  ;;  %1511 = vst.msk [vmem:[#allocation4 + $0x58] sm:$0xf] %vm1499_vm7, %v1483_v60 }
 0x2ac   :  { %1606 = vst.msk [vmem:[#allocation4 + $0x60] sm:$0x1] %vm8512_vm12, %v1578_v12  ;;  %v6359_v12 = vld [vmem:[%s8500_s4 + $0x38] sm:$0xff] }
 0x2ad   :  { %2281 = vmatpush.bf16.msrb.mxu1 %v6359_v12 }
 0x2af   :  { %2024 = vrot.lane.b32.xlu1 %v1624_v51, %s6452_s28  ;;  %v7321_v51 = vpack.c.bf16 %v1380_v63, %v1380_v63 }
 0x2b0   :  { %1470 = vrot.lane.b32.xlu0 %v1439_v34, %s6456_s14 }
 0x2b1   :  { %1747 = vrot.lane.b32.xlu2 %v7170_v20, %s6453_s3  ;;  %v1576_v61 = vpop.permute.xlu1 %1575  ;;  %v6358_v20 = vld [vmem:[%s8500_s4 + $0x30] sm:$0xff]  ;;  %1407 = vst.msk [vmem:[#allocation4] sm:$0xf] %vm1406_vm5, %v7321_v51 }
 0x2b2   :  { %v1671_v16 = vpop.permute.xlu0 %1670  ;;  %1604 = vst.msk [vmem:[#allocation4 + $0x58] sm:$0xf] %vm1592_vm8, %v1576_v61  ;;  %2282 = vmatpush.bf16.msrb.mxu1 %v6358_v20  ;;  %v1890_v61 = vld [vmem:[#allocation3 + $0x2e] sm:$0xff] }
 0x2b3   :  { %v1948_v21 = vpop.permute.xlu2 %1947  ;;  %1697 = vst.msk [vmem:[#allocation4 + $0x58] sm:$0xf] %vm1685_vm9, %v1669_v23  ;;  %v1427_v20 = vld [vmem:[#allocation3 + $0x31] sm:$0xff] }
 0x2b4   :  { %1699 = vst.msk [vmem:[#allocation4 + $0x60] sm:$0x1] %vm8511_vm13, %v1671_v16  ;;  %v1612_v16 = vld [vmem:[#allocation3 + $0x2f] sm:$0xff] }
 0x2b5   :  { %v1625_v3 = vpack.c.bf16 %v1612_v16, %v1612_v16 }
 0x2b7   :  { %1563 = vrot.lane.b32.xlu1 %v1532_v58, %s6455_s13  ;;  %v1613_v58 = vld [vmem:[#allocation3 + $0x37] sm:$0xff] }
 0x2b8   :  { %1749 = vrot.lane.b32.xlu0 %v7187_v56, %s6453_s3  ;;  %v1903_v56 = vpack.c.bf16 %v1890_v61, %v1890_v61 }
 0x2b9   :  { %1838 = vrot.lane.b32.xlu2 %v1438_v62, %s6457_s1  ;;  %v1764_v23 = vpop.permute.xlu1 %1763  ;;  %v3172_v62 = vld [vmem:[#allocation3 + $0x70] sm:$0x3] }
 0x2ba   :  { %v1762_v60 = vpop.permute.xlu0 %1761  ;;  %1792 = vst.msk [vmem:[#allocation4 + $0x60] sm:$0x1] %vm1791_vm14, %v1764_v23  ;;  %v1626_v23 = vpack.c.bf16 %v1613_v58, %v1613_v58  ;;  %v1521_v58 = vld [vmem:[#allocation3 + $0x3a] sm:$0xff] }
 0x2bb   :  { %v2039_v41 = vpop.permute.xlu2 %2038  ;;  %1885 = vst.msk [vmem:[#allocation4 + $0x60] sm:$0x1] %vm1884_vm15, %v1857_v17  ;;  %v6357_v17 = vld [vmem:[%s8500_s4 + $0x28] sm:$0xff] }
 0x2bc   :  { %1978 = vst.msk [vmem:[#allocation4 + $0x60] sm:$0x1] %vm8510_vm0, %v7011_v15  ;;  %v3185_v15 = vpack.c.bf16 %v3172_v62, %v3172_v62  ;;  %2283 = vmatpush.bf16.msrb.mxu1 %v6357_v17  ;;  %vm2057_vm0 = vcmask 1044352   ;;  %v1520_v17 = vld [vmem:[#allocation3 + $0x32] sm:$0xff] }
 0x2bd   :  { %2071 = vst.msk [vmem:[#allocation4 + $0x60] sm:$0x1] %vm8509_vm1, %v7014_v22  ;;  %vm1964_vm1 = vcmask 913152  }
 0x2be   :  { %1790 = vst.msk [vmem:[#allocation4 + $0x58] sm:$0xf] %vm1778_vm10, %v1762_v60  ;;  %v1440_v60 = vpack.c.bf16 %v1427_v20, %v1427_v20  ;;  %v1891_v20 = vld [vmem:[#allocation3 + $0x36] sm:$0xff] }
 0x2bf   :  { %1933 = vrot.lane.b32.xlu1 %v1903_v56, %s6451_s27 }
 0x2c0   :  { %1840 = vrot.lane.b32.xlu0 %v1439_v34, %s6457_s1 }
 0x2c1   :  { %1656 = vrot.lane.b32.xlu2 %v1625_v3, %s6454_s2  ;;  %v1855_v12 = vpop.permute.xlu1 %1854 }
 0x2c2   :  { %v1853_v63 = vpop.permute.xlu0 %1852  ;;  %1883 = vst.msk [vmem:[#allocation4 + $0x58] sm:$0xf] %vm1871_vm2, %v1855_v12 }
 0x2c3   :  { %v1554_v22 = vpop.permute.xlu2 %1553  ;;  %1882 = vst.msk [vmem:[#allocation4 + $0x50] sm:$0xf] %vm1871_vm2, %v1853_v63 }
 0x2c4   :  { %v7347_v34 = vld [vmem:[#allocation4 + $0x60] sm:$0x11]  ;;  %1976 = vst.msk [vmem:[#allocation4 + $0x58] sm:$0xf] %vm1964_vm1, %v1948_v21 }
 0x2c5   :  { %3198 = vst.msk [vmem:[#allocation4 + $0x64] sm:$0x1] %vm1419_vm6, %v3185_v15  ;;  %v2184_v61 = vunpack.c.h.b16 %v7347_v34  ;;  %v1533_v15 = vpack.c.bf16 %v1520_v17, %v1520_v17  ;;  %v1892_v17 = vld [vmem:[#allocation3 + $0x3e] sm:$0xff] }
 0x2c7   :  { %1472 = vrot.lane.b32.xlu1 %v1440_v60, %s6456_s14  ;;  %v2198_v16 = vpack.c.b16 %v2184_v61, %v2184_v61 }
 0x2c8   :  { %1658 = vrot.lane.b32.xlu0 %v1626_v23, %s6454_s2 }
 0x2c9   :  { %2026 = vrot.lane.b32.xlu2 %v1625_v3, %s6452_s28  ;;  %v1946_v56 = vpop.permute.xlu1 %1945  ;;  %6009 = vmatmul.msk.bf16.gmra.mxu2 %vm910_vm3, %v2198_v16  ;;  %v1904_v16 = vpack.c.bf16 %v1891_v20, %v1891_v20 }
 0x2ca   :  { %v2041_v62 = vpop.permute.xlu0 %2040  ;;  %1975 = vst.msk [vmem:[#allocation4 + $0x50] sm:$0xf] %vm1964_vm1, %v1946_v56 }
 0x2cb   :  { %v1463_v21 = vpop.permute.xlu2 %1462  ;;  %2068 = vst.msk [vmem:[#allocation4 + $0x50] sm:$0xf] %vm2057_vm0, %v2039_v41  ;;  %v6356_v41 = vld [vmem:[%s8500_s4 + $0x20] sm:$0xff]  ;;  %v7373_v61 = vpop.f32.mrf.mxu2 }
 0x2cc   :  { %2069 = vst.msk [vmem:[#allocation4 + $0x58] sm:$0xf] %vm2057_vm0, %v2041_v62  ;;  %2284 = vmatpush.bf16.msrb.mxu1 %v6356_v41 }
 0x2cd   :  { %1501 = vst.msk [vmem:[#allocation4 + $0x8] sm:$0xf] %vm1499_vm7, %v1463_v21  ;;  %v1614_v21 = vld [vmem:[#allocation3 + $0x3f] sm:$0xff] }
 0x2cf   :  { %1751 = vrot.lane.b32.xlu1 %v7204_v53, %s6453_s3  ;;  %v6355_v53 = vld [vmem:[%s8500_s4 + $0x18] sm:$0xff] }
 0x2d0   :  { %2028 = vrot.lane.b32.xlu0 %v1626_v23, %s6452_s28  ;;  %v1534_v23 = vpack.c.bf16 %v1521_v58, %v1521_v58  ;;  %2285 = vmatpush.bf16.msrb.mxu1 %v6355_v53  ;;  %v1429_v53 = vld [vmem:[#allocation3 + $0x41] sm:$0xff] }
 0x2d1   :  { %1565 = vrot.lane.b32.xlu2 %v1533_v15, %s6455_s13  ;;  %v1461_v12 = vpop.permute.xlu1 %1460  ;;  %v1428_v15 = vld [vmem:[#allocation3 + $0x39] sm:$0xff] }
 0x2d2   :  { %v1647_v3 = vpop.permute.xlu0 %1646  ;;  %1500 = vst.msk [vmem:[#allocation4] sm:$0xf] %vm1499_vm7, %v1461_v12  ;;  %v1905_v12 = vpack.c.bf16 %v1892_v17, %v1892_v17 }
 0x2d3   :  { %v1742_v63 = vpop.permute.xlu2 %1741  ;;  %1593 = vst.msk [vmem:[#allocation4] sm:$0xf] %vm1592_vm8, %v1554_v22  ;;  %v7383_v58 = vpop.f32.mrf.mxu2 }
 0x2d4   :  { %1686 = vst.msk [vmem:[#allocation4] sm:$0xf] %vm1685_vm9, %v1647_v3  ;;  %v1627_v3 = vpack.c.bf16 %v1614_v21, %v1614_v21  ;;  %v6352_v21 = vld [vmem:[%s8500_s4] sm:$0xff] }
 0x2d7   :  { %1842 = vrot.lane.b32.xlu1 %v1440_v60, %s6457_s1  ;;  %v1441_v60 = vpack.c.bf16 %v1428_v15, %v1428_v15 }
 0x2d8   :  { %1567 = vrot.lane.b32.xlu0 %v1534_v23, %s6455_s13 }
 0x2d9   :  { %1935 = vrot.lane.b32.xlu2 %v1904_v16, %s6451_s27  ;;  %v1740_v22 = vpop.permute.xlu1 %1739  ;;  %v6354_v16 = vld [vmem:[%s8500_s4 + $0x10] sm:$0xff] }
 0x2da   :  { %v1556_v56 = vpop.permute.xlu0 %1555  ;;  %1779 = vst.msk [vmem:[#allocation4] sm:$0xf] %vm1778_vm10, %v1740_v22  ;;  %v1442_v22 = vpack.c.bf16 %v1429_v53, %v1429_v53  ;;  %2286 = vmatpush.bf16.msrb.mxu1 %v6354_v16 }
 0x2db   :  { %v1833_v62 = vpop.permute.xlu2 %1832  ;;  %1594 = vst.msk [vmem:[#allocation4 + $0x8] sm:$0xf] %vm1592_vm8, %v1556_v56  ;;  %v6353_v56 = vld [vmem:[%s8500_s4 + $0x8] sm:$0xff]  ;;  %v7402_v17 = vpop.f32.mrf.mxu2 }
 0x2dc   :  { %1872 = vst.msk [vmem:[#allocation4] sm:$0xf] %vm1871_vm2, %v1833_v62 }
 0x2de   :  { %2287 = vmatpush.bf16.msrb.mxu1 %v6353_v56 }
 0x2df   :  { %1660 = vrot.lane.b32.xlu1 %v1627_v3, %s6454_s2 }
 0x2e0   :  { %1937 = vrot.lane.b32.xlu0 %v1905_v12, %s6451_s27  ;;  %v1430_v12 = vld [vmem:[#allocation3 + $0x49] sm:$0xff] }
 0x2e1   :  { %1474 = vrot.lane.b32.xlu2 %v1441_v60, %s6456_s14  ;;  %v1649_v41 = vpop.permute.xlu1 %1648 }
 0x2e2   :  { %v1926_v20 = vpop.permute.xlu0 %1925  ;;  %1687 = vst.msk [vmem:[#allocation4 + $0x8] sm:$0xf] %vm1685_vm9, %v1649_v41  ;;  %v1616_v41 = vld [vmem:[#allocation3 + $0x4f] sm:$0xff]  ;;  %2288 = vmatpush.bf16.msrb.mxu1 %v6352_v21 }
 0x2e3   :  { %v1651_v23 = vpop.permute.xlu2 %1650  ;;  %1780 = vst.msk [vmem:[#allocation4 + $0x8] sm:$0xf] %vm1778_vm10, %v1742_v63 }
 0x2e4   :  { %1965 = vst.msk [vmem:[#allocation4] sm:$0xf] %vm1964_vm1, %v1926_v20  ;;  %v1629_v20 = vpack.c.bf16 %v1616_v41, %v1616_v41 }
 0x2e7   :  { %2030 = vrot.lane.b32.xlu1 %v1627_v3, %s6452_s28  ;;  %v1443_v3 = vpack.c.bf16 %v1430_v12, %v1430_v12  ;;  %v7412_v12 = vpop.f32.mrf.mxu2 }
 0x2e8   :  { %1476 = vrot.lane.b32.xlu0 %v1442_v22, %s6456_s14 }
 0x2e9   :  { %1753 = vrot.lane.b32.xlu2 %v7224_v25, %s6453_s3  ;;  %v2019_v63 = vpop.permute.xlu1 %2018 }
 0x2ea   :  { %v1465_v62 = vpop.permute.xlu0 %1464  ;;  %2058 = vst.msk [vmem:[#allocation4] sm:$0xf] %vm2057_vm0, %v2019_v63  ;;  %v1522_v63 = vld [vmem:[#allocation3 + $0x42] sm:$0xff] }
 0x2eb   :  { %v2021_v15 = vpop.permute.xlu2 %2020  ;;  %1502 = vst.msk [vmem:[#allocation4 + $0x10] sm:$0xf] %vm1499_vm7, %v1465_v62  ;;  %v1523_v62 = vld [vmem:[#allocation3 + $0x4a] sm:$0xff]  ;;  %v1535_v21 = vpack.c.bf16 %v1522_v63, %v1522_v63 }
 0x2ec   :  { %v1536_v41 = vpack.c.bf16 %v1523_v62, %v1523_v62 }
 0x2ef   :  { %1478 = vrot.lane.b32.xlu1 %v1443_v3, %s6456_s14 }
 0x2f0   :  { %1664 = vrot.lane.b32.xlu0 %v1629_v20, %s6454_s2 }
 0x2f1   :  { %1844 = vrot.lane.b32.xlu2 %v1441_v60, %s6457_s1  ;;  %v5921_v25 = vld [vmem:[#allocation4] sm:$0xf]  ;;  %v1558_v53 = vpop.permute.xlu1 %1557 }
 0x2f2   :  { %v1744_v16 = vpop.permute.xlu0 %1743  ;;  %2510 = vst.msk [vmem:[#allocation4] sm:$0xf] %vm1406_vm5, %v7321_v51 }
 0x2f3   :  { %v1560_v56 = vpop.permute.xlu2 %1559  ;;  %1595 = vst.msk [vmem:[#allocation4 + $0x10] sm:$0xf] %vm1592_vm8, %v1558_v53 }
 0x2f4   :  { %1688 = vst.msk [vmem:[#allocation4 + $0x10] sm:$0xf] %vm1685_vm9, %v1651_v23  ;;  %v7423_v23 = vpop.f32.mrf.mxu2 }
 0x2f5   :  { %1781 = vst.msk [vmem:[#allocation4 + $0x10] sm:$0xf] %vm1778_vm10, %v1744_v16  ;;  %v1628_v16 = vpack.c.bf16 %v1615_v19, %v1615_v19 }
 0x2f7   :  { %1569 = vrot.lane.b32.xlu1 %v1535_v21, %s6455_s13  ;;  %v1893_v21 = vld [vmem:[#allocation3 + $0x46] sm:$0xff] }
 0x2f8   :  { %1755 = vrot.lane.b32.xlu0 %v7241_v46, %s6453_s3  ;;  %v1906_v19 = vpack.c.bf16 %v1893_v21, %v1893_v21 }
 0x2f9   :  { %1571 = vrot.lane.b32.xlu2 %v1536_v41, %s6455_s13  ;;  %v1928_v51 = vpop.permute.xlu1 %1927 }
 0x2fa   :  { %v1835_v60 = vpop.permute.xlu0 %1834 }
 0x2fb   :  { %1873 = vst.msk [vmem:[#allocation4 + $0x8] sm:$0xf] %vm1871_vm2, %v1835_v60  ;;  %v1930_v53 = vpop.permute.xlu2 %1929 }
 0x2fc   :  { %1966 = vst.msk [vmem:[#allocation4 + $0x8] sm:$0xf] %vm1964_vm1, %v1928_v51  ;;  %v1894_v51 = vld [vmem:[#allocation3 + $0x4e] sm:$0xff] }
 0x2fd   :  { %2059 = vst.msk [vmem:[#allocation4 + $0x8] sm:$0xf] %vm2057_vm0, %v2021_v15 }
 0x2ff   :  { %1848 = vrot.lane.b32.xlu1 %v1443_v3, %s6457_s1  ;;  %v7434_v3 = vpop.f32.mrf.mxu2 }
 0x300   :  { %1846 = vrot.lane.b32.xlu0 %v1442_v22, %s6457_s1  ;;  %v1907_v22 = vpack.c.bf16 %v1894_v51, %v1894_v51 }
 0x301   :  { %1662 = vrot.lane.b32.xlu2 %v1628_v16, %s6454_s2  ;;  %v1467_v63 = vpop.permute.xlu1 %1466 }
 0x302   :  { %v1653_v46 = vpop.permute.xlu0 %1652  ;;  %1503 = vst.msk [vmem:[#allocation4 + $0x18] sm:$0xf] %vm1499_vm7, %v1467_v63 }
 0x303   :  { %v1469_v62 = vpop.permute.xlu2 %1468  ;;  %1596 = vst.msk [vmem:[#allocation4 + $0x18] sm:$0xf] %vm1592_vm8, %v1560_v56 }
 0x304   :  { %v6341_v41 = vld [vmem:[#allocation4 + $0x4] sm:$0xf0]  ;;  %1689 = vst.msk [vmem:[#allocation4 + $0x18] sm:$0xf] %vm1685_vm9, %v1653_v46 }
 0x305   :  { %v5922_v15 = vor.u32 %v6341_v41, %v5921_v25  ;;  %1504 = vst.msk [vmem:[#allocation4 + $0x20] sm:$0xf] %vm1499_vm7, %v1469_v62 }
 0x307   :  { %2289 = vmatmul.bf16.vlgmr.msrb.gmra.mxu1 %v5922_v15  ;;  %1939 = vrot.lane.b32.xlu1 %v1906_v19, %s6451_s27  ;;  %v7439_v62 = vpop.f32.mrf.mxu2 }
 0x308   :  { %2034 = vrot.lane.b32.xlu0 %v1629_v20, %s6452_s28 }
 0x309   :  { %1941 = vrot.lane.b32.xlu2 %v1907_v22, %s6451_s27  ;;  %v1746_v63 = vpop.permute.xlu1 %1745 }
 0x30a   :  { %v2023_v60 = vpop.permute.xlu0 %2022  ;;  %1782 = vst.msk [vmem:[#allocation4 + $0x18] sm:$0xf] %vm1778_vm10, %v1746_v63 }
 0x30b   :  { %v1748_v56 = vpop.permute.xlu2 %1747 }
 0x30f   :  { %v7448_v51 = vpop.f32.mrf.mxu2 }
 0x311   :  { %2032 = vrot.lane.b32.xlu2 %v1628_v16, %s6452_s28  ;;  %v1837_v25 = vpop.permute.xlu1 %1836 }
 0x312   :  { %v1562_v46 = vpop.permute.xlu0 %1561  ;;  %1874 = vst.msk [vmem:[#allocation4 + $0x10] sm:$0xf] %vm1871_vm2, %v1837_v25 }
 0x313   :  { %v1839_v21 = vpop.permute.xlu2 %1838  ;;  %1967 = vst.msk [vmem:[#allocation4 + $0x10] sm:$0xf] %vm1964_vm1, %v1930_v53 }
 0x314   :  { %2060 = vst.msk [vmem:[#allocation4 + $0x10] sm:$0xf] %vm2057_vm0, %v2023_v60 }
 0x315   :  { %1597 = vst.msk [vmem:[#allocation4 + $0x20] sm:$0xf] %vm1592_vm8, %v1562_v46 }
 0x316   :  { %1875 = vst.msk [vmem:[#allocation4 + $0x18] sm:$0xf] %vm1871_vm2, %v1839_v21 }
 0x317   :  { %v7453_v22 = vpop.f32.mrf.mxu2 }
 0x319   :  { %v1655_v20 = vpop.permute.xlu1 %1654 }
 0x31a   :  { %v1932_v41 = vpop.permute.xlu0 %1931  ;;  %1690 = vst.msk [vmem:[#allocation4 + $0x20] sm:$0xf] %vm1685_vm9, %v1655_v20 }
 0x31b   :  { %v1657_v16 = vpop.permute.xlu2 %1656  ;;  %1783 = vst.msk [vmem:[#allocation4 + $0x20] sm:$0xf] %vm1778_vm10, %v1748_v56  ;;  %v5929_v60 = vld [vmem:[#allocation4 + $0x10] sm:$0xf] }
 0x31c   :  { %1968 = vst.msk [vmem:[#allocation4 + $0x18] sm:$0xf] %vm1964_vm1, %v1932_v41 }
 0x31f   :  { %v7458_v20 = vpop.f32.mrf.mxu2 }
 0x321   :  { %v2025_v15 = vpop.permute.xlu1 %2024 }
 0x322   :  { %v1471_v19 = vpop.permute.xlu0 %1470  ;;  %2061 = vst.msk [vmem:[#allocation4 + $0x18] sm:$0xf] %vm2057_vm0, %v2025_v15 }
 0x323   :  { %v2027_v53 = vpop.permute.xlu2 %2026  ;;  %1505 = vst.msk [vmem:[#allocation4 + $0x28] sm:$0xf] %vm1499_vm7, %v1471_v19 }
 0x327   :  { %v7463_v6 = vpop.f32.mrf.mxu2 }
 0x329   :  { %v6343_v63 = vld [vmem:[#allocation4 + $0x14] sm:$0xf0]  ;;  %v1564_v25 = vpop.permute.xlu1 %1563 }
 0x32a   :  { %v1750_v46 = vpop.permute.xlu0 %1749  ;;  %1598 = vst.msk [vmem:[#allocation4 + $0x28] sm:$0xf] %vm1592_vm8, %v1564_v25  ;;  %v5930_v21 = vor.u32 %v6343_v63, %v5929_v60 }
 0x32b   :  { %v1566_v56 = vpop.permute.xlu2 %1565  ;;  %1691 = vst.msk [vmem:[#allocation4 + $0x28] sm:$0xf] %vm1685_vm9, %v1657_v16 }
 0x32c   :  { %1784 = vst.msk [vmem:[#allocation4 + $0x28] sm:$0xf] %vm1778_vm10, %v1750_v46  ;;  %2294 = vmatmul.bf16.gmra.mxu1 %v5930_v21 }
 0x32f   :  { %v7470_v21 = vpop.f32.mrf.mxu2 }
 0x331   :  { %v1934_v41 = vpop.permute.xlu1 %1933 }
 0x332   :  { %v1841_v15 = vpop.permute.xlu0 %1840 }
 0x333   :  { %1876 = vst.msk [vmem:[#allocation4 + $0x20] sm:$0xf] %vm1871_vm2, %v1841_v15  ;;  %v1936_v19 = vpop.permute.xlu2 %1935 }
 0x334   :  { %1969 = vst.msk [vmem:[#allocation4 + $0x20] sm:$0xf] %vm1964_vm1, %v1934_v41 }
 0x335   :  { %2062 = vst.msk [vmem:[#allocation4 + $0x20] sm:$0xf] %vm2057_vm0, %v2027_v53 }
 0x339   :  { %v1473_v25 = vpop.permute.xlu1 %1472 }
 0x33a   :  { %v1659_v9 = vpop.permute.xlu0 %1658  ;;  %1506 = vst.msk [vmem:[#allocation4 + $0x30] sm:$0xf] %vm1499_vm7, %v1473_v25 }
 0x33b   :  { %v1475_v16 = vpop.permute.xlu2 %1474  ;;  %1599 = vst.msk [vmem:[#allocation4 + $0x30] sm:$0xf] %vm1592_vm8, %v1566_v56 }
 0x33c   :  { %1692 = vst.msk [vmem:[#allocation4 + $0x30] sm:$0xf] %vm1685_vm9, %v1659_v9 }
 0x33d   :  { %1507 = vst.msk [vmem:[#allocation4 + $0x38] sm:$0xf] %vm1499_vm7, %v1475_v16  ;;  %v5937_v16 = vld [vmem:[#allocation4 + $0x20] sm:$0xf] }
 0x341   :  { %v1752_v63 = vpop.permute.xlu1 %1751 }
 0x342   :  { %v2029_v60 = vpop.permute.xlu0 %2028  ;;  %1785 = vst.msk [vmem:[#allocation4 + $0x30] sm:$0xf] %vm1778_vm10, %v1752_v63 }
 0x343   :  { %v1754_v46 = vpop.permute.xlu2 %1753 }
 0x349   :  { %v1843_v53 = vpop.permute.xlu1 %1842 }
 0x34a   :  { %v1568_v41 = vpop.permute.xlu0 %1567  ;;  %1877 = vst.msk [vmem:[#allocation4 + $0x28] sm:$0xf] %vm1871_vm2, %v1843_v53 }
 0x34b   :  { %1970 = vst.msk [vmem:[#allocation4 + $0x28] sm:$0xf] %vm1964_vm1, %v1936_v19  ;;  %v1845_v15 = vpop.permute.xlu2 %1844 }
 0x34c   :  { %2063 = vst.msk [vmem:[#allocation4 + $0x28] sm:$0xf] %vm2057_vm0, %v2029_v60  ;;  %v7475_v56 = vpop.f32.mrf.mxu2  ;;  %v6380_v60 = vld [vmem:[%s8502_s6 + $0x38] sm:$0xff] }
 0x34d   :  { %1600 = vst.msk [vmem:[#allocation4 + $0x38] sm:$0xf] %vm1592_vm8, %v1568_v41  ;;  %3369 = vmatpush.bf16.msrb.mxu3 %v6380_v60 }
 0x34e   :  { %1878 = vst.msk [vmem:[#allocation4 + $0x30] sm:$0xf] %vm1871_vm2, %v1845_v15 }
 0x351   :  { %v1661_v9 = vpop.permute.xlu1 %1660 }
 0x352   :  { %v1938_v25 = vpop.permute.xlu0 %1937  ;;  %1693 = vst.msk [vmem:[#allocation4 + $0x38] sm:$0xf] %vm1685_vm9, %v1661_v9 }
 0x353   :  { %v6345_v63 = vld [vmem:[#allocation4 + $0x24] sm:$0xf0]  ;;  %1786 = vst.msk [vmem:[#allocation4 + $0x38] sm:$0xf] %vm1778_vm10, %v1754_v46  ;;  %v1572_v9 = vpop.permute.xlu2 %1571 }
 0x354   :  { %1971 = vst.msk [vmem:[#allocation4 + $0x30] sm:$0xf] %vm1964_vm1, %v1938_v25  ;;  %v2365_v19 = vpop.f32.mrf.mxu2  ;;  %v5938_v53 = vor.u32 %v6345_v63, %v5937_v16 }
 0x355   :  { %v7513_v19 = vld [vmem:[%s8501_s5] ss:$0 sm:$0xff] }
 0x356   :  { %2299 = vmatmul.bf16.gmra.mxu1 %v5938_v53 }
 0x359   :  { %v2031_v41 = vpop.permute.xlu1 %2030 }
 0x35a   :  { %v1477_v15 = vpop.permute.xlu0 %1476  ;;  %2064 = vst.msk [vmem:[#allocation4 + $0x30] sm:$0xf] %vm2057_vm0, %v2031_v41 }
 0x35b   :  { %1508 = vst.msk [vmem:[#allocation4 + $0x40] sm:$0xf] %vm1499_vm7, %v1477_v15  ;;  %v1663_v46 = vpop.permute.xlu2 %1662 }
 0x361   :  { %v1479_v14 = vpop.permute.xlu1 %1478  ;;  %v5945_v53 = vld [vmem:[#allocation4 + $0x30] sm:$0xf] }
 0x362   :  { %v1665_v7 = vpop.permute.xlu0 %1664  ;;  %1509 = vst.msk [vmem:[#allocation4 + $0x48] sm:$0xf] %vm1499_vm7, %v1479_v14 }
 0x363   :  { %1602 = vst.msk [vmem:[#allocation4 + $0x48] sm:$0xf] %vm1592_vm8, %v1572_v9  ;;  %v1942_v14 = vpop.permute.xlu2 %1941 }
 0x364   :  { %1695 = vst.msk [vmem:[#allocation4 + $0x48] sm:$0xf] %vm1685_vm9, %v1665_v7 }
 0x365   :  { %1788 = vst.msk [vmem:[#allocation4 + $0x48] sm:$0xf] %vm1778_vm10, %v7286_v32 }
 0x366   :  { %1881 = vst.msk [vmem:[#allocation4 + $0x48] sm:$0xf] %vm1871_vm2, %v7288_v38  ;;  %v6379_v38 = vld [vmem:[%s8502_s6 + $0x30] sm:$0xff] }
 0x367   :  { %1974 = vst.msk [vmem:[#allocation4 + $0x48] sm:$0xf] %vm1964_vm1, %v7303_v0  ;;  %3370 = vmatpush.bf16.msrb.mxu3 %v6379_v38 }
 0x368   :  { %2067 = vst.msk [vmem:[#allocation4 + $0x48] sm:$0xf] %vm2057_vm0, %v7301_v33 }
 0x369   :  { %v1570_v25 = vpop.permute.xlu1 %1569 }
 0x36a   :  { %v1756_v16 = vpop.permute.xlu0 %1755  ;;  %1601 = vst.msk [vmem:[#allocation4 + $0x40] sm:$0xf] %vm1592_vm8, %v1570_v25 }
 0x36b   :  { %1694 = vst.msk [vmem:[#allocation4 + $0x40] sm:$0xf] %vm1685_vm9, %v1663_v46  ;;  %v2033_v63 = vpop.permute.xlu2 %2032 }
 0x36c   :  { %1787 = vst.msk [vmem:[#allocation4 + $0x40] sm:$0xf] %vm1778_vm10, %v1756_v16 }
 0x371   :  { %v1849_v7 = vpop.permute.xlu1 %1848 }
 0x372   :  { %v1847_v32 = vpop.permute.xlu0 %1846  ;;  %1880 = vst.msk [vmem:[#allocation4 + $0x40] sm:$0xf] %vm1871_vm2, %v1849_v7 }
 0x373   :  { %1973 = vst.msk [vmem:[#allocation4 + $0x40] sm:$0xf] %vm1964_vm1, %v1942_v14 }
 0x374   :  { %1879 = vst.msk [vmem:[#allocation4 + $0x38] sm:$0xf] %vm1871_vm2, %v1847_v32 }
 0x379   :  { %v1940_v33 = vpop.permute.xlu1 %1939 }
 0x37a   :  { %v2035_v0 = vpop.permute.xlu0 %2034  ;;  %1972 = vst.msk [vmem:[#allocation4 + $0x38] sm:$0xf] %vm1964_vm1, %v1940_v33 }
 0x37b   :  { %2065 = vst.msk [vmem:[#allocation4 + $0x38] sm:$0xf] %vm2057_vm0, %v2033_v63 }
 0x37c   :  { %2066 = vst.msk [vmem:[#allocation4 + $0x40] sm:$0xf] %vm2057_vm0, %v2035_v0  ;;  %v6349_v0 = vld [vmem:[#allocation4 + $0x44] sm:$0xf0] }
 0x382   :  { %v6347_v60 = vld [vmem:[#allocation4 + $0x34] sm:$0xf0] }
 0x383   :  { %v5946_v15 = vor.u32 %v6347_v60, %v5945_v53  ;;  %v5953_v38 = vld [vmem:[#allocation4 + $0x40] sm:$0xf]  ;;  %v6378_v53 = vld [vmem:[%s8502_s6 + $0x28] sm:$0xff] }
 0x384   :  { %v2290_v41 = vpop.f32.mrf.mxu1  ;;  %3371 = vmatpush.bf16.msrb.mxu3 %v6378_v53 }
 0x385   :  { %v2291_v9 = vadd.f32 %v7513_v19, %v2290_v41  ;;  %2304 = vmatmul.bf16.gmra.mxu1 %v5946_v15 }
 0x387   :  { %v2334_v46 = vadd.f32 %v7373_v61, %v2291_v9  ;;  %v5954_v61 = vor.u32 %v6349_v0, %v5953_v38  ;;  %v5961_v0 = vld [vmem:[#allocation4 + $0x50] sm:$0xf] }
 0x389   :  { %v2367_v25 = vmax.f32 %v2334_v46, 0.0 }
 0x38b   :  { %v2458_v16 = vmul.f32 %v7009_v18, %v2367_v25 }
 0x38c   :  { %v2292_v14 = vpop.f32.mrf.mxu1 }
 0x38d   :  { %2471 = vst.msk [vmem:[#allocation3 + $0x8] sm:$0xff] %vm910_vm3, %v2458_v16  ;;  %v2293_v7 = vadd.f32 %v7513_v19, %v2292_v14 }
 0x38f   :  { %v2336_v32 = vadd.f32 %v7383_v58, %v2293_v7 }
 0x391   :  { %v2368_v33 = vmax.f32 %v2336_v32, 0.0 }
 0x393   :  { %v2459_v63 = vmul.f32 %v7019_v36, %v2368_v33  ;;  %v6381_v33 = vld [vmem:[%s8502_s6 + $0x40] sm:$0xff] }
 0x394   :  { %v2705_v60 = vld [vmem:[#allocation3 + $0x7] sm:$0xff]  ;;  %3419 = vmatpush.bf16.msra.mxu2 %v6381_v33 }
 0x395   :  { %v2614_v41 = vld [vmem:[#allocation3 + $0x2] sm:$0xff]  ;;  %2472 = vst.msk [vmem:[#allocation3 + $0x10] sm:$0xff] %vm910_vm3, %v2459_v63  ;;  %v2718_v15 = vpack.c.bf16 %v2705_v60, %v2705_v60  ;;  %2309 = vmatmul.bf16.gmra.mxu1 %v5954_v61  ;;  %v6351_v63 = vld [vmem:[#allocation4 + $0x54] sm:$0xf0] }
 0x396   :  { %v2523_v18 = vld [vmem:[#allocation3 + $0x1] sm:$0xff]  ;;  %v2627_v9 = vpack.c.bf16 %v2614_v41, %v2614_v41  ;;  %v5962_v60 = vor.u32 %v6351_v63, %v5961_v0 }
 0x397   :  { %v2536_v46 = vpack.c.bf16 %v2523_v18, %v2523_v18  ;;  %v2796_v25 = vld [vmem:[#allocation3 + $0x8] sm:$0xff]  ;;  %2744 = vrot.lane.b32.xlu2 %v2718_v15, %s6454_s2 }
 0x398   :  { %v2809_v58 = vpack.c.bf16 %v2796_v25, %v2796_v25  ;;  %2653 = vrot.lane.b32.xlu1 %v2627_v9, %s6455_s13  ;;  %v6377_v25 = vld [vmem:[%s8502_s6 + $0x20] sm:$0xff] }
 0x399   :  { %2562 = vrot.lane.b32.xlu0 %v2536_v46, %s6456_s14  ;;  %3372 = vmatpush.bf16.msrb.mxu3 %v6377_v25 }
 0x39a   :  { %2511 = vst.msk [vmem:[#allocation4 + $0x8] sm:$0xf] %vm1406_vm5, %v2809_v58 }
 0x39c   :  { %v2615_v36 = vld [vmem:[#allocation3 + $0xa] sm:$0xff] }
 0x39d   :  { %v2524_v16 = vld [vmem:[#allocation3 + $0x9] sm:$0xff]  ;;  %v2628_v14 = vpack.c.bf16 %v2615_v36, %v2615_v36  ;;  %v2183_v36 = vunpack.c.l.b16 %v7347_v34 }
 0x39e   :  { %v2537_v7 = vpack.c.bf16 %v2524_v16, %v2524_v16  ;;  %v2797_v32 = vld [vmem:[#allocation3 + $0x10] sm:$0xff] }
 0x39f   :  { %v2810_v38 = vpack.c.bf16 %v2797_v32, %v2797_v32  ;;  %2655 = vrot.lane.b32.xlu2 %v2628_v14, %s6455_s13  ;;  %v2978_v53 = vld [vmem:[#allocation3 + $0xe] sm:$0xff] }
 0x3a0   :  { %2564 = vrot.lane.b32.xlu1 %v2537_v7, %s6456_s14  ;;  %v2706_v61 = vld [vmem:[#allocation3 + $0xf] sm:$0xff]  ;;  %v2991_v41 = vpack.c.bf16 %v2978_v53, %v2978_v53 }
 0x3a1   :  { %2835 = vrot.lane.b32.xlu0 %v2809_v58, %s6453_s3  ;;  %3186 = vst.msk [vmem:[#allocation4 + $0x4] sm:$0xf] %vm1406_vm5, %v2810_v38  ;;  %v2719_v18 = vpack.c.bf16 %v2706_v61, %v2706_v61 }
 0x3a2   :  { %2512 = vst.msk [vmem:[#allocation4 + $0x10] sm:$0xf] %vm1406_vm5, %v2810_v38 }
 0x3a5   :  { %2314 = vmatmul.bf16.gmra.mxu1 %v5962_v60 }
 0x3a7   :  { %3017 = vrot.lane.b32.xlu2 %v2991_v41, %s6451_s27 }
 0x3a8   :  { %2837 = vrot.lane.b32.xlu1 %v2810_v38, %s6453_s3 }
 0x3a9   :  { %2746 = vrot.lane.b32.xlu0 %v2719_v18, %s6454_s2  ;;  %v2295_v15 = vpop.f32.mrf.mxu1 }
 0x3aa   :  { %v2296_v9 = vadd.f32 %v7513_v19, %v2295_v15 }
 0x3ac   :  { %v2339_v46 = vadd.f32 %v7402_v17, %v2296_v9  ;;  %v2197_v17 = vpack.c.b16 %v2183_v36, %v2183_v36  ;;  %v6361_v9 = vld [vmem:[#allocation4 + $0x4] sm:$0xf]  ;;  %v6376_v36 = vld [vmem:[%s8502_s6 + $0x18] sm:$0xff] }
 0x3ad   :  { %3373 = vmatpush.bf16.msrb.mxu3 %v6376_v36 }
 0x3ae   :  { %v2369_v58 = vmax.f32 %v2339_v46, 0.0 }
 0x3b0   :  { %2926 = vrot.lane.b32.xlu1 %v2537_v7, %s6457_s1  ;;  %v2460_v16 = vmul.f32 %v7021_v42, %v2369_v58 }
 0x3b1   :  { %3108 = vrot.lane.b32.xlu0 %v2719_v18, %s6452_s28  ;;  %v2297_v14 = vpop.f32.mrf.mxu1 }
 0x3b2   :  { %2473 = vst.msk [vmem:[#allocation3 + $0x18] sm:$0xff] %vm910_vm3, %v2460_v16  ;;  %v2298_v32 = vadd.f32 %v7513_v19, %v2297_v14 }
 0x3b4   :  { %v2341_v38 = vadd.f32 %v7412_v12, %v2298_v32 }
 0x3b5   :  { %2319 = vmatmul.bf16.gmra.mxu1 %v2197_v17 }
 0x3b6   :  { %v2370_v33 = vmax.f32 %v2341_v38, 0.0 }
 0x3b8   :  { %v2461_v0 = vmul.f32 %v7016_v28, %v2370_v33 }
 0x3b9   :  { %v2525_v7 = vld [vmem:[#allocation3 + $0x11] sm:$0xff] }
 0x3ba   :  { %v2707_v63 = vld [vmem:[#allocation3 + $0x17] sm:$0xff]  ;;  %2474 = vst.msk [vmem:[#allocation3 + $0x20] sm:$0xff] %vm910_vm3, %v2461_v0  ;;  %v2538_v34 = vpack.c.bf16 %v2525_v7, %v2525_v7 }
 0x3bb   :  { %v2616_v53 = vld [vmem:[#allocation3 + $0x12] sm:$0xff]  ;;  %v2720_v61 = vpack.c.bf16 %v2707_v63, %v2707_v63 }
 0x3bc   :  { %v2629_v42 = vpack.c.bf16 %v2616_v53, %v2616_v53  ;;  %v2798_v60 = vld [vmem:[#allocation3 + $0x18] sm:$0xff]  ;;  %2566 = vrot.lane.b32.xlu2 %v2538_v34, %s6456_s14 }
 0x3bd   :  { %v2811_v41 = vpack.c.bf16 %v2798_v60, %v2798_v60  ;;  %2748 = vrot.lane.b32.xlu1 %v2720_v61, %s6454_s2  ;;  %v2979_v28 = vld [vmem:[#allocation3 + $0x16] sm:$0xff] }
 0x3be   :  { %2657 = vrot.lane.b32.xlu0 %v2629_v42, %s6455_s13  ;;  %v2992_v18 = vpack.c.bf16 %v2979_v28, %v2979_v28 }
 0x3bf   :  { %3187 = vst.msk [vmem:[#allocation4 + $0xc] sm:$0xf] %vm1406_vm5, %v2811_v41 }
 0x3c0   :  { %2513 = vst.msk [vmem:[#allocation4 + $0x18] sm:$0xf] %vm1406_vm5, %v2811_v41 }
 0x3c1   :  { %v2799_v12 = vld [vmem:[#allocation3 + $0x20] sm:$0xff] }
 0x3c2   :  { %v2812_v15 = vpack.c.bf16 %v2799_v12, %v2799_v12  ;;  %v2617_v58 = vld [vmem:[#allocation3 + $0x1a] sm:$0xff] }
 0x3c3   :  { %v2526_v16 = vld [vmem:[#allocation3 + $0x19] sm:$0xff]  ;;  %v2630_v14 = vpack.c.bf16 %v2617_v58, %v2617_v58 }
 0x3c4   :  { %2839 = vrot.lane.b32.xlu2 %v2811_v41, %s6453_s3  ;;  %3188 = vst.msk [vmem:[#allocation4 + $0x14] sm:$0xf] %vm1406_vm5, %v2812_v15  ;;  %v2539_v32 = vpack.c.bf16 %v2526_v16, %v2526_v16  ;;  %v2708_v17 = vld [vmem:[#allocation3 + $0x1f] sm:$0xff] }
 0x3c5   :  { %3110 = vrot.lane.b32.xlu1 %v2720_v61, %s6452_s28  ;;  %2514 = vst.msk [vmem:[#allocation4 + $0x20] sm:$0xf] %vm1406_vm5, %v2812_v15  ;;  %v2980_v38 = vld [vmem:[#allocation3 + $0x1e] sm:$0xff]  ;;  %v2721_v33 = vpack.c.bf16 %v2708_v17, %v2708_v17 }
 0x3c6   :  { %v6014_v46 = vld [vmem:[#allocation4 + $0x8] sm:$0xf0]  ;;  %3019 = vrot.lane.b32.xlu0 %v2992_v18, %s6451_s27  ;;  %v2993_v0 = vpack.c.bf16 %v2980_v38, %v2980_v38 }
 0x3c7   :  { %v6017_v25 = vor.u32 %v6361_v9, %v6014_v46 }
 0x3c9   :  { %6094 = vmatmul.msk.bf16.vlgmr.msra.gmra.mxu2 %vm910_vm3, %v6017_v25 }
 0x3cc   :  { %2928 = vrot.lane.b32.xlu2 %v2538_v34, %s6457_s1 }
 0x3cd   :  { %2659 = vrot.lane.b32.xlu1 %v2630_v14, %s6455_s13  ;;  %v6363_v14 = vld [vmem:[#allocation4 + $0x14] sm:$0xf] }
 0x3ce   :  { %2568 = vrot.lane.b32.xlu0 %v2539_v32, %s6456_s14 }
 0x3d3   :  { %v2300_v7 = vpop.f32.mrf.mxu1 }
 0x3d4   :  { %v2301_v63 = vadd.f32 %v7513_v19, %v2300_v7  ;;  %2750 = vrot.lane.b32.xlu2 %v2721_v33, %s6454_s2 }
 0x3d5   :  { %3021 = vrot.lane.b32.xlu1 %v2993_v0, %s6451_s27  ;;  %v6375_v0 = vld [vmem:[%s8502_s6 + $0x10] sm:$0xff] }
 0x3d6   :  { %2841 = vrot.lane.b32.xlu0 %v2812_v15, %s6453_s3  ;;  %v2344_v53 = vadd.f32 %v7423_v23, %v2301_v63  ;;  %3374 = vmatpush.bf16.msrb.mxu3 %v6375_v0 }
 0x3d8   :  { %v2371_v34 = vmax.f32 %v2344_v53, 0.0 }
 0x3da   :  { %v2462_v61 = vmul.f32 %v7031_v31, %v2371_v34 }
 0x3db   :  { %v2302_v42 = vpop.f32.mrf.mxu1 }
 0x3dc   :  { %2475 = vst.msk [vmem:[#allocation3 + $0x28] sm:$0xff] %vm910_vm3, %v2462_v61  ;;  %v2303_v60 = vadd.f32 %v7513_v19, %v2302_v42  ;;  %3112 = vrot.lane.b32.xlu2 %v2721_v33, %s6452_s28 }
 0x3de   :  { %2930 = vrot.lane.b32.xlu0 %v2539_v32, %s6457_s1  ;;  %v2346_v41 = vadd.f32 %v7434_v3, %v2303_v60 }
 0x3e0   :  { %v2372_v28 = vmax.f32 %v2346_v41, 0.0 }
 0x3e2   :  { %v2463_v12 = vmul.f32 %v7034_v40, %v2372_v28 }
 0x3e3   :  { %v2618_v18 = vld [vmem:[#allocation3 + $0x22] sm:$0xff] }
 0x3e4   :  { %v2527_v15 = vld [vmem:[#allocation3 + $0x21] sm:$0xff]  ;;  %2476 = vst.msk [vmem:[#allocation3 + $0x30] sm:$0xff] %vm910_vm3, %v2463_v12  ;;  %v2631_v31 = vpack.c.bf16 %v2618_v18, %v2618_v18 }
 0x3e5   :  { %v2709_v23 = vld [vmem:[#allocation3 + $0x27] sm:$0xff]  ;;  %v2540_v9 = vpack.c.bf16 %v2527_v15, %v2527_v15 }
 0x3e6   :  { %v2722_v46 = vpack.c.bf16 %v2709_v23, %v2709_v23  ;;  %v2800_v25 = vld [vmem:[#allocation3 + $0x28] sm:$0xff]  ;;  %2661 = vrot.lane.b32.xlu2 %v2631_v31, %s6455_s13 }
 0x3e7   :  { %v2813_v58 = vpack.c.bf16 %v2800_v25, %v2800_v25  ;;  %2570 = vrot.lane.b32.xlu1 %v2540_v9, %s6456_s14  ;;  %v2981_v40 = vld [vmem:[#allocation3 + $0x26] sm:$0xff] }
 0x3e8   :  { %2752 = vrot.lane.b32.xlu0 %v2722_v46, %s6454_s2  ;;  %v2994_v36 = vpack.c.bf16 %v2981_v40, %v2981_v40 }
 0x3e9   :  { %3189 = vst.msk [vmem:[#allocation4 + $0x1c] sm:$0xf] %vm1406_vm5, %v2813_v58 }
 0x3ea   :  { %2515 = vst.msk [vmem:[#allocation4 + $0x28] sm:$0xf] %vm1406_vm5, %v2813_v58 }
 0x3eb   :  { %v2801_v3 = vld [vmem:[#allocation3 + $0x30] sm:$0xff] }
 0x3ec   :  { %v2814_v16 = vpack.c.bf16 %v2801_v3, %v2801_v3  ;;  %v2528_v38 = vld [vmem:[#allocation3 + $0x29] sm:$0xff] }
 0x3ed   :  { %v2619_v33 = vld [vmem:[#allocation3 + $0x2a] sm:$0xff]  ;;  %v2541_v7 = vpack.c.bf16 %v2528_v38, %v2528_v38 }
 0x3ee   :  { %3023 = vrot.lane.b32.xlu2 %v2994_v36, %s6451_s27  ;;  %3190 = vst.msk [vmem:[#allocation4 + $0x24] sm:$0xf] %vm1406_vm5, %v2814_v16  ;;  %v2632_v63 = vpack.c.bf16 %v2619_v33, %v2619_v33  ;;  %v2710_v53 = vld [vmem:[#allocation3 + $0x2f] sm:$0xff] }
 0x3ef   :  { %2843 = vrot.lane.b32.xlu1 %v2813_v58, %s6453_s3  ;;  %2516 = vst.msk [vmem:[#allocation4 + $0x30] sm:$0xf] %vm1406_vm5, %v2814_v16  ;;  %v2982_v61 = vld [vmem:[#allocation3 + $0x2e] sm:$0xff]  ;;  %v2723_v42 = vpack.c.bf16 %v2710_v53, %v2710_v53 }
 0x3f0   :  { %v6022_v32 = vld [vmem:[#allocation4 + $0x18] sm:$0xf0]  ;;  %3114 = vrot.lane.b32.xlu0 %v2722_v46, %s6452_s28  ;;  %v2995_v60 = vpack.c.bf16 %v2982_v61, %v2982_v61 }
 0x3f1   :  { %v6025_v17 = vor.u32 %v6363_v14, %v6022_v32  ;;  %v2745_v34 = vpop.permute.xlu2 %2744 }
 0x3f3   :  { %6095 = vmatmul.msk.bf16.gmra.mxu2 %vm910_vm3, %v6025_v17 }
 0x3f6   :  { %2572 = vrot.lane.b32.xlu2 %v2541_v7, %s6456_s14 }
 0x3f7   :  { %2932 = vrot.lane.b32.xlu1 %v2540_v9, %s6457_s1 }
 0x3f8   :  { %2663 = vrot.lane.b32.xlu0 %v2632_v63, %s6455_s13 }
 0x3f9   :  { %v2656_v12 = vpop.permute.xlu2 %2655 }
 0x3fe   :  { %2845 = vrot.lane.b32.xlu2 %v2814_v16, %s6453_s3 }
 0x3ff   :  { %2754 = vrot.lane.b32.xlu1 %v2723_v42, %s6454_s2 }
 0x400   :  { %3025 = vrot.lane.b32.xlu0 %v2995_v60, %s6451_s27 }
 0x401   :  { %v3018_v40 = vpop.permute.xlu2 %3017 }
 0x402   :  { %v2305_v41 = vpop.f32.mrf.mxu1 }
 0x403   :  { %v2306_v28 = vadd.f32 %v7513_v19, %v2305_v41 }
 0x405   :  { %v2349_v18 = vadd.f32 %v7439_v62, %v2306_v28  ;;  %v6374_v62 = vld [vmem:[%s8502_s6 + $0x8] sm:$0xff] }
 0x406   :  { %2934 = vrot.lane.b32.xlu2 %v2541_v7, %s6457_s1  ;;  %3375 = vmatpush.bf16.msrb.mxu3 %v6374_v62 }
 0x407   :  { %3116 = vrot.lane.b32.xlu1 %v2723_v42, %s6452_s28  ;;  %v2373_v15 = vmax.f32 %v2349_v18, 0.0 }
 0x409   :  { %v2464_v31 = vmul.f32 %v7029_v1, %v2373_v15 }
 0x40a   :  { %v2654_v23 = vpop.permute.xlu1 %2653  ;;  %v2307_v46 = vpop.f32.mrf.mxu1 }
 0x40b   :  { %v2563_v9 = vpop.permute.xlu0 %2562  ;;  %2477 = vst.msk [vmem:[#allocation3 + $0x38] sm:$0xff] %vm910_vm3, %v2464_v31  ;;  %v2308_v25 = vadd.f32 %v7513_v19, %v2307_v46 }
 0x40c   :  { %2601 = vst.msk [vmem:[#allocation4] sm:$0xf] %vm1499_vm7, %v2563_v9 }
 0x40d   :  { %2692 = vst.msk [vmem:[#allocation4] sm:$0xf] %vm1592_vm8, %v2654_v23  ;;  %v2351_v58 = vadd.f32 %v7448_v51, %v2308_v25 }
 0x40e   :  { %2783 = vst.msk [vmem:[#allocation4] sm:$0xf] %vm1685_vm9, %v2745_v34 }
 0x40f   :  { %v2374_v1 = vmax.f32 %v2351_v58, 0.0 }
 0x411   :  { %v2465_v36 = vmul.f32 %v7042_v35, %v2374_v1 }
 0x412   :  { %v2565_v3 = vpop.permute.xlu1 %2564  ;;  %v2310_v14 = vpop.f32.mrf.mxu1  ;;  %v2711_v32 = vld [vmem:[#allocation3 + $0x37] sm:$0xff] }
 0x413   :  { %2602 = vst.msk [vmem:[#allocation4 + $0x8] sm:$0xf] %vm1499_vm7, %v2565_v3  ;;  %v2836_v16 = vpop.permute.xlu0 %2835  ;;  %v2620_v17 = vld [vmem:[#allocation3 + $0x32] sm:$0xff]  ;;  %v2311_v33 = vadd.f32 %v7513_v19, %v2310_v14  ;;  %v2724_v51 = vpack.c.bf16 %v2711_v32, %v2711_v32 }
 0x414   :  { %2693 = vst.msk [vmem:[#allocation4 + $0x8] sm:$0xf] %vm1592_vm8, %v2656_v12  ;;  %v2529_v38 = vld [vmem:[#allocation3 + $0x31] sm:$0xff]  ;;  %v2633_v0 = vpack.c.bf16 %v2620_v17, %v2620_v17 }
 0x415   :  { %2478 = vst.msk [vmem:[#allocation3 + $0x40] sm:$0xff] %vm910_vm3, %v2465_v36  ;;  %v2542_v7 = vpack.c.bf16 %v2529_v38, %v2529_v38  ;;  %v2802_v63 = vld [vmem:[#allocation3 + $0x38] sm:$0xff]  ;;  %v2354_v53 = vadd.f32 %v7453_v22, %v2311_v33  ;;  %2756 = vrot.lane.b32.xlu2 %v2724_v51, %s6454_s2 }
 0x416   :  { %2874 = vst.msk [vmem:[#allocation4] sm:$0xf] %vm1778_vm10, %v2836_v16  ;;  %v2815_v35 = vpack.c.bf16 %v2802_v63, %v2802_v63  ;;  %2665 = vrot.lane.b32.xlu1 %v2633_v0, %s6455_s13  ;;  %v2567_v34 = vpop.permute.xlu2 %2566  ;;  %v2983_v60 = vld [vmem:[#allocation3 + $0x36] sm:$0xff] }
 0x417   :  { %2574 = vrot.lane.b32.xlu0 %v2542_v7, %s6456_s14  ;;  %v2375_v61 = vmax.f32 %v2354_v53, 0.0  ;;  %2603 = vst.msk [vmem:[#allocation4 + $0x10] sm:$0xf] %vm1499_vm7, %v2567_v34  ;;  %v2996_v18 = vpack.c.bf16 %v2983_v60, %v2983_v60 }
 0x418   :  { %3191 = vst.msk [vmem:[#allocation4 + $0x2c] sm:$0xf] %vm1406_vm5, %v2815_v35 }
 0x419   :  { %2517 = vst.msk [vmem:[#allocation4 + $0x38] sm:$0xf] %vm1406_vm5, %v2815_v35  ;;  %v2466_v41 = vmul.f32 %v7044_v52, %v2375_v61  ;;  %v6365_v52 = vld [vmem:[#allocation4 + $0x24] sm:$0xf] }
 0x41a   :  { %v2838_v42 = vpop.permute.xlu1 %2837  ;;  %v2312_v22 = vpop.f32.mrf.mxu1 }
 0x41b   :  { %v2747_v28 = vpop.permute.xlu0 %2746  ;;  %2479 = vst.msk [vmem:[#allocation3 + $0x48] sm:$0xff] %vm910_vm3, %v2466_v41  ;;  %v2313_v12 = vadd.f32 %v7513_v19, %v2312_v22 }
 0x41c   :  { %2784 = vst.msk [vmem:[#allocation4 + $0x8] sm:$0xf] %vm1685_vm9, %v2747_v28  ;;  %v2803_v15 = vld [vmem:[#allocation3 + $0x40] sm:$0xff] }
 0x41d   :  { %2875 = vst.msk [vmem:[#allocation4 + $0x8] sm:$0xf] %vm1778_vm10, %v2838_v42  ;;  %v2816_v23 = vpack.c.bf16 %v2803_v15, %v2803_v15  ;;  %v2356_v31 = vadd.f32 %v7458_v20, %v2313_v12  ;;  %3118 = vrot.lane.b32.xlu2 %v2724_v51, %s6452_s28  ;;  %v2621_v20 = vld [vmem:[#allocation3 + $0x3a] sm:$0xff]  ;;  %v6373_v51 = vld [vmem:[%s8502_s6] sm:$0xff] }
 0x41e   :  { %3027 = vrot.lane.b32.xlu1 %v2996_v18, %s6451_s27  ;;  %v7641_v46 = vpop.permute.xlu2 %2839  ;;  %v2530_v1 = vld [vmem:[#allocation3 + $0x39] sm:$0xff]  ;;  %v2634_v17 = vpack.c.bf16 %v2621_v20, %v2621_v20  ;;  %3376 = vmatpush.bf16.msrb.mxu3 %v6373_v51 }
 0x41f   :  { %v6030_v9 = vld [vmem:[#allocation4 + $0x28] sm:$0xf0]  ;;  %2847 = vrot.lane.b32.xlu0 %v2815_v35, %s6453_s3  ;;  %3192 = vst.msk [vmem:[#allocation4 + $0x34] sm:$0xf] %vm1406_vm5, %v2816_v23  ;;  %v2376_v62 = vmax.f32 %v2356_v31, 0.0  ;;  %v2543_v38 = vpack.c.bf16 %v2530_v1, %v2530_v1 }
 0x420   :  { %v6033_v25 = vor.u32 %v6365_v52, %v6030_v9  ;;  %2518 = vst.msk [vmem:[#allocation4 + $0x40] sm:$0xf] %vm1406_vm5, %v2816_v23  ;;  %v2984_v53 = vld [vmem:[#allocation3 + $0x3e] sm:$0xff] }
 0x421   :  { %v2467_v3 = vmul.f32 %v7039_v24, %v2376_v62  ;;  %v3559_v24 = vld [vmem:[#allocation3] sm:$0xff]  ;;  %v2997_v41 = vpack.c.bf16 %v2984_v53, %v2984_v53 }
 0x422   :  { %6096 = vmatmul.msk.bf16.gmra.mxu2 %vm910_vm3, %v6033_v25  ;;  %v2927_v58 = vpop.permute.xlu1 %2926  ;;  %v2315_v36 = vpop.f32.mrf.mxu1  ;;  %v3167_v16 = vld [vmem:[#allocation3 + $0x48] sm:$0xff]  ;;  %v3572_v35 = vpack.c.bf16 %v3559_v24, %v3559_v24  ;;  %v2712_v34 = vld [vmem:[#allocation3 + $0x3f] sm:$0xff] }
 0x423   :  { %2965 = vst.msk [vmem:[#allocation4] sm:$0xf] %vm1871_vm2, %v2927_v58  ;;  %v3109_v14 = vpop.permute.xlu0 %3108  ;;  %v2316_v32 = vadd.f32 %v7513_v19, %v2315_v36  ;;  %v7651_v33 = vpack.c.bf16 %v3167_v16, %v3167_v16  ;;  %v2725_v22 = vpack.c.bf16 %v2712_v34, %v2712_v34 }
 0x424   :  { %3056 = vst.msk [vmem:[#allocation4] sm:$0xf] %vm1964_vm1, %v3018_v40 }
 0x425   :  { %2480 = vst.msk [vmem:[#allocation3 + $0x50] sm:$0xff] %vm910_vm3, %v2467_v3  ;;  %v2359_v40 = vadd.f32 %v7463_v6, %v2316_v32  ;;  %2667 = vrot.lane.b32.xlu2 %v2634_v17, %s6455_s13  ;;  %v2622_v32 = vld [vmem:[#allocation3 + $0x42] sm:$0xff] }
 0x426   :  { %3147 = vst.msk [vmem:[#allocation4] sm:$0xf] %vm2057_vm0, %v3109_v14  ;;  %2576 = vrot.lane.b32.xlu1 %v2543_v38, %s6456_s14  ;;  %v2929_v0 = vpop.permute.xlu2 %2928  ;;  %v6367_v12 = vld [vmem:[#allocation4 + $0x34] sm:$0xf] }
 0x427   :  { %3193 = vst.msk [vmem:[#allocation4 + $0x3c] sm:$0xf] %vm1406_vm5, %v7651_v33  ;;  %2936 = vrot.lane.b32.xlu0 %v2542_v7, %s6457_s1  ;;  %v2377_v63 = vmax.f32 %v2359_v40, 0.0  ;;  %v2635_v40 = vpack.c.bf16 %v2622_v32, %v2622_v32 }
 0x428   :  { %2519 = vst.msk [vmem:[#allocation4 + $0x48] sm:$0xf] %vm1406_vm5, %v7651_v33 }
 0x429   :  { %2966 = vst.msk [vmem:[#allocation4 + $0x8] sm:$0xf] %vm1871_vm2, %v2929_v0  ;;  %v2468_v6 = vmul.f32 %v7058_v45, %v2377_v63 }
 0x42a   :  { %v2317_v61 = vpop.f32.mrf.mxu1 }
 0x42b   :  { %2481 = vst.msk [vmem:[#allocation3 + $0x58] sm:$0xff] %vm910_vm3, %v2468_v6  ;;  %v2318_v7 = vadd.f32 %v7513_v19, %v2317_v61 }
 0x42c   :  { %v3168_v42 = vld [vmem:[#allocation3 + $0x50] sm:$0xff] }
 0x42d   :  { %v7667_v60 = vld [vmem:[#allocation4] sm:$0xf]  ;;  %v7671_v28 = vpack.c.bf16 %v3168_v42, %v3168_v42  ;;  %v2361_v15 = vadd.f32 %v7470_v21, %v2318_v7  ;;  %3029 = vrot.lane.b32.xlu2 %v2997_v41, %s6451_s27  ;;  %v2531_v21 = vld [vmem:[#allocation3 + $0x41] sm:$0xff] }
 0x42e   :  { %3585 = vst.msk [vmem:[#allocation4] sm:$0xf] %vm1406_vm5, %v3572_v35  ;;  %v6038_v18 = vld [vmem:[#allocation4 + $0x38] sm:$0xf0]  ;;  %2849 = vrot.lane.b32.xlu1 %v2816_v23, %s6453_s3  ;;  %v2751_v31 = vpop.permute.xlu2 %2750  ;;  %v2544_v1 = vpack.c.bf16 %v2531_v21, %v2531_v21  ;;  %v2985_v7 = vld [vmem:[#allocation3 + $0x46] sm:$0xff] }
 0x42f   :  { %v6041_v45 = vor.u32 %v6367_v12, %v6038_v18  ;;  %3194 = vst.msk [vmem:[#allocation4 + $0x44] sm:$0xf] %vm1406_vm5, %v7671_v28  ;;  %2758 = vrot.lane.b32.xlu0 %v2725_v22, %s6454_s2  ;;  %v2749_v52 = vpop.permute.xlu1 %2748  ;;  %v2378_v9 = vmax.f32 %v2361_v15, 0.0  ;;  %v2998_v12 = vpack.c.bf16 %v2985_v7, %v2985_v7 }
 0x430   :  { %2520 = vst.msk [vmem:[#allocation4 + $0x50] sm:$0xf] %vm1406_vm5, %v7671_v28  ;;  %v2658_v25 = vpop.permute.xlu0 %2657 }
 0x431   :  { %2694 = vst.msk [vmem:[#allocation4 + $0x10] sm:$0xf] %vm1592_vm8, %v2658_v25  ;;  %v2469_v23 = vmul.f32 %v7064_v57, %v2378_v9 }
 0x432   :  { %6097 = vmatmul.msk.bf16.gmra.mxu2 %vm910_vm3, %v6041_v45  ;;  %2785 = vst.msk [vmem:[#allocation4 + $0x10] sm:$0xf] %vm1685_vm9, %v2749_v52  ;;  %v2320_v62 = vpop.f32.mrf.mxu1  ;;  %v3169_v58 = vld [vmem:[#allocation3 + $0x58] sm:$0xff]  ;;  %v2714_v45 = vld [vmem:[#allocation3 + $0x4f] sm:$0xff] }
 0x433   :  { %2876 = vst.msk [vmem:[#allocation4 + $0x10] sm:$0xf] %vm1778_vm10, %v7641_v46  ;;  %v2321_v20 = vadd.f32 %v7513_v19, %v2320_v62  ;;  %v7690_v3 = vpack.c.bf16 %v3169_v58, %v3169_v58  ;;  %v2532_v52 = vld [vmem:[#allocation3 + $0x49] sm:$0xff]  ;;  %v2727_v9 = vpack.c.bf16 %v2714_v45, %v2714_v45 }
 0x434   :  { %2482 = vst.msk [vmem:[#allocation3 + $0x60] sm:$0xff] %vm910_vm3, %v2469_v23  ;;  %v2545_v25 = vpack.c.bf16 %v2532_v52, %v2532_v52 }
 0x435   :  { %v2364_v36 = vadd.f32 %v7475_v56, %v2321_v20  ;;  %2578 = vrot.lane.b32.xlu2 %v2544_v1, %s6456_s14  ;;  %3195 = vst.msk [vmem:[#allocation4 + $0x4c] sm:$0xf] %vm1406_vm5, %v7690_v3  ;;  %v2713_v56 = vld [vmem:[#allocation3 + $0x47] sm:$0xff] }
 0x436   :  { %2938 = vrot.lane.b32.xlu1 %v2543_v38, %s6457_s1  ;;  %2521 = vst.msk [vmem:[#allocation4 + $0x58] sm:$0xf] %vm1406_vm5, %v7690_v3  ;;  %v7700_v16 = vpop.permute.xlu2 %3112  ;;  %v2726_v51 = vpack.c.bf16 %v2713_v56, %v2713_v56  ;;  %v6369_v0 = vld [vmem:[#allocation4 + $0x44] sm:$0xf]  ;;  %v2533_v56 = vld [vmem:[#allocation3 + $0x51] sm:$0xff] }
 0x437   :  { %3120 = vrot.lane.b32.xlu0 %v2725_v22, %s6452_s28  ;;  %v3111_v57 = vpop.permute.xlu1 %3110  ;;  %v2379_v46 = vmax.f32 %v2364_v36, 0.0  ;;  %v2986_v36 = vld [vmem:[#allocation3 + $0x4e] sm:$0xff] }
 0x438   :  { %v3020_v19 = vpop.permute.xlu0 %3019 }
 0x439   :  { %3057 = vst.msk [vmem:[#allocation4 + $0x8] sm:$0xf] %vm1964_vm1, %v3020_v19  ;;  %v2470_v14 = vmul.f32 %v7054_v27, %v2379_v46 }
 0x43a   :  { %3148 = vst.msk [vmem:[#allocation4 + $0x8] sm:$0xf] %vm2057_vm0, %v3111_v57  ;;  %v2322_v17 = vpop.f32.mrf.mxu1  ;;  %v2999_v57 = vpack.c.bf16 %v2986_v36, %v2986_v36 }
 0x43b   :  { %v3170_v38 = vld [vmem:[#allocation3 + $0x60] sm:$0xff]  ;;  %2483 = vst.msk [vmem:[#allocation3 + $0x68] sm:$0x3] %vm1021_vm4, %v2470_v14  ;;  %v2624_v14 = vld [vmem:[#allocation3 + $0x52] sm:$0xff] }
 0x43c   :  { %v7706_v24 = vpack.c.bf16 %v3170_v38, %v3170_v38  ;;  %v6046_v63 = vld [vmem:[#allocation4 + $0x48] sm:$0xf0]  ;;  %v2496_v35 = vld [vmem:[#allocation3 + $0x60] sm:$0x3]  ;;  %v2637_v17 = vpack.c.bf16 %v2624_v14, %v2624_v14 }
 0x43d   :  { %2851 = vrot.lane.b32.xlu2 %v7651_v33, %s6453_s3  ;;  %v6049_v27 = vor.u32 %v6369_v0, %v6046_v63  ;;  %v2509_v53 = vpack.c.bf16 %v2496_v35, %v2496_v35  ;;  %v2715_v0 = vld [vmem:[#allocation3 + $0x57] sm:$0xff]  ;;  %v2535_v7 = vld [vmem:[#allocation3 + $0x61] sm:$0x3] }
 0x43e   :  { %2760 = vrot.lane.b32.xlu1 %v2726_v51, %s6454_s2  ;;  %3196 = vst.msk [vmem:[#allocation4 + $0x54] sm:$0xf] %vm1406_vm5, %v7706_v24  ;;  %v2728_v35 = vpack.c.bf16 %v2715_v0, %v2715_v0  ;;  %v2716_v52 = vld [vmem:[#allocation3 + $0x5f] sm:$0xff] }
 0x43f   :  { %2669 = vrot.lane.b32.xlu0 %v2635_v40, %s6455_s13  ;;  %v2660_v6 = vpop.permute.xlu1 %2659  ;;  %2522 = vst.msk [vmem:[#allocation4 + $0x60] sm:$0x1] %vm1419_vm6, %v2509_v53  ;;  %v2534_v53 = vld [vmem:[#allocation3 + $0x59] sm:$0xff] }
 0x440   :  { %v2569_v34 = vpop.permute.xlu0 %2568  ;;  %v2662_v42 = vpop.permute.xlu2 %2661 }
 0x441   :  { %v6362_v61 = vld [vmem:[#allocation4 + $0x4] sm:$0xf0]  ;;  %2604 = vst.msk [vmem:[#allocation4 + $0x18] sm:$0xf] %vm1499_vm7, %v2569_v34  ;;  %v2547_v34 = vpack.c.bf16 %v2534_v53, %v2534_v53 }
 0x442   :  { %6098 = vmatmul.msk.bf16.gmra.mxu2 %vm910_vm3, %v6049_v27  ;;  %2695 = vst.msk [vmem:[#allocation4 + $0x18] sm:$0xf] %vm1592_vm8, %v2660_v6  ;;  %v6013_v33 = vor.u32 %v6362_v61, %v7667_v60  ;;  %v3171_v41 = vld [vmem:[#allocation3 + $0x68] sm:$0xff] }
 0x443   :  { %2786 = vst.msk [vmem:[#allocation4 + $0x18] sm:$0xf] %vm1685_vm9, %v2751_v31  ;;  %v3184_v22 = vpack.c.bf16 %v3171_v41, %v3171_v41  ;;  %v2623_v60 = vld [vmem:[#allocation3 + $0x4a] sm:$0xff] }
 0x444   :  { %3377 = vmatmul.bf16.vlgmr.msrb.gmra.mxu3 %v6013_v33  ;;  %v2636_v31 = vpack.c.bf16 %v2623_v60, %v2623_v60 }
 0x445   :  { %2940 = vrot.lane.b32.xlu2 %v2544_v1, %s6457_s1  ;;  %3197 = vst.msk [vmem:[#allocation4 + $0x5c] sm:$0xf] %vm1406_vm5, %v3184_v22  ;;  %v6371_v21 = vld [vmem:[#allocation4 + $0x54] sm:$0xf] }
 0x446   :  { %3122 = vrot.lane.b32.xlu1 %v2726_v51, %s6452_s28  ;;  %v2987_v51 = vld [vmem:[#allocation3 + $0x56] sm:$0xff] }
 0x447   :  { %3031 = vrot.lane.b32.xlu0 %v2998_v12, %s6451_s27  ;;  %v3022_v20 = vpop.permute.xlu1 %3021  ;;  %v3000_v63 = vpack.c.bf16 %v2987_v51, %v2987_v51  ;;  %v2898_v51 = vld [vmem:[#allocation3 + $0x61] sm:$0xff] }
 0x448   :  { %v2842_v18 = vpop.permute.xlu0 %2841  ;;  %v3024_v15 = vpop.permute.xlu2 %3023  ;;  %v2911_v0 = vpack.c.bf16 %v2898_v51, %v2898_v51 }
 0x449   :  { %2877 = vst.msk [vmem:[#allocation4 + $0x18] sm:$0xf] %vm1778_vm10, %v2842_v18 }
 0x44c   :  { %v6054_v23 = vld [vmem:[#allocation4 + $0x58] sm:$0xf0] }
 0x44d   :  { %2762 = vrot.lane.b32.xlu2 %v2727_v9, %s6454_s2  ;;  %v6057_v62 = vor.u32 %v6371_v21, %v6054_v23  ;;  %v2988_v23 = vld [vmem:[#allocation3 + $0x5e] sm:$0xff] }
 0x44e   :  { %2671 = vrot.lane.b32.xlu1 %v2636_v31, %s6455_s13  ;;  %v2625_v31 = vld [vmem:[#allocation3 + $0x5a] sm:$0xff] }
 0x44f   :  { %2580 = vrot.lane.b32.xlu0 %v2545_v25, %s6456_s14 }
 0x450   :  { %v2931_v58 = vpop.permute.xlu0 %2930  ;;  %v2573_v1 = vpop.permute.xlu2 %2572 }
 0x451   :  { %2967 = vst.msk [vmem:[#allocation4 + $0x10] sm:$0xf] %vm1871_vm2, %v2931_v58  ;;  %v3001_v58 = vpack.c.bf16 %v2988_v23, %v2988_v23 }
 0x452   :  { %6099 = vmatmul.msk.bf16.gmra.mxu2 %vm910_vm3, %v6057_v62  ;;  %3058 = vst.msk [vmem:[#allocation4 + $0x10] sm:$0xf] %vm1964_vm1, %v3022_v20  ;;  %v2717_v62 = vld [vmem:[#allocation3 + $0x67] sm:$0x3] }
 0x453   :  { %3149 = vst.msk [vmem:[#allocation4 + $0x10] sm:$0xf] %vm2057_vm0, %v7700_v16  ;;  %v2546_v16 = vpack.c.bf16 %v2533_v56, %v2533_v56  ;;  %v2730_v20 = vpack.c.bf16 %v2717_v62, %v2717_v62  ;;  %v7805_v62 = vld [vmem:[%s8503_s7] ss:$0 sm:$0xff] }
 0x454   :  { %2606 = vst.msk [vmem:[#allocation4 + $0x28] sm:$0xf] %vm1499_vm7, %v2573_v1 }
 0x455   :  { %3124 = vrot.lane.b32.xlu2 %v2727_v9, %s6452_s28  ;;  %v2729_v9 = vpack.c.bf16 %v2716_v52, %v2716_v52 }
 0x456   :  { %3033 = vrot.lane.b32.xlu1 %v2999_v57, %s6451_s27  ;;  %v2899_v57 = vld [vmem:[#allocation3 + $0x69] sm:$0x3] }
 0x457   :  { %2853 = vrot.lane.b32.xlu0 %v7671_v28, %s6453_s3  ;;  %v2912_v56 = vpack.c.bf16 %v2899_v57, %v2899_v57 }
 0x458   :  { %v2846_v46 = vpop.permute.xlu2 %2845 }
 0x459   :  { %v2571_v19 = vpop.permute.xlu1 %2570 }
 0x45a   :  { %2605 = vst.msk [vmem:[#allocation4 + $0x20] sm:$0xf] %vm1499_vm7, %v2571_v19  ;;  %v2753_v32 = vpop.permute.xlu0 %2752  ;;  %v6020_v41 = vld [vmem:[#allocation4 + $0x10] sm:$0xf] }
 0x45b   :  { %2696 = vst.msk [vmem:[#allocation4 + $0x20] sm:$0xf] %vm1592_vm8, %v2662_v42  ;;  %v2626_v42 = vld [vmem:[#allocation3 + $0x62] sm:$0x3]  ;;  %v3080_v19 = vld [vmem:[#allocation3 + $0x67] sm:$0xff] }
 0x45c   :  { %2787 = vst.msk [vmem:[#allocation4 + $0x20] sm:$0xf] %vm1685_vm9, %v2753_v32  ;;  %v2639_v18 = vpack.c.bf16 %v2626_v42, %v2626_v42  ;;  %v3093_v32 = vpack.c.bf16 %v3080_v19, %v3080_v19 }
 0x45d   :  { %2673 = vrot.lane.b32.xlu2 %v2637_v17, %s6455_s13 }
 0x45e   :  { %2582 = vrot.lane.b32.xlu1 %v2546_v16, %s6456_s14 }
 0x45f   :  { %2942 = vrot.lane.b32.xlu0 %v2545_v25, %s6457_s1  ;;  %v2638_v25 = vpack.c.bf16 %v2625_v31, %v2625_v31 }
 0x460   :  { %v2935_v28 = vpop.permute.xlu2 %2934 }
 0x461   :  { %v2844_v38 = vpop.permute.xlu1 %2843 }
 0x462   :  { %2878 = vst.msk [vmem:[#allocation4 + $0x20] sm:$0xf] %vm1778_vm10, %v2844_v38  ;;  %v3115_v40 = vpop.permute.xlu0 %3114  ;;  %v2989_v38 = vld [vmem:[#allocation3 + $0x66] sm:$0xff] }
 0x463   :  { %2969 = vst.msk [vmem:[#allocation4 + $0x20] sm:$0xf] %vm1871_vm2, %v2935_v28 }
 0x465   :  { %3035 = vrot.lane.b32.xlu2 %v3000_v63, %s6451_s27 }
 0x466   :  { %2855 = vrot.lane.b32.xlu1 %v7690_v3, %s6453_s3 }
 0x467   :  { %2764 = vrot.lane.b32.xlu0 %v2728_v35, %s6454_s2 }
 0x469   :  { %v2933_v27 = vpop.permute.xlu1 %2932 }
 0x46a   :  { %2968 = vst.msk [vmem:[#allocation4 + $0x18] sm:$0xf] %vm1871_vm2, %v2933_v27  ;;  %v2664_v6 = vpop.permute.xlu0 %2663 }
 0x46b   :  { %3059 = vst.msk [vmem:[#allocation4 + $0x18] sm:$0xf] %vm1964_vm1, %v3024_v15  ;;  %v2548_v15 = vpack.c.bf16 %v2535_v7, %v2535_v7 }
 0x46c   :  { %3150 = vst.msk [vmem:[#allocation4 + $0x18] sm:$0xf] %vm2057_vm0, %v3115_v40  ;;  %v3002_v40 = vpack.c.bf16 %v2989_v38, %v2989_v38 }
 0x46d   :  { %2697 = vst.msk [vmem:[#allocation4 + $0x28] sm:$0xf] %vm1592_vm8, %v2664_v6  ;;  %2584 = vrot.lane.b32.xlu2 %v2547_v34, %s6456_s14 }
 0x46e   :  { %2944 = vrot.lane.b32.xlu1 %v2546_v16, %s6457_s1 }
 0x46f   :  { %3126 = vrot.lane.b32.xlu0 %v2728_v35, %s6452_s28  ;;  %v2757_v3 = vpop.permute.xlu2 %2756 }
 0x471   :  { %v2755_v61 = vpop.permute.xlu1 %2754 }
 0x472   :  { %2788 = vst.msk [vmem:[#allocation4 + $0x28] sm:$0xf] %vm1685_vm9, %v2755_v61  ;;  %v3026_v33 = vpop.permute.xlu0 %3025 }
 0x473   :  { %v6364_v22 = vld [vmem:[#allocation4 + $0x14] sm:$0xf0]  ;;  %2879 = vst.msk [vmem:[#allocation4 + $0x28] sm:$0xf] %vm1778_vm10, %v2846_v46  ;;  %v2808_v46 = vld [vmem:[#allocation3 + $0x68] sm:$0x3] }
 0x474   :  { %3060 = vst.msk [vmem:[#allocation4 + $0x20] sm:$0xf] %vm1964_vm1, %v3026_v33  ;;  %v6021_v12 = vor.u32 %v6364_v22, %v6020_v41  ;;  %v2821_v14 = vpack.c.bf16 %v2808_v46, %v2808_v46 }
 0x475   :  { %2857 = vrot.lane.b32.xlu2 %v7706_v24, %s6453_s3 }
 0x476   :  { %3382 = vmatmul.bf16.gmra.mxu3 %v6021_v12  ;;  %2677 = vrot.lane.b32.xlu1 %v2639_v18, %s6455_s13 }
 0x477   :  { %2586 = vrot.lane.b32.xlu0 %v2548_v15, %s6456_s14  ;;  %v3119_v60 = vpop.permute.xlu2 %3118 }
 0x479   :  { %v3117_v45 = vpop.permute.xlu1 %3116 }
 0x47a   :  { %3151 = vst.msk [vmem:[#allocation4 + $0x20] sm:$0xf] %vm2057_vm0, %v3117_v45 }
 0x47d   :  { %2946 = vrot.lane.b32.xlu2 %v2547_v34, %s6457_s1 }
 0x47e   :  { %2766 = vrot.lane.b32.xlu1 %v2729_v9, %s6454_s2 }
 0x47f   :  { %2675 = vrot.lane.b32.xlu0 %v2638_v25, %s6455_s13  ;;  %v2668_v21 = vpop.permute.xlu2 %2667 }
 0x485   :  { %2768 = vrot.lane.b32.xlu2 %v2730_v20, %s6454_s2 }
 0x486   :  { %3128 = vrot.lane.b32.xlu1 %v2729_v9, %s6452_s28 }
 0x487   :  { %3037 = vrot.lane.b32.xlu0 %v3001_v58, %s6451_s27  ;;  %v3030_v24 = vpop.permute.xlu2 %3029  ;;  %v3421_v58 = vpop.f32.mrf.mxu2 }
 0x488   :  { %v2666_v1 = vpop.permute.xlu1 %2665 }
 0x489   :  { %v2575_v36 = vpop.permute.xlu0 %2574 }
 0x48a   :  { %2607 = vst.msk [vmem:[#allocation4 + $0x30] sm:$0xf] %vm1499_vm7, %v2575_v36 }
 0x48b   :  { %2698 = vst.msk [vmem:[#allocation4 + $0x30] sm:$0xf] %vm1592_vm8, %v2666_v1 }
 0x48c   :  { %2789 = vst.msk [vmem:[#allocation4 + $0x30] sm:$0xf] %vm1685_vm9, %v2757_v3  ;;  %v6028_v3 = vld [vmem:[#allocation4 + $0x20] sm:$0xf] }
 0x48d   :  { %3130 = vrot.lane.b32.xlu2 %v3093_v32, %s6452_s28 }
 0x48e   :  { %2950 = vrot.lane.b32.xlu1 %v2912_v56, %s6457_s1 }
 0x48f   :  { %2859 = vrot.lane.b32.xlu0 %v2821_v14, %s6453_s3  ;;  %v2579_v17 = vpop.permute.xlu2 %2578  ;;  %v3423_v14 = vpop.f32.mrf.mxu2 }
 0x490   :  { %v3028_v16 = vpop.permute.xlu1 %3027  ;;  %2609 = vst.msk [vmem:[#allocation4 + $0x40] sm:$0xf] %vm1499_vm7, %v2579_v17 }
 0x491   :  { %v2848_v28 = vpop.permute.xlu0 %2847 }
 0x492   :  { %2880 = vst.msk [vmem:[#allocation4 + $0x30] sm:$0xf] %vm1778_vm10, %v2848_v28 }
 0x496   :  { %3039 = vrot.lane.b32.xlu1 %v3002_v40, %s6451_s27 }
 0x497   :  { %2948 = vrot.lane.b32.xlu0 %v2911_v0, %s6457_s1  ;;  %v2852_v35 = vpop.permute.xlu2 %2851 }
 0x498   :  { %v2577_v63 = vpop.permute.xlu1 %2576 }
 0x499   :  { %2608 = vst.msk [vmem:[#allocation4 + $0x38] sm:$0xf] %vm1499_vm7, %v2577_v63  ;;  %v2937_v27 = vpop.permute.xlu0 %2936 }
 0x49a   :  { %2699 = vst.msk [vmem:[#allocation4 + $0x38] sm:$0xf] %vm1592_vm8, %v2668_v21 }
 0x49b   :  { %2970 = vst.msk [vmem:[#allocation4 + $0x28] sm:$0xf] %vm1871_vm2, %v2937_v27 }
 0x49c   :  { %3061 = vst.msk [vmem:[#allocation4 + $0x28] sm:$0xf] %vm1964_vm1, %v3028_v16 }
 0x49d   :  { %3152 = vst.msk [vmem:[#allocation4 + $0x28] sm:$0xf] %vm2057_vm0, %v3119_v60 }
 0x49f   :  { %v2941_v6 = vpop.permute.xlu2 %2940 }
 0x4a0   :  { %v2850_v53 = vpop.permute.xlu1 %2849 }
 0x4a1   :  { %v2759_v34 = vpop.permute.xlu0 %2758 }
 0x4a2   :  { %2790 = vst.msk [vmem:[#allocation4 + $0x38] sm:$0xf] %vm1685_vm9, %v2759_v34 }
 0x4a3   :  { %2881 = vst.msk [vmem:[#allocation4 + $0x38] sm:$0xf] %vm1778_vm10, %v2850_v53 }
 0x4a4   :  { %v6366_v61 = vld [vmem:[#allocation4 + $0x24] sm:$0xf0]  ;;  %2972 = vst.msk [vmem:[#allocation4 + $0x38] sm:$0xf] %vm1871_vm2, %v2941_v6 }
 0x4a5   :  { %v6029_v42 = vor.u32 %v6366_v61, %v6028_v3 }
 0x4a7   :  { %3387 = vmatmul.bf16.gmra.mxu3 %v6029_v42  ;;  %v2763_v7 = vpop.permute.xlu2 %2762 }
 0x4a8   :  { %v2939_v33 = vpop.permute.xlu1 %2938 }
 0x4a9   :  { %2971 = vst.msk [vmem:[#allocation4 + $0x30] sm:$0xf] %vm1871_vm2, %v2939_v33  ;;  %v3121_v41 = vpop.permute.xlu0 %3120 }
 0x4aa   :  { %3062 = vst.msk [vmem:[#allocation4 + $0x30] sm:$0xf] %vm1964_vm1, %v3030_v24 }
 0x4ab   :  { %3153 = vst.msk [vmem:[#allocation4 + $0x30] sm:$0xf] %vm2057_vm0, %v3121_v41 }
 0x4af   :  { %v3125_v12 = vpop.permute.xlu2 %3124 }
 0x4b0   :  { %v2761_v22 = vpop.permute.xlu1 %2760 }
 0x4b1   :  { %v2670_v18 = vpop.permute.xlu0 %2669 }
 0x4b2   :  { %2700 = vst.msk [vmem:[#allocation4 + $0x40] sm:$0xf] %vm1592_vm8, %v2670_v18  ;;  %v6036_v25 = vld [vmem:[#allocation4 + $0x30] sm:$0xf] }
 0x4b3   :  { %2791 = vst.msk [vmem:[#allocation4 + $0x40] sm:$0xf] %vm1685_vm9, %v2761_v22 }
 0x4b4   :  { %2882 = vst.msk [vmem:[#allocation4 + $0x40] sm:$0xf] %vm1778_vm10, %v2852_v35 }
 0x4b7   :  { %v2674_v60 = vpop.permute.xlu2 %2673 }
 0x4b8   :  { %v3123_v15 = vpop.permute.xlu1 %3122 }
 0x4b9   :  { %v3032_v45 = vpop.permute.xlu0 %3031 }
 0x4ba   :  { %3063 = vst.msk [vmem:[#allocation4 + $0x38] sm:$0xf] %vm1964_vm1, %v3032_v45 }
 0x4bb   :  { %3154 = vst.msk [vmem:[#allocation4 + $0x38] sm:$0xf] %vm2057_vm0, %v3123_v15 }
 0x4bf   :  { %v7797_v31 = vpop.permute.xlu2 %3035 }
 0x4c0   :  { %v2672_v52 = vpop.permute.xlu1 %2671 }
 0x4c1   :  { %v2581_v9 = vpop.permute.xlu0 %2580 }
 0x4c2   :  { %v6368_v21 = vld [vmem:[#allocation4 + $0x34] sm:$0xf0]  ;;  %2610 = vst.msk [vmem:[#allocation4 + $0x48] sm:$0xf] %vm1499_vm7, %v2581_v9 }
 0x4c3   :  { %2701 = vst.msk [vmem:[#allocation4 + $0x48] sm:$0xf] %vm1592_vm8, %v2672_v52  ;;  %v6037_v23 = vor.u32 %v6368_v21, %v6036_v25 }
 0x4c4   :  { %2792 = vst.msk [vmem:[#allocation4 + $0x48] sm:$0xf] %vm1685_vm9, %v2763_v7 }
 0x4c5   :  { %3392 = vmatmul.bf16.gmra.mxu3 %v6037_v23 }
 0x4c7   :  { %v3378_v20 = vpop.f32.mrf.mxu3  ;;  %v2585_v36 = vpop.permute.xlu2 %2584 }
 0x4c8   :  { %v3379_v24 = vadd.f32 %v7805_v62, %v3378_v20  ;;  %v3034_v1 = vpop.permute.xlu1 %3033  ;;  %2612 = vst.msk [vmem:[#allocation4 + $0x58] sm:$0xf] %vm1499_vm7, %v2585_v36 }
 0x4c9   :  { %v2854_v57 = vpop.permute.xlu0 %2853 }
 0x4ca   :  { %v3422_v46 = vadd.f32 %v3421_v58, %v3379_v24  ;;  %2883 = vst.msk [vmem:[#allocation4 + $0x48] sm:$0xf] %vm1778_vm10, %v2854_v57 }
 0x4cc   :  { %v3533_v19 = vmul.f32 %v7088_v49, %v3422_v46 }
 0x4ce   :  { %3546 = vst.msk [vmem:[#allocation3 + $0x8] sm:$0xff] %vm910_vm3, %v3533_v19 }
 0x4cf   :  { %v3380_v56 = vpop.f32.mrf.mxu3  ;;  %v7814_v28 = vpop.permute.xlu2 %2857 }
 0x4d0   :  { %v3381_v32 = vadd.f32 %v7805_v62, %v3380_v56  ;;  %v2583_v16 = vpop.permute.xlu1 %2582 }
 0x4d1   :  { %2611 = vst.msk [vmem:[#allocation4 + $0x50] sm:$0xf] %vm1499_vm7, %v2583_v16  ;;  %v2943_v17 = vpop.permute.xlu0 %2942 }
 0x4d2   :  { %v3424_v38 = vadd.f32 %v3423_v14, %v3381_v32  ;;  %2702 = vst.msk [vmem:[#allocation4 + $0x50] sm:$0xf] %vm1592_vm8, %v2674_v60 }
 0x4d3   :  { %2973 = vst.msk [vmem:[#allocation4 + $0x40] sm:$0xf] %vm1871_vm2, %v2943_v17 }
 0x4d4   :  { %v3534_v51 = vmul.f32 %v7101_v30, %v3424_v38  ;;  %3064 = vst.msk [vmem:[#allocation4 + $0x40] sm:$0xf] %vm1964_vm1, %v3034_v1  ;;  %v3426_v1 = vpop.f32.mrf.mxu2 }
 0x4d5   :  { %3155 = vst.msk [vmem:[#allocation4 + $0x40] sm:$0xf] %vm2057_vm0, %v3125_v12  ;;  %v3780_v49 = vld [vmem:[#allocation3 + $0x7] sm:$0xff] }
 0x4d6   :  { %v3689_v40 = vld [vmem:[#allocation3 + $0x2] sm:$0xff]  ;;  %3547 = vst.msk [vmem:[#allocation3 + $0x10] sm:$0xff] %vm910_vm3, %v3534_v51  ;;  %v3793_v63 = vpack.c.bf16 %v3780_v49, %v3780_v49 }
 0x4d7   :  { %v3598_v0 = vld [vmem:[#allocation3 + $0x1] sm:$0xff]  ;;  %v3702_v35 = vpack.c.bf16 %v3689_v40, %v3689_v40  ;;  %v2947_v3 = vpop.permute.xlu2 %2946 }
 0x4d8   :  { %v3611_v27 = vpack.c.bf16 %v3598_v0, %v3598_v0  ;;  %v3871_v53 = vld [vmem:[#allocation3 + $0x8] sm:$0xff]  ;;  %3819 = vrot.lane.b32.xlu1 %v3793_v63, %s6454_s2  ;;  %v2856_v34 = vpop.permute.xlu1 %2855 }
 0x4d9   :  { %v3884_v6 = vpack.c.bf16 %v3871_v53, %v3871_v53  ;;  %3728 = vrot.lane.b32.xlu0 %v3702_v35, %s6455_s13  ;;  %v2765_v30 = vpop.permute.xlu0 %2764 }
 0x4da   :  { %3637 = vrot.lane.b32.xlu2 %v3611_v27, %s6456_s14  ;;  %2793 = vst.msk [vmem:[#allocation4 + $0x50] sm:$0xf] %vm1685_vm9, %v2765_v30 }
 0x4db   :  { %3586 = vst.msk [vmem:[#allocation4 + $0x8] sm:$0xf] %vm1406_vm5, %v3884_v6 }
 0x4dc   :  { %2884 = vst.msk [vmem:[#allocation4 + $0x50] sm:$0xf] %vm1778_vm10, %v2856_v34  ;;  %v6044_v9 = vld [vmem:[#allocation4 + $0x40] sm:$0xf]  ;;  %v3428_v38 = vpop.f32.mrf.mxu2 }
 0x4dd   :  { %2975 = vst.msk [vmem:[#allocation4 + $0x50] sm:$0xf] %vm1871_vm2, %v2947_v3  ;;  %v3690_v61 = vld [vmem:[#allocation3 + $0xa] sm:$0xff] }
 0x4de   :  { %v3599_v42 = vld [vmem:[#allocation3 + $0x9] sm:$0xff]  ;;  %v3703_v33 = vpack.c.bf16 %v3690_v61, %v3690_v61 }
 0x4df   :  { %v3612_v7 = vpack.c.bf16 %v3599_v42, %v3599_v42  ;;  %v3872_v41 = vld [vmem:[#allocation3 + $0x10] sm:$0xff] }
 0x4e0   :  { %3730 = vrot.lane.b32.xlu1 %v3703_v33, %s6455_s13  ;;  %v2945_v22 = vpop.permute.xlu1 %2944  ;;  %v3885_v12 = vpack.c.bf16 %v3872_v41, %v3872_v41  ;;  %v4144_v15 = vld [vmem:[#allocation3 + $0xf] sm:$0xff] }
 0x4e1   :  { %3639 = vrot.lane.b32.xlu0 %v3612_v7, %s6456_s14  ;;  %2974 = vst.msk [vmem:[#allocation4 + $0x48] sm:$0xf] %vm1871_vm2, %v2945_v22  ;;  %v3127_v18 = vpop.permute.xlu0 %3126  ;;  %v4157_v60 = vpack.c.bf16 %v4144_v15, %v4144_v15  ;;  %v4053_v23 = vld [vmem:[#allocation3 + $0xe] sm:$0xff] }
 0x4e2   :  { %3910 = vrot.lane.b32.xlu2 %v3884_v6, %s6453_s3  ;;  %3065 = vst.msk [vmem:[#allocation4 + $0x48] sm:$0xf] %vm1964_vm1, %v7797_v31  ;;  %v2769_v31 = vpop.permute.xlu2 %2768  ;;  %v4066_v58 = vpack.c.bf16 %v4053_v23, %v4053_v23 }
 0x4e3   :  { %3156 = vst.msk [vmem:[#allocation4 + $0x48] sm:$0xf] %vm2057_vm0, %v3127_v18 }
 0x4e4   :  { %4261 = vst.msk [vmem:[#allocation4 + $0x4] sm:$0xf] %vm1406_vm5, %v3885_v12 }
 0x4e5   :  { %3587 = vst.msk [vmem:[#allocation4 + $0x10] sm:$0xf] %vm1406_vm5, %v3885_v12 }
 0x4e8   :  { %4183 = vrot.lane.b32.xlu1 %v4157_v60, %s6452_s28  ;;  %v2678_v45 = vpop.permute.xlu1 %2677 }
 0x4e9   :  { %3912 = vrot.lane.b32.xlu0 %v3885_v12, %s6453_s3  ;;  %v2587_v52 = vpop.permute.xlu0 %2586 }
 0x4ea   :  { %3821 = vrot.lane.b32.xlu2 %v4157_v60, %s6454_s2  ;;  %v6370_v25 = vld [vmem:[#allocation4 + $0x44] sm:$0xf0]  ;;  %2613 = vst.msk [vmem:[#allocation4 + $0x60] sm:$0x1] %vm1512_vm11, %v2587_v52 }
 0x4eb   :  { %2704 = vst.msk [vmem:[#allocation4 + $0x60] sm:$0x1] %vm8512_vm12, %v2678_v45  ;;  %v6045_v21 = vor.u32 %v6370_v25, %v6044_v9  ;;  %vm8523_vm12 = vcmask 1041280   ;;  %v6402_v25 = vld [vmem:[%s8504_s8 + $0x40] sm:$0xff] }
 0x4ec   :  { %2795 = vst.msk [vmem:[#allocation4 + $0x60] sm:$0x1] %vm8511_vm13, %v2769_v31  ;;  %vm8522_vm13 = vcmask 910080   ;;  %v6401_v31 = vld [vmem:[%s8504_s8 + $0x38] sm:$0xff]  ;;  %4494 = vmatpush.bf16.msra.mxu3 %v6402_v25 }
 0x4ed   :  { %3397 = vmatmul.bf16.gmra.mxu3 %v6045_v21  ;;  %4444 = vmatpush.bf16.msra.mxu1 %v6401_v31 }
 0x4f0   :  { %v2767_v20 = vpop.permute.xlu1 %2766 }
 0x4f1   :  { %4001 = vrot.lane.b32.xlu0 %v3612_v7, %s6457_s1  ;;  %v2676_v24 = vpop.permute.xlu0 %2675 }
 0x4f2   :  { %4092 = vrot.lane.b32.xlu2 %v4066_v58, %s6451_s27  ;;  %2703 = vst.msk [vmem:[#allocation4 + $0x58] sm:$0xf] %vm1592_vm8, %v2676_v24 }
 0x4f3   :  { %2794 = vst.msk [vmem:[#allocation4 + $0x58] sm:$0xf] %vm1685_vm9, %v2767_v20 }
 0x4f4   :  { %2885 = vst.msk [vmem:[#allocation4 + $0x58] sm:$0xf] %vm1778_vm10, %v7814_v28 }
 0x4f8   :  { %v3129_v36 = vpop.permute.xlu1 %3128 }
 0x4f9   :  { %v3038_v57 = vpop.permute.xlu0 %3037  ;;  %v3383_v46 = vpop.f32.mrf.mxu3 }
 0x4fa   :  { %3066 = vst.msk [vmem:[#allocation4 + $0x50] sm:$0xf] %vm1964_vm1, %v3038_v57  ;;  %v3384_v19 = vadd.f32 %v7805_v62, %v3383_v46  ;;  %v3431_v57 = vpop.f32.mrf.mxu2 }
 0x4fb   :  { %3157 = vst.msk [vmem:[#allocation4 + $0x50] sm:$0xf] %vm2057_vm0, %v3129_v36 }
 0x4fc   :  { %v3427_v56 = vadd.f32 %v3426_v1, %v3384_v19  ;;  %v6400_v1 = vld [vmem:[%s8504_s8 + $0x30] sm:$0xff] }
 0x4fd   :  { %4445 = vmatpush.bf16.msra.mxu1 %v6400_v1 }
 0x4fe   :  { %v3535_v14 = vmul.f32 %v7112_v48, %v3427_v56  ;;  %v4247_v48 = vld [vmem:[#allocation3 + $0x70] sm:$0x3] }
 0x4ff   :  { %v4260_v30 = vpack.c.bf16 %v4247_v48, %v4247_v48 }
 0x500   :  { %3548 = vst.msk [vmem:[#allocation3 + $0x18] sm:$0xff] %vm910_vm3, %v3535_v14  ;;  %v2951_v32 = vpop.permute.xlu1 %2950 }
 0x501   :  { %v2860_v16 = vpop.permute.xlu0 %2859  ;;  %v3385_v17 = vpop.f32.mrf.mxu3 }
 0x502   :  { %2886 = vst.msk [vmem:[#allocation4 + $0x60] sm:$0x1] %vm1791_vm14, %v2860_v16  ;;  %v3386_v28 = vadd.f32 %v7805_v62, %v3385_v17  ;;  %v6052_v12 = vld [vmem:[#allocation4 + $0x50] sm:$0xf] }
 0x503   :  { %2977 = vst.msk [vmem:[#allocation4 + $0x60] sm:$0x1] %vm1884_vm15, %v2951_v32 }
 0x504   :  { %3068 = vst.msk [vmem:[#allocation4 + $0x60] sm:$0x1] %vm8522_vm13, %v7081_v26  ;;  %v3429_v51 = vadd.f32 %v3428_v38, %v3386_v28  ;;  %v6382_v38 = vld [vmem:[#allocation4 + $0x4] sm:$0xf]  ;;  %vm8525_vm13 = vcmask 516480  }
 0x505   :  { %3159 = vst.msk [vmem:[#allocation4 + $0x60] sm:$0x1] %vm8523_vm12, %v7085_v39  ;;  %v3131_v39 = vpop.permute.xlu2 %3130  ;;  %vm8524_vm12 = vcmask 385280  }
 0x506   :  { %v3536_v49 = vmul.f32 %v7122_v13, %v3429_v51  ;;  %v3433_v51 = vpop.f32.mrf.mxu2 }
 0x507   :  { %v3600_v40 = vld [vmem:[#allocation3 + $0x11] sm:$0xff] }
 0x508   :  { %v3782_v0 = vld [vmem:[#allocation3 + $0x17] sm:$0xff]  ;;  %3549 = vst.msk [vmem:[#allocation3 + $0x20] sm:$0xff] %vm910_vm3, %v3536_v49  ;;  %v3040_v35 = vpop.permute.xlu1 %3039  ;;  %v3613_v27 = vpack.c.bf16 %v3600_v40, %v3600_v40 }
 0x509   :  { %v3691_v63 = vld [vmem:[#allocation3 + $0x12] sm:$0xff]  ;;  %v3795_v53 = vpack.c.bf16 %v3782_v0, %v3782_v0  ;;  %v2949_v3 = vpop.permute.xlu0 %2948 }
 0x50a   :  { %v3704_v6 = vpack.c.bf16 %v3691_v63, %v3691_v63  ;;  %v3873_v34 = vld [vmem:[#allocation3 + $0x18] sm:$0xff]  ;;  %2976 = vst.msk [vmem:[#allocation4 + $0x58] sm:$0xf] %vm1871_vm2, %v2949_v3  ;;  %3641 = vrot.lane.b32.xlu1 %v3613_v27, %s6456_s14 }
 0x50b   :  { %3823 = vrot.lane.b32.xlu0 %v3795_v53, %s6454_s2  ;;  %v3886_v26 = vpack.c.bf16 %v3873_v34, %v3873_v34  ;;  %3067 = vst.msk [vmem:[#allocation4 + $0x58] sm:$0xf] %vm1964_vm1, %v3040_v35  ;;  %v4054_v42 = vld [vmem:[#allocation3 + $0x16] sm:$0xff] }
 0x50c   :  { %3732 = vrot.lane.b32.xlu2 %v3704_v6, %s6455_s13  ;;  %v3211_v13 = vld [vmem:[#allocation4 + $0x60] sm:$0x11]  ;;  %3158 = vst.msk [vmem:[#allocation4 + $0x58] sm:$0xf] %vm2057_vm0, %v3131_v39  ;;  %v4067_v7 = vpack.c.bf16 %v4054_v42, %v4054_v42 }
 0x50d   :  { %4273 = vst.msk [vmem:[#allocation4 + $0x64] sm:$0x1] %vm1419_vm6, %v4260_v30  ;;  %v3272_v61 = vunpack.c.h.b16 %v3211_v13  ;;  %v3271_v58 = vunpack.c.l.b16 %v3211_v13 }
 0x50e   :  { %4262 = vst.msk [vmem:[#allocation4 + $0xc] sm:$0xf] %vm1406_vm5, %v3886_v26 }
 0x50f   :  { %v3286_v33 = vpack.c.b16 %v3272_v61, %v3272_v61  ;;  %3588 = vst.msk [vmem:[#allocation4 + $0x18] sm:$0xf] %vm1406_vm5, %v3886_v26  ;;  %v3874_v41 = vld [vmem:[#allocation3 + $0x20] sm:$0xff]  ;;  %v3285_v20 = vpack.c.b16 %v3271_v58, %v3271_v58 }
 0x510   :  { %v3887_v22 = vpack.c.bf16 %v3874_v41, %v3874_v41  ;;  %v3692_v60 = vld [vmem:[#allocation3 + $0x1a] sm:$0xff]  ;;  %v3436_v41 = vpop.f32.mrf.mxu2 }
 0x511   :  { %6100 = vmatmul.msk.bf16.gmra.mxu2 %vm910_vm3, %v3286_v33  ;;  %v3601_v45 = vld [vmem:[#allocation3 + $0x19] sm:$0xff]  ;;  %v3705_v52 = vpack.c.bf16 %v3692_v60, %v3692_v60  ;;  %v6398_v33 = vld [vmem:[%s8504_s8 + $0x20] sm:$0xff] }
 0x512   :  { %3914 = vrot.lane.b32.xlu1 %v3886_v26, %s6453_s3  ;;  %4263 = vst.msk [vmem:[#allocation4 + $0x14] sm:$0xf] %vm1406_vm5, %v3887_v22  ;;  %v3614_v9 = vpack.c.bf16 %v3601_v45, %v3601_v45  ;;  %v3783_v21 = vld [vmem:[#allocation3 + $0x1f] sm:$0xff] }
 0x513   :  { %4094 = vrot.lane.b32.xlu0 %v4067_v7, %s6451_s27  ;;  %v6372_v18 = vld [vmem:[#allocation4 + $0x54] sm:$0xf0]  ;;  %3589 = vst.msk [vmem:[#allocation4 + $0x20] sm:$0xf] %vm1406_vm5, %v3887_v22  ;;  %v3796_v23 = vpack.c.bf16 %v3783_v21, %v3783_v21  ;;  %v4055_v24 = vld [vmem:[#allocation3 + $0x1e] sm:$0xff] }
 0x514   :  { %4185 = vrot.lane.b32.xlu2 %v3795_v53, %s6452_s28  ;;  %v6053_v15 = vor.u32 %v6372_v18, %v6052_v12  ;;  %v4068_v36 = vpack.c.bf16 %v4055_v24, %v4055_v24 }
 0x515   :  { %v6105_v32 = vld [vmem:[#allocation4 + $0x8] sm:$0xf0] }
 0x516   :  { %3402 = vmatmul.bf16.gmra.mxu3 %v6053_v15  ;;  %v6108_v48 = vor.u32 %v6382_v38, %v6105_v32  ;;  %v6397_v32 = vld [vmem:[%s8504_s8 + $0x18] sm:$0xff] }
 0x518   :  { %v3438_v58 = vpop.f32.mrf.mxu2 }
 0x519   :  { %v6384_v13 = vld [vmem:[#allocation4 + $0x14] sm:$0xf] }
 0x51a   :  { %4003 = vrot.lane.b32.xlu1 %v3613_v27, %s6457_s1 }
 0x51b   :  { %3734 = vrot.lane.b32.xlu0 %v3705_v52, %s6455_s13 }
 0x51c   :  { %3643 = vrot.lane.b32.xlu2 %v3614_v9, %s6456_s14 }
 0x522   :  { %3825 = vrot.lane.b32.xlu1 %v3796_v23, %s6454_s2 }
 0x523   :  { %4005 = vrot.lane.b32.xlu0 %v3614_v9, %s6457_s1 }
 0x524   :  { %3916 = vrot.lane.b32.xlu2 %v3887_v22, %s6453_s3 }
 0x526   :  { %3407 = vmatmul.bf16.gmra.mxu3 %v3285_v20 }
 0x52a   :  { %v3388_v46 = vpop.f32.mrf.mxu3  ;;  %4187 = vrot.lane.b32.xlu1 %v3796_v23, %s6452_s28 }
 0x52b   :  { %v3389_v19 = vadd.f32 %v7805_v62, %v3388_v46 }
 0x52c   :  { %4096 = vrot.lane.b32.xlu2 %v4068_v36, %s6451_s27 }
 0x52d   :  { %v3432_v56 = vadd.f32 %v3431_v57, %v3389_v19 }
 0x52f   :  { %v3537_v14 = vmul.f32 %v7133_v29, %v3432_v56  ;;  %v6399_v29 = vld [vmem:[%s8504_s8 + $0x28] sm:$0xff] }
 0x530   :  { %4446 = vmatpush.bf16.msra.mxu1 %v6399_v29 }
 0x531   :  { %3550 = vst.msk [vmem:[#allocation3 + $0x28] sm:$0xff] %vm910_vm3, %v3537_v14 }
 0x532   :  { %v3390_v16 = vpop.f32.mrf.mxu3 }
 0x533   :  { %v3391_v17 = vadd.f32 %v7805_v62, %v3390_v16 }
 0x534   :  { %v3638_v28 = vpop.permute.xlu2 %3637  ;;  %4447 = vmatpush.bf16.msra.mxu1 %v6398_v33 }
 0x535   :  { %3676 = vst.msk [vmem:[#allocation4] sm:$0xf] %vm1499_vm7, %v3638_v28  ;;  %v3434_v49 = vadd.f32 %v3433_v51, %v3391_v17 }
 0x536   :  { %6185 = vmatmul.msk.bf16.vlgmr.msra.gmra.mxu3 %vm910_vm3, %v6108_v48 }
 0x537   :  { %v3538_v40 = vmul.f32 %v7141_v47, %v3434_v49 }
 0x538   :  { %v3693_v0 = vld [vmem:[#allocation3 + $0x22] sm:$0xff]  ;;  %4448 = vmatpush.bf16.msra.mxu1 %v6397_v32 }
 0x539   :  { %v3602_v63 = vld [vmem:[#allocation3 + $0x21] sm:$0xff]  ;;  %3551 = vst.msk [vmem:[#allocation3 + $0x30] sm:$0xff] %vm910_vm3, %v3538_v40  ;;  %v3706_v27 = vpack.c.bf16 %v3693_v0, %v3693_v0  ;;  %v6396_v0 = vld [vmem:[%s8504_s8 + $0x10] sm:$0xff] }
 0x53a   :  { %v3784_v35 = vld [vmem:[#allocation3 + $0x27] sm:$0xff]  ;;  %v3615_v53 = vpack.c.bf16 %v3602_v63, %v3602_v63 }
 0x53b   :  { %v3797_v6 = vpack.c.bf16 %v3784_v35, %v3784_v35  ;;  %v4238_v34 = vld [vmem:[#allocation3 + $0x28] sm:$0xff]  ;;  %3736 = vrot.lane.b32.xlu1 %v3706_v27, %s6455_s13 }
 0x53c   :  { %v4251_v30 = vpack.c.bf16 %v4238_v34, %v4238_v34  ;;  %3645 = vrot.lane.b32.xlu0 %v3615_v53, %s6456_s14  ;;  %v4056_v47 = vld [vmem:[#allocation3 + $0x26] sm:$0xff]  ;;  %v3911_v18 = vpop.permute.xlu2 %3910  ;;  %4449 = vmatpush.bf16.msra.mxu1 %v6396_v0 }
 0x53d   :  { %3827 = vrot.lane.b32.xlu2 %v3797_v6, %s6454_s2  ;;  %v4069_v26 = vpack.c.bf16 %v4056_v47, %v4056_v47 }
 0x53e   :  { %4264 = vst.msk [vmem:[#allocation4 + $0x1c] sm:$0xf] %vm1406_vm5, %v4251_v30 }
 0x53f   :  { %3590 = vst.msk [vmem:[#allocation4 + $0x28] sm:$0xf] %vm1406_vm5, %v4251_v30 }
 0x540   :  { %v3876_v3 = vld [vmem:[#allocation3 + $0x30] sm:$0xff] }
 0x541   :  { %v3889_v39 = vpack.c.bf16 %v3876_v3, %v3876_v3  ;;  %v3603_v7 = vld [vmem:[#allocation3 + $0x29] sm:$0xff] }
 0x542   :  { %v3694_v22 = vld [vmem:[#allocation3 + $0x2a] sm:$0xff]  ;;  %v3616_v60 = vpack.c.bf16 %v3603_v7, %v3603_v7 }
 0x543   :  { %4007 = vrot.lane.b32.xlu1 %v3615_v53, %s6457_s1  ;;  %4265 = vst.msk [vmem:[#allocation4 + $0x24] sm:$0xf] %vm1406_vm5, %v3889_v39  ;;  %v3707_v9 = vpack.c.bf16 %v3694_v22, %v3694_v22  ;;  %v3785_v21 = vld [vmem:[#allocation3 + $0x2f] sm:$0xff] }
 0x544   :  { %4098 = vrot.lane.b32.xlu0 %v4069_v26, %s6451_s27  ;;  %3591 = vst.msk [vmem:[#allocation4 + $0x30] sm:$0xf] %vm1406_vm5, %v3889_v39  ;;  %v3798_v24 = vpack.c.bf16 %v3785_v21, %v3785_v21  ;;  %v3822_v57 = vpop.permute.xlu2 %3821  ;;  %v4057_v19 = vld [vmem:[#allocation3 + $0x2e] sm:$0xff] }
 0x545   :  { %v6113_v61 = vld [vmem:[#allocation4 + $0x18] sm:$0xf0]  ;;  %4189 = vrot.lane.b32.xlu2 %v3797_v6, %s6452_s28  ;;  %v4070_v28 = vpack.c.bf16 %v4057_v19, %v4057_v19 }
 0x546   :  { %v6116_v42 = vor.u32 %v6384_v13, %v6113_v61  ;;  %v6395_v26 = vld [vmem:[%s8504_s8 + $0x8] sm:$0xff] }
 0x547   :  { %4450 = vmatpush.bf16.msra.mxu1 %v6395_v26 }
 0x548   :  { %6186 = vmatmul.msk.bf16.gmra.mxu3 %vm910_vm3, %v6116_v42  ;;  %v3393_v12 = vpop.f32.mrf.mxu3 }
 0x549   :  { %v3394_v15 = vadd.f32 %v7805_v62, %v3393_v12 }
 0x54a   :  { %v3820_v45 = vpop.permute.xlu1 %3819  ;;  %v6386_v27 = vld [vmem:[#allocation4 + $0x24] sm:$0xf] }
 0x54b   :  { %v3729_v52 = vpop.permute.xlu0 %3728  ;;  %v3437_v25 = vadd.f32 %v3436_v41, %v3394_v15  ;;  %3647 = vrot.lane.b32.xlu1 %v3616_v60, %s6456_s14 }
 0x54c   :  { %3918 = vrot.lane.b32.xlu0 %v4251_v30, %s6453_s3  ;;  %3767 = vst.msk [vmem:[#allocation4] sm:$0xf] %vm1592_vm8, %v3729_v52 }
 0x54d   :  { %3858 = vst.msk [vmem:[#allocation4] sm:$0xf] %vm1685_vm9, %v3820_v45  ;;  %3738 = vrot.lane.b32.xlu2 %v3707_v9, %s6455_s13  ;;  %v3539_v31 = vmul.f32 %v7144_v8, %v3437_v25  ;;  %v6394_v25 = vld [vmem:[%s8504_s8] sm:$0xff] }
 0x54e   :  { %3949 = vst.msk [vmem:[#allocation4] sm:$0xf] %vm1778_vm10, %v3911_v18  ;;  %4451 = vmatpush.bf16.msra.mxu1 %v6394_v25 }
 0x54f   :  { %3552 = vst.msk [vmem:[#allocation3 + $0x38] sm:$0xff] %vm910_vm3, %v3539_v31 }
 0x550   :  { %v3395_v23 = vpop.f32.mrf.mxu3 }
 0x551   :  { %v3396_v20 = vadd.f32 %v7805_v62, %v3395_v23 }
 0x552   :  { %v3731_v1 = vpop.permute.xlu1 %3730 }
 0x553   :  { %v3640_v36 = vpop.permute.xlu0 %3639  ;;  %v3439_v46 = vadd.f32 %v3438_v58, %v3396_v20  ;;  %3920 = vrot.lane.b32.xlu1 %v3889_v39, %s6453_s3  ;;  %v3441_v39 = vpop.f32.mrf.mxu2 }
 0x554   :  { %3829 = vrot.lane.b32.xlu0 %v3798_v24, %s6454_s2  ;;  %3677 = vst.msk [vmem:[#allocation4 + $0x8] sm:$0xf] %vm1499_vm7, %v3640_v36 }
 0x555   :  { %3768 = vst.msk [vmem:[#allocation4 + $0x8] sm:$0xf] %vm1592_vm8, %v3731_v1  ;;  %4009 = vrot.lane.b32.xlu2 %v3616_v60, %s6457_s1  ;;  %v3540_v8 = vmul.f32 %v7160_v44, %v3439_v46  ;;  %v4093_v44 = vpop.permute.xlu2 %4092 }
 0x556   :  { %3859 = vst.msk [vmem:[#allocation4 + $0x8] sm:$0xf] %vm1685_vm9, %v3822_v57  ;;  %v3604_v56 = vld [vmem:[#allocation3 + $0x31] sm:$0xff] }
 0x557   :  { %3553 = vst.msk [vmem:[#allocation3 + $0x40] sm:$0xff] %vm910_vm3, %v3540_v8  ;;  %v4240_v14 = vld [vmem:[#allocation3 + $0x38] sm:$0xff]  ;;  %v3617_v16 = vpack.c.bf16 %v3604_v56, %v3604_v56 }
 0x558   :  { %v4253_v17 = vpack.c.bf16 %v4240_v14, %v4240_v14  ;;  %v3786_v51 = vld [vmem:[#allocation3 + $0x37] sm:$0xff] }
 0x559   :  { %v3695_v48 = vld [vmem:[#allocation3 + $0x32] sm:$0xff]  ;;  %v3799_v63 = vpack.c.bf16 %v3786_v51, %v3786_v51 }
 0x55a   :  { %4266 = vst.msk [vmem:[#allocation4 + $0x2c] sm:$0xf] %vm1406_vm5, %v4253_v17  ;;  %v4058_v49 = vld [vmem:[#allocation3 + $0x36] sm:$0xff]  ;;  %v3708_v35 = vpack.c.bf16 %v3695_v48, %v3695_v48  ;;  %v4184_v47 = vpop.permute.xlu1 %4183 }
 0x55b   :  { %v3913_v38 = vpop.permute.xlu0 %3912  ;;  %4100 = vrot.lane.b32.xlu1 %v4070_v28, %s6451_s27  ;;  %3592 = vst.msk [vmem:[#allocation4 + $0x38] sm:$0xf] %vm1406_vm5, %v4253_v17  ;;  %v4071_v34 = vpack.c.bf16 %v4058_v49, %v4058_v49  ;;  %v3443_v52 = vpop.f32.mrf.mxu2 }
 0x55c   :  { %4191 = vrot.lane.b32.xlu0 %v3798_v24, %s6452_s28  ;;  %3950 = vst.msk [vmem:[#allocation4 + $0x8] sm:$0xf] %vm1778_vm10, %v3913_v38 }
 0x55d   :  { %3649 = vrot.lane.b32.xlu2 %v3617_v16, %s6456_s14 }
 0x55e   :  { %v3878_v40 = vld [vmem:[#allocation3 + $0x40] sm:$0xff] }
 0x55f   :  { %v3891_v29 = vpack.c.bf16 %v3878_v40, %v3878_v40  ;;  %v3696_v61 = vld [vmem:[#allocation3 + $0x3a] sm:$0xff] }
 0x560   :  { %v3605_v42 = vld [vmem:[#allocation3 + $0x39] sm:$0xff]  ;;  %v3709_v22 = vpack.c.bf16 %v3696_v61, %v3696_v61 }
 0x561   :  { %v6121_v53 = vld [vmem:[#allocation4 + $0x28] sm:$0xf0]  ;;  %4267 = vst.msk [vmem:[#allocation4 + $0x34] sm:$0xf] %vm1406_vm5, %v3891_v29  ;;  %v3618_v12 = vpack.c.bf16 %v3605_v42, %v3605_v42 }
 0x562   :  { %v6124_v30 = vor.u32 %v6386_v27, %v6121_v53  ;;  %3593 = vst.msk [vmem:[#allocation4 + $0x40] sm:$0xf] %vm1406_vm5, %v3891_v29  ;;  %v3787_v33 = vld [vmem:[#allocation3 + $0x3f] sm:$0xff] }
 0x563   :  { %v4002_v6 = vpop.permute.xlu0 %4001  ;;  %3831 = vrot.lane.b32.xlu1 %v3799_v63, %s6454_s2  ;;  %v3800_v18 = vpack.c.bf16 %v3787_v33, %v3787_v33  ;;  %v4059_v20 = vld [vmem:[#allocation3 + $0x3e] sm:$0xff]  ;;  %v3446_v19 = vpop.f32.mrf.mxu2 }
 0x564   :  { %4040 = vst.msk [vmem:[#allocation4] sm:$0xf] %vm1871_vm2, %v4002_v6  ;;  %3740 = vrot.lane.b32.xlu0 %v3708_v35, %s6455_s13  ;;  %6187 = vmatmul.msk.bf16.gmra.mxu3 %vm910_vm3, %v6124_v30  ;;  %v4072_v56 = vpack.c.bf16 %v4059_v20, %v4059_v20 }
 0x565   :  { %4131 = vst.msk [vmem:[#allocation4] sm:$0xf] %vm1964_vm1, %v4093_v44  ;;  %4102 = vrot.lane.b32.xlu2 %v4071_v34, %s6451_s27 }
 0x566   :  { %4222 = vst.msk [vmem:[#allocation4] sm:$0xf] %vm2057_vm0, %v4184_v47  ;;  %v3733_v3 = vpop.permute.xlu2 %3732 }
 0x568   :  { %v6388_v48 = vld [vmem:[#allocation4 + $0x34] sm:$0xf] }
 0x56b   :  { %4193 = vrot.lane.b32.xlu1 %v3799_v63, %s6452_s28 }
 0x56c   :  { %4011 = vrot.lane.b32.xlu0 %v3617_v16, %s6457_s1 }
 0x56d   :  { %3922 = vrot.lane.b32.xlu2 %v4253_v17, %s6453_s3  ;;  %v6103_v47 = vld [vmem:[#allocation4] sm:$0xf] }
 0x56e   :  { %v7966_v13 = vpop.permute.xlu2 %4185 }
 0x570   :  { %v3398_v7 = vpop.f32.mrf.mxu3 }
 0x571   :  { %v3399_v41 = vadd.f32 %v7805_v62, %v3398_v7 }
 0x573   :  { %v3442_v15 = vadd.f32 %v3441_v39, %v3399_v41  ;;  %3742 = vrot.lane.b32.xlu1 %v3709_v22, %s6455_s13 }
 0x574   :  { %3651 = vrot.lane.b32.xlu0 %v3618_v12, %s6456_s14 }
 0x575   :  { %3833 = vrot.lane.b32.xlu2 %v3800_v18, %s6454_s2  ;;  %v3541_v60 = vmul.f32 %v7166_v2, %v3442_v15 }
 0x576   :  { %v3644_v45 = vpop.permute.xlu2 %3643 }
 0x577   :  { %3679 = vst.msk [vmem:[#allocation4 + $0x18] sm:$0xf] %vm1499_vm7, %v3644_v45 }
 0x578   :  { %3554 = vst.msk [vmem:[#allocation3 + $0x48] sm:$0xff] %vm910_vm3, %v3541_v60  ;;  %v3400_v9 = vpop.f32.mrf.mxu3 }
 0x579   :  { %v3401_v31 = vadd.f32 %v7805_v62, %v3400_v9 }
 0x57b   :  { %v3444_v21 = vadd.f32 %v3443_v52, %v3401_v31  ;;  %4013 = vrot.lane.b32.xlu1 %v3618_v12, %s6457_s1 }
 0x57c   :  { %3924 = vrot.lane.b32.xlu0 %v3891_v29, %s6453_s3  ;;  %v3642_v2 = vpop.permute.xlu1 %3641  ;;  %v3448_v29 = vpop.f32.mrf.mxu2 }
 0x57d   :  { %4195 = vrot.lane.b32.xlu2 %v3800_v18, %s6452_s28  ;;  %v3824_v23 = vpop.permute.xlu0 %3823  ;;  %v3542_v58 = vmul.f32 %v7172_v5, %v3444_v21  ;;  %3678 = vst.msk [vmem:[#allocation4 + $0x10] sm:$0xf] %vm1499_vm7, %v3642_v2 }
 0x57e   :  { %3769 = vst.msk [vmem:[#allocation4 + $0x10] sm:$0xf] %vm1592_vm8, %v3733_v3  ;;  %v3917_v5 = vpop.permute.xlu2 %3916 }
 0x57f   :  { %v3697_v24 = vld [vmem:[#allocation3 + $0x42] sm:$0xff]  ;;  %3555 = vst.msk [vmem:[#allocation3 + $0x50] sm:$0xff] %vm910_vm3, %v3542_v58 }
 0x580   :  { %v3606_v1 = vld [vmem:[#allocation3 + $0x41] sm:$0xff]  ;;  %3860 = vst.msk [vmem:[#allocation4 + $0x10] sm:$0xf] %vm1685_vm9, %v3824_v23  ;;  %v3710_v46 = vpack.c.bf16 %v3697_v24, %v3697_v24 }
 0x581   :  { %v3619_v36 = vpack.c.bf16 %v3606_v1, %v3606_v1  ;;  %v4242_v57 = vld [vmem:[#allocation3 + $0x48] sm:$0xff] }
 0x582   :  { %v4255_v8 = vpack.c.bf16 %v4242_v57, %v4242_v57  ;;  %v3788_v16 = vld [vmem:[#allocation3 + $0x47] sm:$0xff] }
 0x583   :  { %3653 = vrot.lane.b32.xlu1 %v3619_v36, %s6456_s14  ;;  %v4060_v17 = vld [vmem:[#allocation3 + $0x46] sm:$0xff]  ;;  %v3801_v44 = vpack.c.bf16 %v3788_v16, %v3788_v16 }
 0x584   :  { %4268 = vst.msk [vmem:[#allocation4 + $0x3c] sm:$0xf] %vm1406_vm5, %v4255_v8  ;;  %4104 = vrot.lane.b32.xlu0 %v4072_v56, %s6451_s27  ;;  %v3915_v14 = vpop.permute.xlu1 %3914  ;;  %v4073_v51 = vpack.c.bf16 %v4060_v17, %v4060_v17 }
 0x585   :  { %3594 = vst.msk [vmem:[#allocation4 + $0x48] sm:$0xf] %vm1406_vm5, %v4255_v8  ;;  %3744 = vrot.lane.b32.xlu2 %v3710_v46, %s6455_s13  ;;  %v4095_v32 = vpop.permute.xlu0 %4094 }
 0x586   :  { %3951 = vst.msk [vmem:[#allocation4 + $0x10] sm:$0xf] %vm1778_vm10, %v3915_v14  ;;  %v3880_v28 = vld [vmem:[#allocation3 + $0x50] sm:$0xff]  ;;  %v4097_v35 = vpop.permute.xlu2 %4096 }
 0x587   :  { %v3893_v38 = vpack.c.bf16 %v3880_v28, %v3880_v28  ;;  %v3607_v27 = vld [vmem:[#allocation3 + $0x49] sm:$0xff] }
 0x588   :  { %v3620_v53 = vpack.c.bf16 %v3607_v27, %v3607_v27  ;;  %v3698_v39 = vld [vmem:[#allocation3 + $0x4a] sm:$0xff] }
 0x589   :  { %4269 = vst.msk [vmem:[#allocation4 + $0x44] sm:$0xf] %vm1406_vm5, %v3893_v38  ;;  %v3711_v33 = vpack.c.bf16 %v3698_v39, %v3698_v39  ;;  %v4061_v45 = vld [vmem:[#allocation3 + $0x4e] sm:$0xff] }
 0x58a   :  { %3595 = vst.msk [vmem:[#allocation4 + $0x50] sm:$0xf] %vm1406_vm5, %v3893_v38  ;;  %v4074_v25 = vpack.c.bf16 %v4061_v45, %v4061_v45 }
 0x58b   :  { %v6129_v49 = vld [vmem:[#allocation4 + $0x38] sm:$0xf0]  ;;  %4106 = vrot.lane.b32.xlu1 %v4073_v51, %s6451_s27 }
 0x58c   :  { %v6132_v40 = vor.u32 %v6388_v48, %v6129_v49  ;;  %3835 = vrot.lane.b32.xlu0 %v3801_v44, %s6454_s2  ;;  %v4004_v0 = vpop.permute.xlu1 %4003 }
 0x58d   :  { %4015 = vrot.lane.b32.xlu2 %v3619_v36, %s6457_s1  ;;  %v3735_v63 = vpop.permute.xlu0 %3734  ;;  %4041 = vst.msk [vmem:[#allocation4 + $0x8] sm:$0xf] %vm1871_vm2, %v4004_v0 }
 0x58e   :  { %6188 = vmatmul.msk.bf16.gmra.mxu3 %vm910_vm3, %v6132_v40  ;;  %4132 = vst.msk [vmem:[#allocation4 + $0x8] sm:$0xf] %vm1964_vm1, %v4095_v32 }
 0x58f   :  { %4223 = vst.msk [vmem:[#allocation4 + $0x8] sm:$0xf] %vm2057_vm0, %v7966_v13  ;;  %v3789_v13 = vld [vmem:[#allocation3 + $0x4f] sm:$0xff] }
 0x590   :  { %3770 = vst.msk [vmem:[#allocation4 + $0x18] sm:$0xf] %vm1592_vm8, %v3735_v63  ;;  %v3802_v7 = vpack.c.bf16 %v3789_v13, %v3789_v13 }
 0x593   :  { %3926 = vrot.lane.b32.xlu1 %v4255_v8, %s6453_s3 }
 0x594   :  { %4197 = vrot.lane.b32.xlu0 %v3801_v44, %s6452_s28  ;;  %v3451_v6 = vpop.f32.mrf.mxu2  ;;  %v3826_v34 = vpop.permute.xlu1 %3825  ;;  %v6390_v44 = vld [vmem:[#allocation4 + $0x44] sm:$0xf] }
 0x595   :  { %3655 = vrot.lane.b32.xlu2 %v3620_v53, %s6456_s14  ;;  %3861 = vst.msk [vmem:[#allocation4 + $0x18] sm:$0xf] %vm1685_vm9, %v3826_v34  ;;  %v4006_v30 = vpop.permute.xlu0 %4005 }
 0x596   :  { %3952 = vst.msk [vmem:[#allocation4 + $0x18] sm:$0xf] %vm1778_vm10, %v3917_v5  ;;  %v6383_v26 = vld [vmem:[#allocation4 + $0x4] sm:$0xf0] }
 0x597   :  { %v3828_v3 = vpop.permute.xlu2 %3827  ;;  %4042 = vst.msk [vmem:[#allocation4 + $0x10] sm:$0xf] %vm1871_vm2, %v4006_v30  ;;  %v6104_v61 = vor.u32 %v6383_v26, %v6103_v47 }
 0x598   :  { %4133 = vst.msk [vmem:[#allocation4 + $0x10] sm:$0xf] %vm1964_vm1, %v4097_v35 }
 0x599   :  { %v3403_v42 = vpop.f32.mrf.mxu3  ;;  %4452 = vmatmul.bf16.vlgmr.msra.gmra.mxu1 %v6104_v61 }
 0x59a   :  { %v3404_v41 = vadd.f32 %v7805_v62, %v3403_v42 }
 0x59b   :  { %3837 = vrot.lane.b32.xlu1 %v3802_v7, %s6454_s2 }
 0x59c   :  { %3746 = vrot.lane.b32.xlu0 %v3711_v33, %s6455_s13  ;;  %v3447_v22 = vadd.f32 %v3446_v19, %v3404_v41  ;;  %v3453_v12 = vpop.f32.mrf.mxu2  ;;  %v4188_v18 = vpop.permute.xlu1 %4187 }
 0x59d   :  { %3928 = vrot.lane.b32.xlu2 %v3893_v38, %s6453_s3  ;;  %4224 = vst.msk [vmem:[#allocation4 + $0x10] sm:$0xf] %vm2057_vm0, %v4188_v18 }
 0x59e   :  { %v3543_v15 = vmul.f32 %v7184_v43, %v3447_v22 }
 0x59f   :  { %v4190_v60 = vpop.permute.xlu2 %4189 }
 0x5a0   :  { %3556 = vst.msk [vmem:[#allocation3 + $0x58] sm:$0xff] %vm910_vm3, %v3543_v15 }
 0x5a1   :  { %v3405_v52 = vpop.f32.mrf.mxu3 }
 0x5a2   :  { %v3406_v9 = vadd.f32 %v7805_v62, %v3405_v52 }
 0x5a3   :  { %4199 = vrot.lane.b32.xlu1 %v3802_v7, %s6452_s28 }
 0x5a4   :  { %4017 = vrot.lane.b32.xlu0 %v3620_v53, %s6457_s1  ;;  %v3449_v31 = vadd.f32 %v3448_v29, %v3406_v9 }
 0x5a5   :  { %4108 = vrot.lane.b32.xlu2 %v4074_v25, %s6451_s27 }
 0x5a6   :  { %v3544_v21 = vmul.f32 %v7190_v50, %v3449_v31 }
 0x5a7   :  { %v8023_v2 = vpop.permute.xlu2 %3738  ;;  %v3608_v43 = vld [vmem:[#allocation3 + $0x51] sm:$0xff] }
 0x5a8   :  { %v3790_v23 = vld [vmem:[#allocation3 + $0x57] sm:$0xff]  ;;  %3557 = vst.msk [vmem:[#allocation3 + $0x60] sm:$0xff] %vm910_vm3, %v3544_v21  ;;  %v3621_v20 = vpack.c.bf16 %v3608_v43, %v3608_v43 }
 0x5a9   :  { %v3699_v58 = vld [vmem:[#allocation3 + $0x52] sm:$0xff]  ;;  %v3803_v24 = vpack.c.bf16 %v3790_v23, %v3790_v23  ;;  %v3408_v57 = vpop.f32.mrf.mxu3 }
 0x5aa   :  { %v3712_v1 = vpack.c.bf16 %v3699_v58, %v3699_v58  ;;  %v4244_v36 = vld [vmem:[#allocation3 + $0x58] sm:$0xff]  ;;  %v3409_v8 = vadd.f32 %v7805_v62, %v3408_v57 }
 0x5ab   :  { %v4257_v46 = vpack.c.bf16 %v4244_v36, %v4244_v36  ;;  %v4062_v32 = vld [vmem:[#allocation3 + $0x56] sm:$0xff] }
 0x5ac   :  { %3657 = vrot.lane.b32.xlu0 %v3621_v20, %s6456_s14  ;;  %3748 = vrot.lane.b32.xlu1 %v3712_v1, %s6455_s13  ;;  %v3452_v50 = vadd.f32 %v3451_v6, %v3409_v8  ;;  %v4075_v17 = vpack.c.bf16 %v4062_v32, %v4062_v32 }
 0x5ad   :  { %4270 = vst.msk [vmem:[#allocation4 + $0x4c] sm:$0xf] %vm1406_vm5, %v4257_v46  ;;  %3839 = vrot.lane.b32.xlu2 %v3803_v24, %s6454_s2  ;;  %v3737_v19 = vpop.permute.xlu1 %3736 }
 0x5ae   :  { %3596 = vst.msk [vmem:[#allocation4 + $0x58] sm:$0xf] %vm1406_vm5, %v4257_v46  ;;  %v3646_v56 = vpop.permute.xlu0 %3645  ;;  %v3545_v5 = vmul.f32 %v7197_v4, %v3452_v50 }
 0x5af   :  { %3680 = vst.msk [vmem:[#allocation4 + $0x20] sm:$0xf] %vm1499_vm7, %v3646_v56  ;;  %v4010_v14 = vpop.permute.xlu2 %4009  ;;  %v3882_v62 = vld [vmem:[#allocation3 + $0x60] sm:$0xff] }
 0x5b0   :  { %3771 = vst.msk [vmem:[#allocation4 + $0x20] sm:$0xf] %vm1592_vm8, %v3737_v19  ;;  %v3895_v28 = vpack.c.bf16 %v3882_v62, %v3882_v62  ;;  %v3571_v38 = vld [vmem:[#allocation3 + $0x60] sm:$0x3]  ;;  %v3701_v26 = vld [vmem:[#allocation3 + $0x62] sm:$0x3] }
 0x5b1   :  { %3558 = vst.msk [vmem:[#allocation3 + $0x68] sm:$0x3] %vm1021_vm4, %v3545_v5  ;;  %v3410_v16 = vpop.f32.mrf.mxu3  ;;  %v3584_v48 = vpack.c.bf16 %v3571_v38, %v3571_v38  ;;  %v3609_v0 = vld [vmem:[#allocation3 + $0x59] sm:$0xff]  ;;  %v3610_v63 = vld [vmem:[#allocation3 + $0x61] sm:$0x3]  ;;  %v3714_v42 = vpack.c.bf16 %v3701_v26, %v3701_v26 }
 0x5b2   :  { %3862 = vst.msk [vmem:[#allocation4 + $0x20] sm:$0xf] %vm1685_vm9, %v3828_v3  ;;  %v3622_v53 = vpack.c.bf16 %v3609_v0, %v3609_v0  ;;  %v3623_v6 = vpack.c.bf16 %v3610_v63, %v3610_v63  ;;  %v6111_v3 = vld [vmem:[#allocation4 + $0x10] sm:$0xf]  ;;  %v3700_v13 = vld [vmem:[#allocation3 + $0x5a] sm:$0xff] }
 0x5b3   :  { %4271 = vst.msk [vmem:[#allocation4 + $0x54] sm:$0xf] %vm1406_vm5, %v3895_v28  ;;  %v3713_v41 = vpack.c.bf16 %v3700_v13, %v3700_v13  ;;  %v4063_v45 = vld [vmem:[#allocation3 + $0x5e] sm:$0xff] }
 0x5b4   :  { %v6137_v51 = vld [vmem:[#allocation4 + $0x48] sm:$0xf0]  ;;  %4110 = vrot.lane.b32.xlu0 %v4075_v17, %s6451_s27  ;;  %4019 = vrot.lane.b32.xlu1 %v3621_v20, %s6457_s1  ;;  %3597 = vst.msk [vmem:[#allocation4 + $0x60] sm:$0x1] %vm1419_vm6, %v3584_v48  ;;  %v4076_v9 = vpack.c.bf16 %v4063_v45, %v4063_v45 }
 0x5b5   :  { %v6140_v4 = vor.u32 %v6390_v44, %v6137_v51  ;;  %4201 = vrot.lane.b32.xlu2 %v3803_v24, %s6452_s28  ;;  %v4008_v49 = vpop.permute.xlu1 %4007 }
 0x5b6   :  { %v4099_v40 = vpop.permute.xlu0 %4098  ;;  %4043 = vst.msk [vmem:[#allocation4 + $0x18] sm:$0xf] %vm1871_vm2, %v4008_v49 }
 0x5b7   :  { %6189 = vmatmul.msk.bf16.gmra.mxu3 %vm910_vm3, %v6140_v4  ;;  %v3650_v29 = vpop.permute.xlu2 %3649  ;;  %4134 = vst.msk [vmem:[#allocation4 + $0x18] sm:$0xf] %vm1964_vm1, %v4099_v40 }
 0x5b8   :  { %v4246_v35 = vld [vmem:[#allocation3 + $0x68] sm:$0xff]  ;;  %4225 = vst.msk [vmem:[#allocation4 + $0x18] sm:$0xf] %vm2057_vm0, %v4190_v60  ;;  %v3791_v60 = vld [vmem:[#allocation3 + $0x5f] sm:$0xff] }
 0x5b9   :  { %v4259_v27 = vpack.c.bf16 %v4246_v35, %v4246_v35  ;;  %3682 = vst.msk [vmem:[#allocation4 + $0x30] sm:$0xf] %vm1499_vm7, %v3650_v29  ;;  %v3804_v52 = vpack.c.bf16 %v3791_v60, %v3791_v60  ;;  %v4064_v43 = vld [vmem:[#allocation3 + $0x66] sm:$0xff] }
 0x5ba   :  { %v6392_v33 = vld [vmem:[#allocation4 + $0x54] sm:$0xf]  ;;  %v4077_v58 = vpack.c.bf16 %v4064_v43, %v4064_v43  ;;  %v3973_v36 = vld [vmem:[#allocation3 + $0x61] sm:$0xff]  ;;  %v3974_v32 = vld [vmem:[#allocation3 + $0x69] sm:$0x3] }
 0x5bb   :  { %4272 = vst.msk [vmem:[#allocation4 + $0x5c] sm:$0xf] %vm1406_vm5, %v4259_v27  ;;  %v4155_v57 = vld [vmem:[#allocation3 + $0x67] sm:$0xff]  ;;  %v3986_v8 = vpack.c.bf16 %v3973_v36, %v3973_v36  ;;  %v3987_v62 = vpack.c.bf16 %v3974_v32, %v3974_v32 }
 0x5bc   :  { %3930 = vrot.lane.b32.xlu0 %v4257_v46, %s6453_s3  ;;  %3659 = vrot.lane.b32.xlu1 %v3622_v53, %s6456_s14  ;;  %v3883_v46 = vld [vmem:[#allocation3 + $0x68] sm:$0x3]  ;;  %v4168_v50 = vpack.c.bf16 %v4155_v57, %v4155_v57 }
 0x5bd   :  { %3661 = vrot.lane.b32.xlu2 %v3623_v6, %s6456_s14  ;;  %v3648_v34 = vpop.permute.xlu1 %3647  ;;  %v3896_v19 = vpack.c.bf16 %v3883_v46, %v3883_v46 }
 0x5be   :  { %v3919_v30 = vpop.permute.xlu0 %3918  ;;  %3681 = vst.msk [vmem:[#allocation4 + $0x28] sm:$0xf] %vm1499_vm7, %v3648_v34 }
 0x5bf   :  { %v8052_v47 = vpop.permute.xlu2 %4102  ;;  %3772 = vst.msk [vmem:[#allocation4 + $0x28] sm:$0xf] %vm1592_vm8, %v8023_v2  ;;  %v6385_v39 = vld [vmem:[#allocation4 + $0x14] sm:$0xf0]  ;;  %v3792_v2 = vld [vmem:[#allocation3 + $0x67] sm:$0x3] }
 0x5c0   :  { %3953 = vst.msk [vmem:[#allocation4 + $0x20] sm:$0xf] %vm1778_vm10, %v3919_v30  ;;  %v6112_v61 = vor.u32 %v6385_v39, %v6111_v3  ;;  %v3805_v23 = vpack.c.bf16 %v3792_v2, %v3792_v2 }
 0x5c1   :  { %4044 = vst.msk [vmem:[#allocation4 + $0x20] sm:$0xf] %vm1871_vm2, %v4010_v14 }
 0x5c2   :  { %v6145_v7 = vld [vmem:[#allocation4 + $0x58] sm:$0xf0]  ;;  %4457 = vmatmul.bf16.gmra.mxu1 %v6112_v61  ;;  %v8104_v61 = vld [vmem:[%s8505_s9] ss:$0 sm:$0xff] }
 0x5c3   :  { %v6148_v22 = vor.u32 %v6392_v33, %v6145_v7 }
 0x5c4   :  { %3752 = vrot.lane.b32.xlu0 %v3714_v42, %s6455_s13  ;;  %3932 = vrot.lane.b32.xlu1 %v3895_v28, %s6453_s3  ;;  %v4496_v42 = vpop.f32.mrf.mxu3 }
 0x5c5   :  { %3750 = vrot.lane.b32.xlu2 %v3713_v41, %s6455_s13  ;;  %v3921_v12 = vpop.permute.xlu1 %3920 }
 0x5c6   :  { %v3830_v18 = vpop.permute.xlu0 %3829 }
 0x5c7   :  { %6190 = vmatmul.msk.bf16.gmra.mxu3 %vm910_vm3, %v6148_v22  ;;  %3863 = vst.msk [vmem:[#allocation4 + $0x28] sm:$0xf] %vm1685_vm9, %v3830_v18  ;;  %v3923_v15 = vpop.permute.xlu2 %3922 }
 0x5c8   :  { %3954 = vst.msk [vmem:[#allocation4 + $0x28] sm:$0xf] %vm1778_vm10, %v3921_v12 }
 0x5cc   :  { %3841 = vrot.lane.b32.xlu0 %v3804_v52, %s6454_s2  ;;  %4112 = vrot.lane.b32.xlu1 %v4076_v9, %s6451_s27 }
 0x5cd   :  { %4021 = vrot.lane.b32.xlu2 %v3622_v53, %s6457_s1  ;;  %v4101_v25 = vpop.permute.xlu1 %4100 }
 0x5ce   :  { %v4192_v31 = vpop.permute.xlu0 %4191  ;;  %4135 = vst.msk [vmem:[#allocation4 + $0x20] sm:$0xf] %vm1964_vm1, %v4101_v25 }
 0x5cf   :  { %v3834_v21 = vpop.permute.xlu2 %3833  ;;  %4226 = vst.msk [vmem:[#allocation4 + $0x20] sm:$0xf] %vm2057_vm0, %v4192_v31  ;;  %v4498_v31 = vpop.f32.mrf.mxu3 }
 0x5d4   :  { %4203 = vrot.lane.b32.xlu0 %v3804_v52, %s6452_s28  ;;  %3843 = vrot.lane.b32.xlu1 %v3805_v23, %s6454_s2 }
 0x5d5   :  { %4114 = vrot.lane.b32.xlu2 %v4077_v58, %s6451_s27  ;;  %v3832_v20 = vpop.permute.xlu1 %3831 }
 0x5d6   :  { %v3741_v24 = vpop.permute.xlu0 %3740  ;;  %v6119_v38 = vld [vmem:[#allocation4 + $0x20] sm:$0xf] }
 0x5d7   :  { %3773 = vst.msk [vmem:[#allocation4 + $0x30] sm:$0xf] %vm1592_vm8, %v3741_v24  ;;  %v4196_v1 = vpop.permute.xlu2 %4195 }
 0x5d8   :  { %3864 = vst.msk [vmem:[#allocation4 + $0x30] sm:$0xf] %vm1685_vm9, %v3832_v20 }
 0x5d9   :  { %3955 = vst.msk [vmem:[#allocation4 + $0x30] sm:$0xf] %vm1778_vm10, %v3923_v15 }
 0x5dc   :  { %4023 = vrot.lane.b32.xlu0 %v3986_v8, %s6457_s1  ;;  %4205 = vrot.lane.b32.xlu1 %v4168_v50, %s6452_s28 }
 0x5dd   :  { %3934 = vrot.lane.b32.xlu2 %v3896_v19, %s6453_s3  ;;  %v4194_v56 = vpop.permute.xlu1 %4193 }
 0x5de   :  { %v4012_v5 = vpop.permute.xlu0 %4011 }
 0x5df   :  { %4045 = vst.msk [vmem:[#allocation4 + $0x28] sm:$0xf] %vm1871_vm2, %v4012_v5  ;;  %v3745_v14 = vpop.permute.xlu2 %3744 }
 0x5e0   :  { %4136 = vst.msk [vmem:[#allocation4 + $0x28] sm:$0xf] %vm1964_vm1, %v8052_v47 }
 0x5e1   :  { %4227 = vst.msk [vmem:[#allocation4 + $0x28] sm:$0xf] %vm2057_vm0, %v4194_v56 }
 0x5e4   :  { %4025 = vrot.lane.b32.xlu0 %v3987_v62, %s6457_s1 }
 0x5e5   :  { %v3743_v16 = vpop.permute.xlu1 %3742 }
 0x5e6   :  { %v3652_v17 = vpop.permute.xlu0 %3651 }
 0x5e7   :  { %3683 = vst.msk [vmem:[#allocation4 + $0x38] sm:$0xf] %vm1499_vm7, %v3652_v17  ;;  %v4016_v28 = vpop.permute.xlu2 %4015 }
 0x5e8   :  { %3774 = vst.msk [vmem:[#allocation4 + $0x38] sm:$0xf] %vm1592_vm8, %v3743_v16  ;;  %v6387_v44 = vld [vmem:[#allocation4 + $0x24] sm:$0xf0] }
 0x5e9   :  { %3865 = vst.msk [vmem:[#allocation4 + $0x38] sm:$0xf] %vm1685_vm9, %v3834_v21  ;;  %v6120_v51 = vor.u32 %v6387_v44, %v6119_v38 }
 0x5eb   :  { %4462 = vmatmul.bf16.gmra.mxu1 %v6120_v51 }
 0x5ed   :  { %v4014_v48 = vpop.permute.xlu1 %4013 }
 0x5ee   :  { %v3925_v4 = vpop.permute.xlu0 %3924  ;;  %4046 = vst.msk [vmem:[#allocation4 + $0x30] sm:$0xf] %vm1871_vm2, %v4014_v48 }
 0x5ef   :  { %v3656_v49 = vpop.permute.xlu2 %3655  ;;  %3956 = vst.msk [vmem:[#allocation4 + $0x38] sm:$0xf] %vm1778_vm10, %v3925_v4 }
 0x5f0   :  { %4047 = vst.msk [vmem:[#allocation4 + $0x38] sm:$0xf] %vm1871_vm2, %v4016_v28 }
 0x5f1   :  { %3685 = vst.msk [vmem:[#allocation4 + $0x48] sm:$0xf] %vm1499_vm7, %v3656_v49 }
 0x5f5   :  { %v3654_v29 = vpop.permute.xlu1 %3653 }
 0x5f6   :  { %v4105_v40 = vpop.permute.xlu0 %4104  ;;  %3684 = vst.msk [vmem:[#allocation4 + $0x40] sm:$0xf] %vm1499_vm7, %v3654_v29 }
 0x5f7   :  { %4137 = vst.msk [vmem:[#allocation4 + $0x30] sm:$0xf] %vm1964_vm1, %v4105_v40  ;;  %v3929_v0 = vpop.permute.xlu2 %3928 }
 0x5f8   :  { %4228 = vst.msk [vmem:[#allocation4 + $0x30] sm:$0xf] %vm2057_vm0, %v4196_v1 }
 0x5f9   :  { %3775 = vst.msk [vmem:[#allocation4 + $0x40] sm:$0xf] %vm1592_vm8, %v3745_v14 }
 0x5fd   :  { %v4107_v35 = vpop.permute.xlu1 %4106 }
 0x5fe   :  { %v3836_v63 = vpop.permute.xlu0 %3835  ;;  %4138 = vst.msk [vmem:[#allocation4 + $0x38] sm:$0xf] %vm1964_vm1, %v4107_v35  ;;  %v4501_v35 = vpop.f32.mrf.mxu3 }
 0x5ff   :  { %3866 = vst.msk [vmem:[#allocation4 + $0x40] sm:$0xf] %vm1685_vm9, %v3836_v63  ;;  %v4109_v27 = vpop.permute.xlu2 %4108  ;;  %v6127_v3 = vld [vmem:[#allocation4 + $0x30] sm:$0xf] }
 0x605   :  { %v3927_v6 = vpop.permute.xlu1 %3926 }
 0x606   :  { %v4198_v53 = vpop.permute.xlu0 %4197  ;;  %3957 = vst.msk [vmem:[#allocation4 + $0x40] sm:$0xf] %vm1778_vm10, %v3927_v6 }
 0x607   :  { %4229 = vst.msk [vmem:[#allocation4 + $0x38] sm:$0xf] %vm2057_vm0, %v4198_v53  ;;  %v3840_v34 = vpop.permute.xlu2 %3839 }
 0x60d   :  { %v3838_v47 = vpop.permute.xlu1 %3837 }
 0x60e   :  { %v3747_v30 = vpop.permute.xlu0 %3746  ;;  %v6389_v26 = vld [vmem:[#allocation4 + $0x34] sm:$0xf0] }
 0x60f   :  { %3776 = vst.msk [vmem:[#allocation4 + $0x48] sm:$0xf] %vm1592_vm8, %v3747_v30  ;;  %v4202_v39 = vpop.permute.xlu2 %4201  ;;  %v6128_v13 = vor.u32 %v6389_v26, %v6127_v3 }
 0x610   :  { %3867 = vst.msk [vmem:[#allocation4 + $0x48] sm:$0xf] %vm1685_vm9, %v3838_v47 }
 0x611   :  { %3958 = vst.msk [vmem:[#allocation4 + $0x48] sm:$0xf] %vm1778_vm10, %v3929_v0  ;;  %4467 = vmatmul.bf16.gmra.mxu1 %v6128_v13 }
 0x615   :  { %v4200_v7 = vpop.permute.xlu1 %4199 }
 0x616   :  { %v4018_v33 = vpop.permute.xlu0 %4017  ;;  %v4453_v22 = vpop.f32.mrf.mxu1 }
 0x617   :  { %4048 = vst.msk [vmem:[#allocation4 + $0x40] sm:$0xf] %vm1871_vm2, %v4018_v33  ;;  %v3662_v41 = vpop.permute.xlu2 %3661  ;;  %v4454_v12 = vadd.f32 %v8104_v61, %v4453_v22  ;;  %v4503_v33 = vpop.f32.mrf.mxu3 }
 0x618   :  { %4139 = vst.msk [vmem:[#allocation4 + $0x40] sm:$0xf] %vm1964_vm1, %v4109_v27 }
 0x619   :  { %3688 = vst.msk [vmem:[#allocation4 + $0x60] sm:$0x1] %vm1512_vm11, %v3662_v41  ;;  %v4497_v18 = vadd.f32 %v4496_v42, %v4454_v12 }
 0x61a   :  { %4230 = vst.msk [vmem:[#allocation4 + $0x40] sm:$0xf] %vm2057_vm0, %v4200_v7 }
 0x61b   :  { %v4530_v15 = vmax.f32 %v4497_v18, 0.0 }
 0x61d   :  { %v4621_v60 = vmul.f32 %v7214_v55, %v4530_v15 }
 0x61e   :  { %v3658_v45 = vpop.permute.xlu0 %3657  ;;  %v3749_v52 = vpop.permute.xlu1 %3748 }
 0x61f   :  { %3686 = vst.msk [vmem:[#allocation4 + $0x50] sm:$0xf] %vm1499_vm7, %v3658_v45  ;;  %v4455_v9 = vpop.f32.mrf.mxu1  ;;  %v3751_v43 = vpop.permute.xlu2 %3750 }
 0x620   :  { %4634 = vst.msk [vmem:[#allocation3 + $0x8] sm:$0xff] %vm910_vm3, %v4621_v60  ;;  %v4456_v25 = vadd.f32 %v8104_v61, %v4455_v9 }
 0x621   :  { %3777 = vst.msk [vmem:[#allocation4 + $0x50] sm:$0xf] %vm1592_vm8, %v3749_v52  ;;  %v6135_v28 = vld [vmem:[#allocation4 + $0x40] sm:$0xf] }
 0x622   :  { %3868 = vst.msk [vmem:[#allocation4 + $0x50] sm:$0xf] %vm1685_vm9, %v3840_v34  ;;  %v4499_v21 = vadd.f32 %v4498_v31, %v4456_v25 }
 0x624   :  { %v4531_v2 = vmax.f32 %v4499_v21, 0.0 }
 0x626   :  { %v4622_v23 = vmul.f32 %v7239_v37, %v4531_v2  ;;  %v4111_v55 = vpop.permute.xlu0 %4110  ;;  %v4020_v58 = vpop.permute.xlu1 %4019 }
 0x627   :  { %4049 = vst.msk [vmem:[#allocation4 + $0x48] sm:$0xf] %vm1871_vm2, %v4020_v58  ;;  %v4868_v20 = vld [vmem:[#allocation3 + $0x7] sm:$0xff]  ;;  %v4022_v56 = vpop.permute.xlu2 %4021 }
 0x628   :  { %v4686_v24 = vld [vmem:[#allocation3 + $0x1] sm:$0xff]  ;;  %4635 = vst.msk [vmem:[#allocation3 + $0x10] sm:$0xff] %vm910_vm3, %v4622_v23  ;;  %v4881_v36 = vpack.c.bf16 %v4868_v20, %v4868_v20 }
 0x629   :  { %v4777_v1 = vld [vmem:[#allocation3 + $0x2] sm:$0xff]  ;;  %v4699_v57 = vpack.c.bf16 %v4686_v24, %v4686_v24  ;;  %4140 = vst.msk [vmem:[#allocation4 + $0x48] sm:$0xf] %vm1964_vm1, %v4111_v55 }
 0x62a   :  { %v4790_v46 = vpack.c.bf16 %v4777_v1, %v4777_v1  ;;  %v4959_v8 = vld [vmem:[#allocation3 + $0x8] sm:$0xff]  ;;  %4231 = vst.msk [vmem:[#allocation4 + $0x48] sm:$0xf] %vm2057_vm0, %v4202_v39  ;;  %4907 = vrot.lane.b32.xlu0 %v4881_v36, %s6454_s2 }
 0x62b   :  { %v4972_v50 = vpack.c.bf16 %v4959_v8, %v4959_v8  ;;  %4725 = vrot.lane.b32.xlu2 %v4699_v57, %s6456_s14  ;;  %v6423_v24 = vld [vmem:[%s8506_s10 + $0x40] sm:$0xff] }
 0x62c   :  { %4816 = vrot.lane.b32.xlu1 %v4790_v46, %s6455_s13  ;;  %5582 = vmatpush.bf16.msrb.mxu1 %v6423_v24  ;;  %v8530_v24 = vld [vmem:[#allocation6_spill] sm:$0xff] }
 0x62d   :  { %4674 = vst.msk [vmem:[#allocation4 + $0x8] sm:$0xf] %vm1406_vm5, %v4972_v50 }
 0x62e   :  { %v3931_v37 = vpop.permute.xlu0 %3930  ;;  %v3660_v19 = vpop.permute.xlu1 %3659 }
 0x62f   :  { %3959 = vst.msk [vmem:[#allocation4 + $0x50] sm:$0xf] %vm1778_vm10, %v3931_v37  ;;  %v4687_v5 = vld [vmem:[#allocation3 + $0x9] sm:$0xff]  ;;  %v4115_v63 = vpop.permute.xlu2 %4114 }
 0x630   :  { %v4869_v14 = vld [vmem:[#allocation3 + $0xf] sm:$0xff]  ;;  %4050 = vst.msk [vmem:[#allocation4 + $0x50] sm:$0xf] %vm1871_vm2, %v4022_v56  ;;  %v4700_v62 = vpack.c.bf16 %v4687_v5, %v4687_v5  ;;  %v4506_v5 = vpop.f32.mrf.mxu3 }
 0x631   :  { %v4960_v32 = vld [vmem:[#allocation3 + $0x10] sm:$0xff]  ;;  %v4882_v16 = vpack.c.bf16 %v4869_v14, %v4869_v14  ;;  %3687 = vst.msk [vmem:[#allocation4 + $0x58] sm:$0xf] %vm1499_vm7, %v3660_v19  ;;  %v6391_v38 = vld [vmem:[#allocation4 + $0x44] sm:$0xf0] }
 0x632   :  { %v4973_v17 = vpack.c.bf16 %v4960_v32, %v4960_v32  ;;  %3778 = vst.msk [vmem:[#allocation4 + $0x58] sm:$0xf] %vm1592_vm8, %v3751_v43  ;;  %v6136_v44 = vor.u32 %v6391_v38, %v6135_v28  ;;  %4727 = vrot.lane.b32.xlu0 %v4700_v62, %s6456_s14  ;;  %v4778_v51 = vld [vmem:[#allocation3 + $0xa] sm:$0xff] }
 0x633   :  { %4998 = vrot.lane.b32.xlu2 %v4972_v50, %s6453_s3  ;;  %v4791_v49 = vpack.c.bf16 %v4778_v51, %v4778_v51  ;;  %v5141_v40 = vld [vmem:[#allocation3 + $0xe] sm:$0xff]  ;;  %v4647_v50 = vld [vmem:[#allocation3] sm:$0xff] }
 0x634   :  { %4909 = vrot.lane.b32.xlu1 %v4882_v16, %s6454_s2  ;;  %5349 = vst.msk [vmem:[#allocation4 + $0x4] sm:$0xf] %vm1406_vm5, %v4973_v17  ;;  %4472 = vmatmul.bf16.gmra.mxu1 %v6136_v44  ;;  %v5154_v53 = vpack.c.bf16 %v5141_v40, %v5141_v40  ;;  %v4660_v37 = vpack.c.bf16 %v4647_v50, %v4647_v50  ;;  %v8528_v44 = vld [vmem:[#allocation7_spill] sm:$0xff] }
 0x635   :  { %4675 = vst.msk [vmem:[#allocation4 + $0x10] sm:$0xf] %vm1406_vm5, %v4973_v17 }
 0x636   :  { %v3753_v48 = vpop.permute.xlu0 %3752  ;;  %v3933_v4 = vpop.permute.xlu1 %3932  ;;  %4673 = vst.msk [vmem:[#allocation4] sm:$0xf] %vm1406_vm5, %v4660_v37  ;;  %v6421_v37 = vld [vmem:[%s8506_s10 + $0x30] sm:$0xff] }
 0x637   :  { %3779 = vst.msk [vmem:[#allocation4 + $0x60] sm:$0x1] %vm8524_vm12, %v3753_v48  ;;  %v3935_v13 = vpop.permute.xlu2 %3934  ;;  %vm8526_vm12 = vcmask 910080  }
 0x638   :  { %v4508_v40 = vpop.f32.mrf.mxu3 }
 0x63a   :  { %5000 = vrot.lane.b32.xlu0 %v4973_v17, %s6453_s3 }
 0x63b   :  { %4818 = vrot.lane.b32.xlu2 %v4791_v49, %s6455_s13 }
 0x63c   :  { %5089 = vrot.lane.b32.xlu1 %v4700_v62, %s6457_s1 }
 0x63e   :  { %v3842_v29 = vpop.permute.xlu0 %3841  ;;  %v4113_v0 = vpop.permute.xlu1 %4112 }
 0x63f   :  { %3869 = vst.msk [vmem:[#allocation4 + $0x58] sm:$0xf] %vm1685_vm9, %v3842_v29  ;;  %v4458_v27 = vpop.f32.mrf.mxu1 }
 0x640   :  { %3960 = vst.msk [vmem:[#allocation4 + $0x58] sm:$0xf] %vm1778_vm10, %v3933_v4  ;;  %v4459_v6 = vadd.f32 %v8104_v61, %v4458_v27 }
 0x641   :  { %4141 = vst.msk [vmem:[#allocation4 + $0x50] sm:$0xf] %vm1964_vm1, %v4113_v0 }
 0x642   :  { %5180 = vrot.lane.b32.xlu0 %v5154_v53, %s6451_s27  ;;  %v4502_v34 = vadd.f32 %v4501_v35, %v4459_v6 }
 0x643   :  { %5271 = vrot.lane.b32.xlu2 %v4882_v16, %s6452_s28 }
 0x644   :  { %v4532_v30 = vmax.f32 %v4502_v34, 0.0 }
 0x646   :  { %v4204_v47 = vpop.permute.xlu0 %4203  ;;  %v3844_v3 = vpop.permute.xlu1 %3843  ;;  %v4623_v26 = vmul.f32 %v7226_v11, %v4532_v30 }
 0x647   :  { %4232 = vst.msk [vmem:[#allocation4 + $0x50] sm:$0xf] %vm2057_vm0, %v4204_v47  ;;  %v4460_v39 = vpop.f32.mrf.mxu1 }
 0x648   :  { %3870 = vst.msk [vmem:[#allocation4 + $0x60] sm:$0x1] %vm8525_vm13, %v3844_v3  ;;  %v4461_v42 = vadd.f32 %v8104_v61, %v4460_v39  ;;  %vm8527_vm13 = vcmask 1041280  }
 0x649   :  { %4636 = vst.msk [vmem:[#allocation3 + $0x18] sm:$0xff] %vm910_vm3, %v4623_v26  ;;  %v6403_v26 = vld [vmem:[#allocation4 + $0x4] sm:$0xf] }
 0x64a   :  { %3961 = vst.msk [vmem:[#allocation4 + $0x60] sm:$0x1] %vm1791_vm14, %v3935_v13  ;;  %v4504_v7 = vadd.f32 %v4503_v33, %v4461_v42 }
 0x64c   :  { %v4533_v41 = vmax.f32 %v4504_v7, 0.0 }
 0x64e   :  { %v4024_v22 = vpop.permute.xlu0 %4023  ;;  %v4624_v12 = vmul.f32 %v7237_v10, %v4533_v41  ;;  %v4206_v60 = vpop.permute.xlu1 %4205  ;;  %v6143_v23 = vld [vmem:[#allocation4 + $0x50] sm:$0xf] }
 0x64f   :  { %4051 = vst.msk [vmem:[#allocation4 + $0x58] sm:$0xf] %vm1871_vm2, %v4024_v22 }
 0x650   :  { %4142 = vst.msk [vmem:[#allocation4 + $0x58] sm:$0xf] %vm1964_vm1, %v4115_v63  ;;  %v5233_v11 = vld [vmem:[#allocation3 + $0x17] sm:$0xff]  ;;  %v8529_v63 = vld [vmem:[#allocation5_spill] sm:$0xff] }
 0x651   :  { %v5051_v18 = vld [vmem:[#allocation3 + $0x11] sm:$0xff]  ;;  %4637 = vst.msk [vmem:[#allocation3 + $0x20] sm:$0xff] %vm910_vm3, %v4624_v12  ;;  %v5246_v45 = vpack.c.bf16 %v5233_v11, %v5233_v11 }
 0x652   :  { %v5142_v15 = vld [vmem:[#allocation3 + $0x16] sm:$0xff]  ;;  %v5064_v52 = vpack.c.bf16 %v5051_v18, %v5051_v18  ;;  %4233 = vst.msk [vmem:[#allocation4 + $0x58] sm:$0xf] %vm2057_vm0, %v4206_v60 }
 0x653   :  { %v5155_v9 = vpack.c.bf16 %v5142_v15, %v5142_v15  ;;  %v4961_v25 = vld [vmem:[#allocation3 + $0x18] sm:$0xff]  ;;  %5273 = vrot.lane.b32.xlu0 %v5246_v45, %s6452_s28 }
 0x654   :  { %v4974_v31 = vpack.c.bf16 %v4961_v25, %v4961_v25  ;;  %5091 = vrot.lane.b32.xlu2 %v5064_v52, %s6457_s1  ;;  %v4779_v21 = vld [vmem:[#allocation3 + $0x12] sm:$0xff] }
 0x655   :  { %5182 = vrot.lane.b32.xlu1 %v5155_v9, %s6451_s27  ;;  %v4792_v43 = vpack.c.bf16 %v4779_v21, %v4779_v21 }
 0x656   :  { %5350 = vst.msk [vmem:[#allocation4 + $0xc] sm:$0xf] %vm1406_vm5, %v4974_v31  ;;  %v4026_v10 = vpop.permute.xlu0 %4025 }
 0x657   :  { %4676 = vst.msk [vmem:[#allocation4 + $0x18] sm:$0xf] %vm1406_vm5, %v4974_v31 }
 0x658   :  { %4052 = vst.msk [vmem:[#allocation4 + $0x60] sm:$0x1] %vm1884_vm15, %v4026_v10  ;;  %v4962_v2 = vld [vmem:[#allocation3 + $0x20] sm:$0xff] }
 0x659   :  { %4143 = vst.msk [vmem:[#allocation4 + $0x60] sm:$0x1] %vm8526_vm12, %v7220_v59  ;;  %v6393_v55 = vld [vmem:[#allocation4 + $0x54] sm:$0xf0]  ;;  %v4975_v58 = vpack.c.bf16 %v4962_v2, %v4962_v2  ;;  %v4689_v59 = vld [vmem:[#allocation3 + $0x19] sm:$0xff] }
 0x65a   :  { %4234 = vst.msk [vmem:[#allocation4 + $0x60] sm:$0x1] %vm8527_vm13, %v7206_v54  ;;  %v6144_v20 = vor.u32 %v6393_v55, %v6143_v23  ;;  %v4871_v54 = vld [vmem:[#allocation3 + $0x1f] sm:$0xff]  ;;  %v4702_v57 = vpack.c.bf16 %v4689_v59, %v4689_v59 }
 0x65b   :  { %4820 = vrot.lane.b32.xlu0 %v4792_v43, %s6455_s13  ;;  %5351 = vst.msk [vmem:[#allocation4 + $0x14] sm:$0xf] %vm1406_vm5, %v4975_v58  ;;  %v4884_v36 = vpack.c.bf16 %v4871_v54, %v4871_v54  ;;  %v4780_v56 = vld [vmem:[#allocation3 + $0x1a] sm:$0xff] }
 0x65c   :  { %4911 = vrot.lane.b32.xlu2 %v5246_v45, %s6454_s2  ;;  %4477 = vmatmul.bf16.gmra.mxu1 %v6144_v20  ;;  %4677 = vst.msk [vmem:[#allocation4 + $0x20] sm:$0xf] %vm1406_vm5, %v4975_v58  ;;  %v4793_v62 = vpack.c.bf16 %v4780_v56, %v4780_v56  ;;  %v5143_v38 = vld [vmem:[#allocation3 + $0x1e] sm:$0xff]  ;;  %v8531_v56 = vld [vmem:[#allocation10_spill] sm:$0xff] }
 0x65d   :  { %4729 = vrot.lane.b32.xlu1 %v5064_v52, %s6456_s14  ;;  %v5156_v49 = vpack.c.bf16 %v5143_v38, %v5143_v38  ;;  %v6196_v27 = vld [vmem:[#allocation4 + $0x8] sm:$0xf0]  ;;  %v4511_v52 = vpop.f32.mrf.mxu3 }
 0x65e   :  { %v6199_v13 = vor.u32 %v6403_v26, %v6196_v27 }
 0x661   :  { %v4286_v1 = vld [vmem:[#allocation4 + $0x60] sm:$0x11] }
 0x662   :  { %v4347_v46 = vunpack.c.h.b16 %v4286_v1  ;;  %v4346_v19 = vunpack.c.l.b16 %v4286_v1  ;;  %v6405_v15 = vld [vmem:[#allocation4 + $0x14] sm:$0xf] }
 0x663   :  { %4913 = vrot.lane.b32.xlu0 %v4884_v36, %s6454_s2 }
 0x664   :  { %4731 = vrot.lane.b32.xlu2 %v4702_v57, %s6456_s14  ;;  %v4361_v8 = vpack.c.b16 %v4347_v46, %v4347_v46  ;;  %v4360_v16 = vpack.c.b16 %v4346_v19, %v4346_v19  ;;  %v6422_v46 = vld [vmem:[%s8506_s10 + $0x38] sm:$0xff] }
 0x665   :  { %5002 = vrot.lane.b32.xlu1 %v4974_v31, %s6453_s3  ;;  %5532 = vmatpush.bf16.msrb.mxu2 %v6422_v46 }
 0x666   :  { %6191 = vmatmul.msk.bf16.gmra.mxu3 %vm910_vm3, %v4361_v8 }
 0x668   :  { %v4463_v14 = vpop.f32.mrf.mxu1 }
 0x669   :  { %v4464_v32 = vadd.f32 %v8104_v61, %v4463_v14  ;;  %5533 = vmatpush.bf16.msrb.mxu2 %v6421_v37 }
 0x66b   :  { %v4507_v17 = vadd.f32 %v4506_v5, %v4464_v32  ;;  %5093 = vrot.lane.b32.xlu0 %v4702_v57, %s6457_s1 }
 0x66c   :  { %5004 = vrot.lane.b32.xlu2 %v4975_v58, %s6453_s3  ;;  %4482 = vmatmul.bf16.gmra.mxu1 %v4360_v16 }
 0x66d   :  { %4822 = vrot.lane.b32.xlu1 %v4793_v62, %s6455_s13  ;;  %v4534_v28 = vmax.f32 %v4507_v17, 0.0 }
 0x66f   :  { %v4625_v51 = vmul.f32 %v8528_v44, %v4534_v28 }
 0x670   :  { %v4465_v48 = vpop.f32.mrf.mxu1 }
 0x671   :  { %4638 = vst.msk [vmem:[#allocation3 + $0x28] sm:$0xff] %vm910_vm3, %v4625_v51  ;;  %v4466_v4 = vadd.f32 %v8104_v61, %v4465_v48  ;;  %v6420_v51 = vld [vmem:[%s8506_s10 + $0x28] sm:$0xff] }
 0x672   :  { %5534 = vmatpush.bf16.msrb.mxu2 %v6420_v51 }
 0x673   :  { %v4509_v29 = vadd.f32 %v4508_v40, %v4466_v4  ;;  %v6419_v4 = vld [vmem:[%s8506_s10 + $0x20] sm:$0xff] }
 0x674   :  { %5184 = vrot.lane.b32.xlu2 %v5156_v49, %s6451_s27 }
 0x675   :  { %5275 = vrot.lane.b32.xlu1 %v4884_v36, %s6452_s28  ;;  %v4535_v0 = vmax.f32 %v4509_v29, 0.0  ;;  %v4513_v36 = vpop.f32.mrf.mxu3 }
 0x676   :  { %5535 = vmatpush.bf16.msrb.mxu2 %v6419_v4 }
 0x677   :  { %v4626_v35 = vmul.f32 %v8529_v63, %v4535_v0 }
 0x678   :  { %v5144_v53 = vld [vmem:[#allocation3 + $0x26] sm:$0xff] }
 0x679   :  { %v5235_v6 = vld [vmem:[#allocation3 + $0x27] sm:$0xff]  ;;  %4639 = vst.msk [vmem:[#allocation3 + $0x30] sm:$0xff] %vm910_vm3, %v4626_v35  ;;  %v5157_v30 = vpack.c.bf16 %v5144_v53, %v5144_v53 }
 0x67a   :  { %v5053_v34 = vld [vmem:[#allocation3 + $0x21] sm:$0xff]  ;;  %v5248_v47 = vpack.c.bf16 %v5235_v6, %v5235_v6 }
 0x67b   :  { %v5066_v3 = vpack.c.bf16 %v5053_v34, %v5053_v34  ;;  %v4963_v39 = vld [vmem:[#allocation3 + $0x28] sm:$0xff]  ;;  %5186 = vrot.lane.b32.xlu0 %v5157_v30, %s6451_s27  ;;  %v6418_v53 = vld [vmem:[%s8506_s10 + $0x18] sm:$0xff] }
 0x67c   :  { %v4976_v42 = vpack.c.bf16 %v4963_v39, %v4963_v39  ;;  %5277 = vrot.lane.b32.xlu2 %v5248_v47, %s6452_s28  ;;  %6276 = vmatmul.msk.bf16.vlgmr.msrb.gmra.mxu1 %vm910_vm3, %v6199_v13  ;;  %v4781_v12 = vld [vmem:[#allocation3 + $0x22] sm:$0xff] }
 0x67d   :  { %5095 = vrot.lane.b32.xlu1 %v5066_v3, %s6457_s1  ;;  %v4794_v60 = vpack.c.bf16 %v4781_v12, %v4781_v12  ;;  %5536 = vmatpush.bf16.msrb.mxu2 %v6418_v53 }
 0x67e   :  { %5352 = vst.msk [vmem:[#allocation4 + $0x1c] sm:$0xf] %vm1406_vm5, %v4976_v42 }
 0x67f   :  { %4678 = vst.msk [vmem:[#allocation4 + $0x28] sm:$0xf] %vm1406_vm5, %v4976_v42 }
 0x680   :  { %v4964_v33 = vld [vmem:[#allocation3 + $0x30] sm:$0xff] }
 0x681   :  { %v4977_v7 = vpack.c.bf16 %v4964_v33, %v4964_v33  ;;  %v4691_v22 = vld [vmem:[#allocation3 + $0x29] sm:$0xff] }
 0x682   :  { %v4704_v18 = vpack.c.bf16 %v4691_v22, %v4691_v22  ;;  %v5145_v25 = vld [vmem:[#allocation3 + $0x2e] sm:$0xff] }
 0x683   :  { %4915 = vrot.lane.b32.xlu0 %v5248_v47, %s6454_s2  ;;  %5353 = vst.msk [vmem:[#allocation4 + $0x24] sm:$0xf] %vm1406_vm5, %v4977_v7  ;;  %v4782_v31 = vld [vmem:[#allocation3 + $0x2a] sm:$0xff]  ;;  %v5158_v23 = vpack.c.bf16 %v5145_v25, %v5145_v25  ;;  %v6417_v47 = vld [vmem:[%s8506_s10 + $0x10] sm:$0xff] }
 0x684   :  { %5006 = vrot.lane.b32.xlu2 %v4976_v42, %s6453_s3  ;;  %4679 = vst.msk [vmem:[#allocation4 + $0x30] sm:$0xf] %vm1406_vm5, %v4977_v7  ;;  %v4873_v21 = vld [vmem:[#allocation3 + $0x2f] sm:$0xff]  ;;  %v4795_v55 = vpack.c.bf16 %v4782_v31, %v4782_v31  ;;  %5537 = vmatpush.bf16.msrb.mxu2 %v6417_v47  ;;  %v8532_v25 = vld [vmem:[#allocation8_spill] sm:$0xff] }
 0x685   :  { %4733 = vrot.lane.b32.xlu1 %v5066_v3, %s6456_s14  ;;  %v4726_v41 = vpop.permute.xlu2 %4725  ;;  %v6204_v11 = vld [vmem:[#allocation4 + $0x18] sm:$0xf0]  ;;  %v4886_v58 = vpack.c.bf16 %v4873_v21, %v4873_v21 }
 0x686   :  { %4764 = vst.msk [vmem:[#allocation4] sm:$0xf] %vm1499_vm7, %v4726_v41  ;;  %v6207_v45 = vor.u32 %v6405_v15, %v6204_v11  ;;  %v4516_v41 = vpop.f32.mrf.mxu3 }
 0x68a   :  { %v6407_v6 = vld [vmem:[#allocation4 + $0x24] sm:$0xf] }
 0x68b   :  { %5008 = vrot.lane.b32.xlu0 %v4977_v7, %s6453_s3  ;;  %v6416_v7 = vld [vmem:[%s8506_s10 + $0x8] sm:$0xff] }
 0x68c   :  { %4735 = vrot.lane.b32.xlu2 %v4704_v18, %s6456_s14  ;;  %6277 = vmatmul.msk.bf16.gmra.mxu1 %vm910_vm3, %v6207_v45 }
 0x68d   :  { %4824 = vrot.lane.b32.xlu1 %v4794_v60, %s6455_s13  ;;  %v4999_v2 = vpop.permute.xlu2 %4998  ;;  %5538 = vmatpush.bf16.msrb.mxu2 %v6416_v7 }
 0x68e   :  { %v4468_v9 = vpop.f32.mrf.mxu1 }
 0x68f   :  { %v4469_v10 = vadd.f32 %v8104_v61, %v4468_v9 }
 0x691   :  { %v4512_v43 = vadd.f32 %v4511_v52, %v4469_v10 }
 0x693   :  { %v4536_v20 = vmax.f32 %v4512_v43, 0.0  ;;  %5188 = vrot.lane.b32.xlu0 %v5158_v23, %s6451_s27  ;;  %v4518_v43 = vpop.f32.mrf.mxu3 }
 0x694   :  { %4826 = vrot.lane.b32.xlu2 %v4795_v55, %s6455_s13 }
 0x695   :  { %4917 = vrot.lane.b32.xlu1 %v4886_v58, %s6454_s2  ;;  %v4627_v54 = vmul.f32 %v8530_v24, %v4536_v20  ;;  %v4819_v8 = vpop.permute.xlu2 %4818  ;;  %v8533_v24 = vld [vmem:[#allocation9_spill] sm:$0xff] }
 0x696   :  { %v4470_v59 = vpop.f32.mrf.mxu1 }
 0x697   :  { %4640 = vst.msk [vmem:[#allocation3 + $0x38] sm:$0xff] %vm910_vm3, %v4627_v54  ;;  %v4471_v1 = vadd.f32 %v8104_v61, %v4470_v59 }
 0x699   :  { %v4514_v57 = vadd.f32 %v4513_v36, %v4471_v1 }
 0x69b   :  { %v4537_v50 = vmax.f32 %v4514_v57, 0.0 }
 0x69c   :  { %5279 = vrot.lane.b32.xlu2 %v4886_v58, %s6452_s28  ;;  %v4908_v19 = vpop.permute.xlu0 %4907 }
 0x69d   :  { %5097 = vrot.lane.b32.xlu1 %v4704_v18, %s6457_s1  ;;  %v4628_v5 = vmul.f32 %v8531_v56, %v4537_v50  ;;  %v5272_v29 = vpop.permute.xlu2 %5271  ;;  %v6415_v18 = vld [vmem:[%s8506_s10] sm:$0xff] }
 0x69e   :  { %v4817_v14 = vpop.permute.xlu1 %4816  ;;  %v5237_v32 = vld [vmem:[#allocation3 + $0x37] sm:$0xff]  ;;  %5539 = vmatpush.bf16.msrb.mxu2 %v6415_v18 }
 0x69f   :  { %4855 = vst.msk [vmem:[#allocation4] sm:$0xf] %vm1592_vm8, %v4817_v14  ;;  %v5055_v62 = vld [vmem:[#allocation3 + $0x31] sm:$0xff]  ;;  %v5250_v16 = vpack.c.bf16 %v5237_v32, %v5237_v32 }
 0x6a0   :  { %4641 = vst.msk [vmem:[#allocation3 + $0x40] sm:$0xff] %vm910_vm3, %v4628_v5  ;;  %v5146_v17 = vld [vmem:[#allocation3 + $0x36] sm:$0xff]  ;;  %v5068_v44 = vpack.c.bf16 %v5055_v62, %v5055_v62 }
 0x6a1   :  { %v5328_v28 = vld [vmem:[#allocation3 + $0x38] sm:$0xff]  ;;  %4946 = vst.msk [vmem:[#allocation4] sm:$0xf] %vm1685_vm9, %v4908_v19  ;;  %5281 = vrot.lane.b32.xlu0 %v5250_v16, %s6452_s28  ;;  %v5159_v48 = vpack.c.bf16 %v5146_v17, %v5146_v17 }
 0x6a2   :  { %v5341_v38 = vpack.c.bf16 %v5328_v28, %v5328_v28  ;;  %5037 = vst.msk [vmem:[#allocation4] sm:$0xf] %vm1778_vm10, %v4999_v2  ;;  %v4783_v40 = vld [vmem:[#allocation3 + $0x32] sm:$0xff] }
 0x6a3   :  { %v4796_v35 = vpack.c.bf16 %v4783_v40, %v4783_v40 }
 0x6a4   :  { %5354 = vst.msk [vmem:[#allocation4 + $0x2c] sm:$0xf] %vm1406_vm5, %v5341_v38  ;;  %5099 = vrot.lane.b32.xlu2 %v5068_v44, %s6457_s1  ;;  %v4728_v49 = vpop.permute.xlu0 %4727 }
 0x6a5   :  { %4680 = vst.msk [vmem:[#allocation4 + $0x38] sm:$0xf] %vm1406_vm5, %v5341_v38  ;;  %5190 = vrot.lane.b32.xlu1 %v5159_v48, %s6451_s27 }
 0x6a6   :  { %4765 = vst.msk [vmem:[#allocation4 + $0x8] sm:$0xf] %vm1499_vm7, %v4728_v49  ;;  %v4910_v0 = vpop.permute.xlu1 %4909 }
 0x6a7   :  { %4856 = vst.msk [vmem:[#allocation4 + $0x8] sm:$0xf] %vm1592_vm8, %v4819_v8  ;;  %v4966_v63 = vld [vmem:[#allocation3 + $0x40] sm:$0xff] }
 0x6a8   :  { %4947 = vst.msk [vmem:[#allocation4 + $0x8] sm:$0xf] %vm1685_vm9, %v4910_v0  ;;  %v4979_v27 = vpack.c.bf16 %v4966_v63, %v4966_v63  ;;  %v4875_v26 = vld [vmem:[#allocation3 + $0x3f] sm:$0xff] }
 0x6a9   :  { %4828 = vrot.lane.b32.xlu0 %v4796_v35, %s6455_s13  ;;  %v4693_v42 = vld [vmem:[#allocation3 + $0x39] sm:$0xff]  ;;  %v4888_v33 = vpack.c.bf16 %v4875_v26, %v4875_v26  ;;  %v4521_v35 = vpop.f32.mrf.mxu3 }
 0x6aa   :  { %5355 = vst.msk [vmem:[#allocation4 + $0x34] sm:$0xf] %vm1406_vm5, %v4979_v27  ;;  %v4706_v12 = vpack.c.bf16 %v4693_v42, %v4693_v42  ;;  %v4784_v9 = vld [vmem:[#allocation3 + $0x3a] sm:$0xff] }
 0x6ab   :  { %v6212_v34 = vld [vmem:[#allocation4 + $0x28] sm:$0xf0]  ;;  %4681 = vst.msk [vmem:[#allocation4 + $0x40] sm:$0xf] %vm1406_vm5, %v4979_v27  ;;  %v4797_v2 = vpack.c.bf16 %v4784_v9, %v4784_v9 }
 0x6ac   :  { %v6215_v30 = vor.u32 %v6407_v6, %v6212_v34  ;;  %4919 = vrot.lane.b32.xlu2 %v5250_v16, %s6454_s2  ;;  %v5001_v3 = vpop.permute.xlu0 %5000  ;;  %v5147_v20 = vld [vmem:[#allocation3 + $0x3e] sm:$0xff] }
 0x6ad   :  { %4737 = vrot.lane.b32.xlu1 %v5068_v44, %s6456_s14  ;;  %5038 = vst.msk [vmem:[#allocation4 + $0x8] sm:$0xf] %vm1778_vm10, %v5001_v3  ;;  %v5160_v59 = vpack.c.bf16 %v5147_v20, %v5147_v20 }
 0x6ae   :  { %6278 = vmatmul.msk.bf16.gmra.mxu1 %vm910_vm3, %v6215_v30  ;;  %v5092_v39 = vpop.permute.xlu2 %5091  ;;  %v5090_v13 = vpop.permute.xlu1 %5089 }
 0x6af   :  { %5129 = vst.msk [vmem:[#allocation4 + $0x8] sm:$0xf] %vm1871_vm2, %v5092_v39 }
 0x6b0   :  { %5128 = vst.msk [vmem:[#allocation4] sm:$0xf] %vm1871_vm2, %v5090_v13 }
 0x6b1   :  { %v4473_v22 = vpop.f32.mrf.mxu1  ;;  %4921 = vrot.lane.b32.xlu0 %v4888_v33, %s6454_s2  ;;  %v6409_v16 = vld [vmem:[#allocation4 + $0x34] sm:$0xf] }
 0x6b2   :  { %v4474_v11 = vadd.f32 %v8104_v61, %v4473_v22  ;;  %v4523_v22 = vpop.f32.mrf.mxu3 }
 0x6b4   :  { %4739 = vrot.lane.b32.xlu2 %v4706_v12, %s6456_s14  ;;  %v4517_v15 = vadd.f32 %v4516_v41, %v4474_v11  ;;  %v5181_v60 = vpop.permute.xlu0 %5180 }
 0x6b5   :  { %5010 = vrot.lane.b32.xlu1 %v5341_v38, %s6453_s3  ;;  %5219 = vst.msk [vmem:[#allocation4] sm:$0xf] %vm1964_vm1, %v5181_v60 }
 0x6b6   :  { %v4912_v45 = vpop.permute.xlu2 %4911  ;;  %v4538_v52 = vmax.f32 %v4517_v15, 0.0  ;;  %5310 = vst.msk [vmem:[#allocation4] sm:$0xf] %vm2057_vm0, %v5272_v29 }
 0x6b8   :  { %v4629_v31 = vmul.f32 %v8532_v25, %v4538_v52 }
 0x6b9   :  { %v4475_v10 = vpop.f32.mrf.mxu1  ;;  %5101 = vrot.lane.b32.xlu0 %v4706_v12, %s6457_s1  ;;  %v8534_v12 = vld [vmem:[#allocation12_spill] sm:$0xff] }
 0x6ba   :  { %4642 = vst.msk [vmem:[#allocation3 + $0x48] sm:$0xff] %vm910_vm3, %v4629_v31  ;;  %v4476_v21 = vadd.f32 %v8104_v61, %v4475_v10  ;;  %v8535_v31 = vld [vmem:[#allocation11_spill] sm:$0xff] }
 0x6bc   :  { %5012 = vrot.lane.b32.xlu2 %v4979_v27, %s6453_s3  ;;  %v4519_v23 = vadd.f32 %v4518_v43, %v4476_v21 }
 0x6bd   :  { %4830 = vrot.lane.b32.xlu1 %v4797_v2, %s6455_s13  ;;  %v6194_v4 = vld [vmem:[#allocation4] sm:$0xf] }
 0x6be   :  { %v4732_v55 = vpop.permute.xlu2 %4731  ;;  %v4539_v58 = vmax.f32 %v4519_v23, 0.0 }
 0x6bf   :  { %4767 = vst.msk [vmem:[#allocation4 + $0x18] sm:$0xf] %vm1499_vm7, %v4732_v55 }
 0x6c0   :  { %v4630_v54 = vmul.f32 %v8533_v24, %v4539_v58 }
 0x6c1   :  { %v5148_v1 = vld [vmem:[#allocation3 + $0x46] sm:$0xff] }
 0x6c2   :  { %4643 = vst.msk [vmem:[#allocation3 + $0x50] sm:$0xff] %vm910_vm3, %v4630_v54  ;;  %v5161_v36 = vpack.c.bf16 %v5148_v1, %v5148_v1  ;;  %v5330_v57 = vld [vmem:[#allocation3 + $0x48] sm:$0xff] }
 0x6c3   :  { %v5343_v46 = vpack.c.bf16 %v5330_v57, %v5330_v57  ;;  %v5239_v19 = vld [vmem:[#allocation3 + $0x47] sm:$0xff] }
 0x6c4   :  { %5192 = vrot.lane.b32.xlu2 %v5160_v59, %s6451_s27  ;;  %5194 = vrot.lane.b32.xlu0 %v5161_v36, %s6451_s27  ;;  %v5057_v56 = vld [vmem:[#allocation3 + $0x41] sm:$0xff]  ;;  %v5252_v5 = vpack.c.bf16 %v5239_v19, %v5239_v19 }
 0x6c5   :  { %5283 = vrot.lane.b32.xlu1 %v4888_v33, %s6452_s28  ;;  %v5274_v8 = vpop.permute.xlu0 %5273  ;;  %5356 = vst.msk [vmem:[#allocation4 + $0x3c] sm:$0xf] %vm1406_vm5, %v5343_v46  ;;  %v5070_v14 = vpack.c.bf16 %v5057_v56, %v5057_v56  ;;  %v4785_v48 = vld [vmem:[#allocation3 + $0x42] sm:$0xff] }
 0x6c6   :  { %v8279_v50 = vpop.permute.xlu2 %5004  ;;  %4682 = vst.msk [vmem:[#allocation4 + $0x48] sm:$0xf] %vm1406_vm5, %v5343_v46  ;;  %v4798_v29 = vpack.c.bf16 %v4785_v48, %v4785_v48 }
 0x6c7   :  { %v5183_v37 = vpop.permute.xlu1 %5182 }
 0x6c8   :  { %5220 = vst.msk [vmem:[#allocation4 + $0x8] sm:$0xf] %vm1964_vm1, %v5183_v37 }
 0x6c9   :  { %5311 = vst.msk [vmem:[#allocation4 + $0x8] sm:$0xf] %vm2057_vm0, %v5274_v8  ;;  %v4968_v32 = vld [vmem:[#allocation3 + $0x50] sm:$0xff] }
 0x6ca   :  { %v4981_v62 = vpack.c.bf16 %v4968_v32, %v4968_v32  ;;  %v4877_v53 = vld [vmem:[#allocation3 + $0x4f] sm:$0xff] }
 0x6cb   :  { %v4695_v6 = vld [vmem:[#allocation3 + $0x49] sm:$0xff]  ;;  %v4890_v47 = vpack.c.bf16 %v4877_v53, %v4877_v53 }
 0x6cc   :  { %5285 = vrot.lane.b32.xlu2 %v5252_v5, %s6452_s28  ;;  %4741 = vrot.lane.b32.xlu0 %v5070_v14, %s6456_s14  ;;  %v6220_v17 = vld [vmem:[#allocation4 + $0x38] sm:$0xf0]  ;;  %5357 = vst.msk [vmem:[#allocation4 + $0x44] sm:$0xf] %vm1406_vm5, %v4981_v62  ;;  %v4786_v34 = vld [vmem:[#allocation3 + $0x4a] sm:$0xff]  ;;  %v4708_v26 = vpack.c.bf16 %v4695_v6, %v4695_v6 }
 0x6cd   :  { %5103 = vrot.lane.b32.xlu1 %v5070_v14, %s6457_s1  ;;  %v4821_v28 = vpop.permute.xlu0 %4820  ;;  %v6223_v44 = vor.u32 %v6409_v16, %v6220_v17  ;;  %4683 = vst.msk [vmem:[#allocation4 + $0x50] sm:$0xf] %vm1406_vm5, %v4981_v62  ;;  %v4799_v39 = vpack.c.bf16 %v4786_v34, %v4786_v34  ;;  %v5149_v25 = vld [vmem:[#allocation3 + $0x4e] sm:$0xff] }
 0x6ce   :  { %v5185_v38 = vpop.permute.xlu2 %5184  ;;  %v5162_v20 = vpack.c.bf16 %v5149_v25, %v5149_v25 }
 0x6cf   :  { %v4730_v51 = vpop.permute.xlu1 %4729  ;;  %6279 = vmatmul.msk.bf16.gmra.mxu1 %vm910_vm3, %v6223_v44 }
 0x6d0   :  { %4766 = vst.msk [vmem:[#allocation4 + $0x10] sm:$0xf] %vm1499_vm7, %v4730_v51  ;;  %v6404_v49 = vld [vmem:[#allocation4 + $0x4] sm:$0xf0] }
 0x6d1   :  { %4857 = vst.msk [vmem:[#allocation4 + $0x10] sm:$0xf] %vm1592_vm8, %v4821_v28  ;;  %v6195_v40 = vor.u32 %v6404_v49, %v6194_v4 }
 0x6d2   :  { %4948 = vst.msk [vmem:[#allocation4 + $0x10] sm:$0xf] %vm1685_vm9, %v4912_v45 }
 0x6d3   :  { %5540 = vmatmul.bf16.vlgmr.msrb.gmra.mxu2 %v6195_v40  ;;  %v6411_v16 = vld [vmem:[#allocation4 + $0x44] sm:$0xf] }
 0x6d4   :  { %4832 = vrot.lane.b32.xlu2 %v4798_v29, %s6455_s13  ;;  %5014 = vrot.lane.b32.xlu0 %v5343_v46, %s6453_s3 }
 0x6d5   :  { %4923 = vrot.lane.b32.xlu1 %v5252_v5, %s6454_s2  ;;  %v4914_v0 = vpop.permute.xlu0 %4913 }
 0x6d6   :  { %v8297_v63 = vpop.permute.xlu2 %5277 }
 0x6d7   :  { %v5003_v27 = vpop.permute.xlu1 %5002 }
 0x6d8   :  { %5039 = vst.msk [vmem:[#allocation4 + $0x10] sm:$0xf] %vm1778_vm10, %v5003_v27 }
 0x6d9   :  { %v4478_v30 = vpop.f32.mrf.mxu1 }
 0x6da   :  { %v4479_v3 = vadd.f32 %v8104_v61, %v4478_v30 }
 0x6dc   :  { %4925 = vrot.lane.b32.xlu2 %v4890_v47, %s6454_s2  ;;  %v4522_v13 = vadd.f32 %v4521_v35, %v4479_v3  ;;  %4834 = vrot.lane.b32.xlu0 %v4799_v39, %s6455_s13 }
 0x6dd   :  { %4743 = vrot.lane.b32.xlu1 %v4708_v26, %s6456_s14  ;;  %v5094_v42 = vpop.permute.xlu0 %5093 }
 0x6de   :  { %v8304_v33 = vpop.permute.xlu2 %5006  ;;  %v4540_v7 = vmax.f32 %v4522_v13, 0.0  ;;  %5130 = vst.msk [vmem:[#allocation4 + $0x10] sm:$0xf] %vm1871_vm2, %v5094_v42 }
 0x6df   :  { %v4823_v41 = vpop.permute.xlu1 %4822  ;;  %5221 = vst.msk [vmem:[#allocation4 + $0x10] sm:$0xf] %vm1964_vm1, %v5185_v38 }
 0x6e0   :  { %v4631_v11 = vmul.f32 %v8534_v12, %v4540_v7  ;;  %4858 = vst.msk [vmem:[#allocation4 + $0x18] sm:$0xf] %vm1592_vm8, %v4823_v41 }
 0x6e1   :  { %4949 = vst.msk [vmem:[#allocation4 + $0x18] sm:$0xf] %vm1685_vm9, %v4914_v0  ;;  %v4480_v18 = vpop.f32.mrf.mxu1 }
 0x6e2   :  { %4644 = vst.msk [vmem:[#allocation3 + $0x58] sm:$0xff] %vm910_vm3, %v4631_v11  ;;  %v4481_v15 = vadd.f32 %v8104_v61, %v4480_v18 }
 0x6e3   :  { %5040 = vst.msk [vmem:[#allocation4 + $0x18] sm:$0xf] %vm1778_vm10, %v8279_v50  ;;  %v8536_v50 = vld [vmem:[#allocation13_spill] sm:$0xff] }
 0x6e4   :  { %5105 = vrot.lane.b32.xlu2 %v4708_v26, %s6457_s1  ;;  %v4524_v60 = vadd.f32 %v4523_v22, %v4481_v15  ;;  %5287 = vrot.lane.b32.xlu0 %v4890_v47, %s6452_s28 }
 0x6e5   :  { %5016 = vrot.lane.b32.xlu1 %v4981_v62, %s6453_s3 }
 0x6e6   :  { %v4736_v45 = vpop.permute.xlu2 %4735  ;;  %v4541_v52 = vmax.f32 %v4524_v60, 0.0 }
 0x6e7   :  { %4769 = vst.msk [vmem:[#allocation4 + $0x28] sm:$0xf] %vm1499_vm7, %v4736_v45  ;;  %v5276_v9 = vpop.permute.xlu1 %5275 }
 0x6e8   :  { %5312 = vst.msk [vmem:[#allocation4 + $0x10] sm:$0xf] %vm2057_vm0, %v5276_v9  ;;  %v4632_v10 = vmul.f32 %v8535_v31, %v4541_v52 }
 0x6e9   :  { %v4526_v21 = vpop.f32.mrf.mxu3  ;;  %v4483_v2 = vpop.f32.mrf.mxu1  ;;  %v5150_v43 = vld [vmem:[#allocation3 + $0x56] sm:$0xff] }
 0x6ea   :  { %v5059_v23 = vld [vmem:[#allocation3 + $0x51] sm:$0xff]  ;;  %4645 = vst.msk [vmem:[#allocation3 + $0x60] sm:$0xff] %vm910_vm3, %v4632_v10  ;;  %v4484_v55 = vadd.f32 %v8104_v61, %v4483_v2  ;;  %v5163_v58 = vpack.c.bf16 %v5150_v43, %v5150_v43 }
 0x6eb   :  { %v5072_v24 = vpack.c.bf16 %v5059_v23, %v5059_v23  ;;  %v5332_v54 = vld [vmem:[#allocation3 + $0x58] sm:$0xff] }
 0x6ec   :  { %v5345_v59 = vpack.c.bf16 %v5332_v54, %v5332_v54  ;;  %v4527_v1 = vadd.f32 %v4526_v21, %v4484_v55  ;;  %5198 = vrot.lane.b32.xlu2 %v5163_v58, %s6451_s27  ;;  %v5241_v8 = vld [vmem:[#allocation3 + $0x57] sm:$0xff] }
 0x6ed   :  { %5196 = vrot.lane.b32.xlu1 %v5162_v20, %s6451_s27  ;;  %5107 = vrot.lane.b32.xlu0 %v5072_v24, %s6457_s1  ;;  %v5187_v36 = vpop.permute.xlu0 %5186  ;;  %v5254_v5 = vpack.c.bf16 %v5241_v8, %v5241_v8  ;;  %v4787_v4 = vld [vmem:[#allocation3 + $0x52] sm:$0xff] }
 0x6ee   :  { %v4827_v57 = vpop.permute.xlu2 %4826  ;;  %5358 = vst.msk [vmem:[#allocation4 + $0x4c] sm:$0xf] %vm1406_vm5, %v5345_v59  ;;  %v4542_v46 = vmax.f32 %v4527_v1, 0.0  ;;  %v4800_v35 = vpack.c.bf16 %v4787_v4, %v4787_v4 }
 0x6ef   :  { %4860 = vst.msk [vmem:[#allocation4 + $0x28] sm:$0xf] %vm1592_vm8, %v4827_v57  ;;  %v5096_v61 = vpop.permute.xlu1 %5095  ;;  %v6202_v49 = vld [vmem:[#allocation4 + $0x10] sm:$0xf] }
 0x6f0   :  { %5131 = vst.msk [vmem:[#allocation4 + $0x18] sm:$0xf] %vm1871_vm2, %v5096_v61  ;;  %v4633_v37 = vmul.f32 %v8536_v50, %v4542_v46  ;;  %v5153_v46 = vld [vmem:[#allocation3 + $0x6e] sm:$0x3] }
 0x6f1   :  { %5222 = vst.msk [vmem:[#allocation4 + $0x18] sm:$0xf] %vm1964_vm1, %v5187_v36  ;;  %v4528_v19 = vpop.f32.mrf.mxu3  ;;  %v4485_v56 = vpop.f32.mrf.mxu1  ;;  %v4970_v14 = vld [vmem:[#allocation3 + $0x60] sm:$0xff] }
 0x6f2   :  { %5313 = vst.msk [vmem:[#allocation4 + $0x18] sm:$0xf] %vm2057_vm0, %v8297_v63  ;;  %v4983_v32 = vpack.c.bf16 %v4970_v14, %v4970_v14  ;;  %v4659_v62 = vld [vmem:[#allocation3 + $0x60] sm:$0x3]  ;;  %v4789_v43 = vld [vmem:[#allocation3 + $0x62] sm:$0x3] }
 0x6f3   :  { %4646 = vst.msk [vmem:[#allocation3 + $0x68] sm:$0x3] %vm1021_vm4, %v4633_v37  ;;  %v4672_v28 = vpack.c.bf16 %v4659_v62, %v4659_v62  ;;  %v4697_v29 = vld [vmem:[#allocation3 + $0x59] sm:$0xff]  ;;  %v4698_v45 = vld [vmem:[#allocation3 + $0x61] sm:$0x3]  ;;  %v4802_v58 = vpack.c.bf16 %v4789_v43, %v4789_v43  ;;  %v5166_v37 = vpack.c.bf16 %v5153_v46, %v5153_v46 }
 0x6f4   :  { %4684 = vst.msk [vmem:[#allocation4 + $0x58] sm:$0xf] %vm1406_vm5, %v5345_v59  ;;  %4745 = vrot.lane.b32.xlu2 %v5072_v24, %s6456_s14  ;;  %v4710_v53 = vpack.c.bf16 %v4697_v29, %v4697_v29  ;;  %v4788_v30 = vld [vmem:[#allocation3 + $0x5a] sm:$0xff]  ;;  %v4711_v25 = vpack.c.bf16 %v4698_v45, %v4698_v45 }
 0x6f5   :  { %5289 = vrot.lane.b32.xlu1 %v5254_v5, %s6452_s28  ;;  %v6228_v17 = vld [vmem:[#allocation4 + $0x48] sm:$0xf0]  ;;  %4927 = vrot.lane.b32.xlu0 %v5254_v5, %s6454_s2  ;;  %5359 = vst.msk [vmem:[#allocation4 + $0x54] sm:$0xf] %vm1406_vm5, %v4983_v32  ;;  %v4916_v48 = vpop.permute.xlu0 %4915  ;;  %v4801_v26 = vpack.c.bf16 %v4788_v30, %v4788_v30 }
 0x6f6   :  { %v5280_v38 = vpop.permute.xlu2 %5279  ;;  %v6231_v44 = vor.u32 %v6411_v16, %v6228_v17  ;;  %4685 = vst.msk [vmem:[#allocation4 + $0x60] sm:$0x1] %vm1419_vm6, %v4672_v28  ;;  %v4879_v47 = vld [vmem:[#allocation3 + $0x5f] sm:$0xff] }
 0x6f7   :  { %v4734_v51 = vpop.permute.xlu1 %4733  ;;  %v4892_v39 = vpack.c.bf16 %v4879_v47, %v4879_v47  ;;  %v8401_v47 = vld [vmem:[%s8507_s11] ss:$0 sm:$0xff] }
 0x6f8   :  { %4768 = vst.msk [vmem:[#allocation4 + $0x20] sm:$0xf] %vm1499_vm7, %v4734_v51  ;;  %6280 = vmatmul.msk.bf16.gmra.mxu1 %vm910_vm3, %v6231_v44 }
 0x6f9   :  { %v6406_v40 = vld [vmem:[#allocation4 + $0x14] sm:$0xf0] }
 0x6fa   :  { %v6203_v0 = vor.u32 %v6406_v40, %v6202_v49  ;;  %v5334_v63 = vld [vmem:[#allocation3 + $0x68] sm:$0xff] }
 0x6fb   :  { %v5347_v27 = vpack.c.bf16 %v5334_v63, %v5334_v63  ;;  %v5061_v60 = vld [vmem:[#allocation3 + $0x61] sm:$0xff]  ;;  %v5062_v36 = vld [vmem:[#allocation3 + $0x69] sm:$0x3] }
 0x6fc   :  { %5545 = vmatmul.bf16.gmra.mxu2 %v6203_v0  ;;  %5018 = vrot.lane.b32.xlu2 %v5345_v59, %s6453_s3  ;;  %v6413_v13 = vld [vmem:[#allocation4 + $0x54] sm:$0xf]  ;;  %v5074_v9 = vpack.c.bf16 %v5061_v60, %v5061_v60  ;;  %v4880_v55 = vld [vmem:[#allocation3 + $0x67] sm:$0x3]  ;;  %v5075_v19 = vpack.c.bf16 %v5062_v36, %v5062_v36  ;;  %v5335_v36 = vld [vmem:[#allocation3 + $0x70] sm:$0x3] }
 0x6fd   :  { %4836 = vrot.lane.b32.xlu1 %v4800_v35, %s6455_s13  ;;  %5360 = vst.msk [vmem:[#allocation4 + $0x5c] sm:$0xf] %vm1406_vm5, %v5347_v27  ;;  %4747 = vrot.lane.b32.xlu0 %v4710_v53, %s6456_s14  ;;  %v5009_v3 = vpop.permute.xlu0 %5008  ;;  %v5243_v52 = vld [vmem:[#allocation3 + $0x67] sm:$0xff]  ;;  %v4893_v54 = vpack.c.bf16 %v4880_v55, %v4880_v55  ;;  %vm8537_vm5 = vcmask 385280  }
 0x6fe   :  { %v5100_v6 = vpop.permute.xlu2 %5099  ;;  %v5256_v10 = vpack.c.bf16 %v5243_v52, %v5243_v52  ;;  %v5152_v23 = vld [vmem:[#allocation3 + $0x66] sm:$0xff] }
 0x6ff   :  { %v4825_v34 = vpop.permute.xlu1 %4824  ;;  %v5165_v20 = vpack.c.bf16 %v5152_v23, %v5152_v23  ;;  %v4971_v57 = vld [vmem:[#allocation3 + $0x68] sm:$0x3] }
 0x700   :  { %4859 = vst.msk [vmem:[#allocation4 + $0x20] sm:$0xf] %vm1592_vm8, %v4825_v34  ;;  %v4984_v56 = vpack.c.bf16 %v4971_v57, %v4971_v57  ;;  %v5348_v57 = vpack.c.bf16 %v5335_v36, %v5335_v36 }
 0x701   :  { %4950 = vst.msk [vmem:[#allocation4 + $0x20] sm:$0xf] %vm1685_vm9, %v4916_v48 }
 0x702   :  { %5041 = vst.msk [vmem:[#allocation4 + $0x20] sm:$0xf] %vm1778_vm10, %v8304_v33  ;;  %v5151_v33 = vld [vmem:[#allocation3 + $0x5e] sm:$0xff] }
 0x703   :  { %v5164_v11 = vpack.c.bf16 %v5151_v33, %v5151_v33  ;;  %5361 = vst.msk [vmem:[#allocation4 + $0x64] sm:$0x1] %vm1419_vm6, %v5348_v57  ;;  %vm8539_vm6 = vmmov %vm8526_vm12 }
 0x704   :  { %v6236_v42 = vld [vmem:[#allocation4 + $0x58] sm:$0xf0]  ;;  %4838 = vrot.lane.b32.xlu2 %v4801_v26, %s6455_s13 }
 0x705   :  { %4929 = vrot.lane.b32.xlu1 %v4892_v39, %s6454_s2  ;;  %v6239_v7 = vor.u32 %v6413_v13, %v6236_v42  ;;  %5020 = vrot.lane.b32.xlu0 %v4983_v32, %s6453_s3  ;;  %v5189_v12 = vpop.permute.xlu0 %5188  ;;  %v5244_v32 = vld [vmem:[#allocation3 + $0x6f] sm:$0x3] }
 0x706   :  { %v4920_v41 = vpop.permute.xlu2 %4919  ;;  %v5257_v16 = vpack.c.bf16 %v5244_v32, %v5244_v32 }
 0x707   :  { %v4918_v22 = vpop.permute.xlu1 %4917 }
 0x708   :  { %4951 = vst.msk [vmem:[#allocation4 + $0x28] sm:$0xf] %vm1685_vm9, %v4918_v22  ;;  %6281 = vmatmul.msk.bf16.gmra.mxu1 %vm910_vm3, %v6239_v7 }
 0x709   :  { %5042 = vst.msk [vmem:[#allocation4 + $0x28] sm:$0xf] %vm1778_vm10, %v5009_v3  ;;  %v5584_v3 = vpop.f32.mrf.mxu1 }
 0x70a   :  { %5133 = vst.msk [vmem:[#allocation4 + $0x28] sm:$0xf] %vm1871_vm2, %v5100_v6 }
 0x70c   :  { %5291 = vrot.lane.b32.xlu2 %v4892_v39, %s6452_s28 }
 0x70d   :  { %5109 = vrot.lane.b32.xlu1 %v4710_v53, %s6457_s1  ;;  %5200 = vrot.lane.b32.xlu0 %v5164_v11, %s6451_s27 }
 0x70e   :  { %v4740_v18 = vpop.permute.xlu2 %4739 }
 0x70f   :  { %4771 = vst.msk [vmem:[#allocation4 + $0x38] sm:$0xf] %vm1499_vm7, %v4740_v18  ;;  %v5098_v15 = vpop.permute.xlu1 %5097 }
 0x710   :  { %5132 = vst.msk [vmem:[#allocation4 + $0x20] sm:$0xf] %vm1871_vm2, %v5098_v15 }
 0x711   :  { %5223 = vst.msk [vmem:[#allocation4 + $0x20] sm:$0xf] %vm1964_vm1, %v5189_v12  ;;  %v5586_v11 = vpop.f32.mrf.mxu1 }
 0x712   :  { %5314 = vst.msk [vmem:[#allocation4 + $0x20] sm:$0xf] %vm2057_vm0, %v5280_v38 }
 0x713   :  { %v5282_v31 = vpop.permute.xlu0 %5281 }
 0x714   :  { %5111 = vrot.lane.b32.xlu2 %v5074_v9, %s6457_s1 }
 0x715   :  { %4749 = vrot.lane.b32.xlu1 %v4711_v25, %s6456_s14  ;;  %5293 = vrot.lane.b32.xlu0 %v5256_v10, %s6452_s28 }
 0x716   :  { %v5013_v21 = vpop.permute.xlu2 %5012 }
 0x717   :  { %v5191_v2 = vpop.permute.xlu1 %5190 }
 0x718   :  { %5224 = vst.msk [vmem:[#allocation4 + $0x28] sm:$0xf] %vm1964_vm1, %v5191_v2 }
 0x719   :  { %5315 = vst.msk [vmem:[#allocation4 + $0x28] sm:$0xf] %vm2057_vm0, %v5282_v31  ;;  %v6210_v61 = vld [vmem:[#allocation4 + $0x20] sm:$0xf] }
 0x71b   :  { %v4829_v24 = vpop.permute.xlu0 %4828 }
 0x71c   :  { %4840 = vrot.lane.b32.xlu2 %v4802_v58, %s6455_s13  ;;  %v5589_v58 = vpop.f32.mrf.mxu1 }
 0x71d   :  { %5202 = vrot.lane.b32.xlu1 %v5165_v20, %s6451_s27  ;;  %4931 = vrot.lane.b32.xlu0 %v4893_v54, %s6454_s2 }
 0x71e   :  { %v5193_v59 = vpop.permute.xlu2 %5192 }
 0x71f   :  { %v4738_v1 = vpop.permute.xlu1 %4737 }
 0x720   :  { %4770 = vst.msk [vmem:[#allocation4 + $0x30] sm:$0xf] %vm1499_vm7, %v4738_v1  ;;  %v6408_v8 = vld [vmem:[#allocation4 + $0x24] sm:$0xf0] }
 0x721   :  { %4861 = vst.msk [vmem:[#allocation4 + $0x30] sm:$0xf] %vm1592_vm8, %v4829_v24  ;;  %v6211_v50 = vor.u32 %v6408_v8, %v6210_v61 }
 0x722   :  { %4952 = vst.msk [vmem:[#allocation4 + $0x30] sm:$0xf] %vm1685_vm9, %v4920_v41 }
 0x723   :  { %5550 = vmatmul.bf16.gmra.mxu2 %v6211_v50  ;;  %v4922_v5 = vpop.permute.xlu0 %4921 }
 0x724   :  { %5113 = vrot.lane.b32.xlu2 %v5075_v19, %s6457_s1 }
 0x725   :  { %5022 = vrot.lane.b32.xlu1 %v4984_v56, %s6453_s3  ;;  %5204 = vrot.lane.b32.xlu0 %v5166_v37, %s6451_s27  ;;  %v5591_v37 = vpop.f32.mrf.mxu1 }
 0x726   :  { %v5286_v14 = vpop.permute.xlu2 %5285 }
 0x727   :  { %v5011_v62 = vpop.permute.xlu1 %5010 }
 0x728   :  { %5043 = vst.msk [vmem:[#allocation4 + $0x30] sm:$0xf] %vm1778_vm10, %v5011_v62 }
 0x72b   :  { %v5102_v17 = vpop.permute.xlu0 %5101 }
 0x72c   :  { %5134 = vst.msk [vmem:[#allocation4 + $0x30] sm:$0xf] %vm1871_vm2, %v5102_v17 }
 0x72d   :  { %5295 = vrot.lane.b32.xlu1 %v5257_v16, %s6452_s28  ;;  %5225 = vst.msk [vmem:[#allocation4 + $0x30] sm:$0xf] %vm1964_vm1, %v5193_v59 }
 0x72e   :  { %v4833_v28 = vpop.permute.xlu2 %4832 }
 0x72f   :  { %v4831_v38 = vpop.permute.xlu1 %4830 }
 0x730   :  { %4862 = vst.msk [vmem:[#allocation4 + $0x38] sm:$0xf] %vm1592_vm8, %v4831_v38 }
 0x731   :  { %4953 = vst.msk [vmem:[#allocation4 + $0x38] sm:$0xf] %vm1685_vm9, %v4922_v5 }
 0x732   :  { %5044 = vst.msk [vmem:[#allocation4 + $0x38] sm:$0xf] %vm1778_vm10, %v5013_v21 }
 0x736   :  { %v4926_v44 = vpop.permute.xlu2 %4925  ;;  %v5195_v48 = vpop.permute.xlu0 %5194 }
 0x737   :  { %v5284_v51 = vpop.permute.xlu1 %5283 }
 0x738   :  { %5316 = vst.msk [vmem:[#allocation4 + $0x30] sm:$0xf] %vm2057_vm0, %v5284_v51  ;;  %v5594_v51 = vpop.f32.mrf.mxu1 }
 0x73e   :  { %v5106_v4 = vpop.permute.xlu2 %5105  ;;  %v4742_v40 = vpop.permute.xlu0 %4741 }
 0x73f   :  { %v5104_v49 = vpop.permute.xlu1 %5103  ;;  %4772 = vst.msk [vmem:[#allocation4 + $0x40] sm:$0xf] %vm1499_vm7, %v4742_v40  ;;  %v6218_v35 = vld [vmem:[#allocation4 + $0x30] sm:$0xf] }
 0x740   :  { %5135 = vst.msk [vmem:[#allocation4 + $0x38] sm:$0xf] %vm1871_vm2, %v5104_v49 }
 0x741   :  { %5226 = vst.msk [vmem:[#allocation4 + $0x38] sm:$0xf] %vm1964_vm1, %v5195_v48 }
 0x742   :  { %5317 = vst.msk [vmem:[#allocation4 + $0x38] sm:$0xf] %vm2057_vm0, %v5286_v14 }
 0x743   :  { %4863 = vst.msk [vmem:[#allocation4 + $0x40] sm:$0xf] %vm1592_vm8, %v4833_v28 }
 0x746   :  { %v5199_v0 = vpop.permute.xlu2 %5198  ;;  %v5015_v63 = vpop.permute.xlu0 %5014 }
 0x747   :  { %v4924_v29 = vpop.permute.xlu1 %4923 }
 0x748   :  { %4954 = vst.msk [vmem:[#allocation4 + $0x40] sm:$0xf] %vm1685_vm9, %v4924_v29 }
 0x749   :  { %5045 = vst.msk [vmem:[#allocation4 + $0x40] sm:$0xf] %vm1778_vm10, %v5015_v63  ;;  %v6410_v27 = vld [vmem:[#allocation4 + $0x34] sm:$0xf0] }
 0x74a   :  { %5136 = vst.msk [vmem:[#allocation4 + $0x40] sm:$0xf] %vm1871_vm2, %v5106_v4  ;;  %v6219_v53 = vor.u32 %v6410_v27, %v6218_v35 }
 0x74c   :  { %5555 = vmatmul.bf16.gmra.mxu2 %v6219_v53 }
 0x74e   :  { %v4746_v6 = vpop.permute.xlu2 %4745  ;;  %v4835_v30 = vpop.permute.xlu0 %4834 }
 0x74f   :  { %v4744_v34 = vpop.permute.xlu1 %4743  ;;  %4774 = vst.msk [vmem:[#allocation4 + $0x50] sm:$0xf] %vm1499_vm7, %v4746_v6  ;;  %v5596_v6 = vpop.f32.mrf.mxu1 }
 0x750   :  { %4773 = vst.msk [vmem:[#allocation4 + $0x48] sm:$0xf] %vm1499_vm7, %v4744_v34 }
 0x751   :  { %4864 = vst.msk [vmem:[#allocation4 + $0x48] sm:$0xf] %vm1592_vm8, %v4835_v30 }
 0x752   :  { %4955 = vst.msk [vmem:[#allocation4 + $0x48] sm:$0xf] %vm1685_vm9, %v4926_v44 }
 0x756   :  { %v5541_v26 = vpop.f32.mrf.mxu2  ;;  %v5288_v42 = vpop.permute.xlu0 %5287 }
 0x757   :  { %v5542_v39 = vadd.f32 %v8401_v47, %v5541_v26  ;;  %v5017_v13 = vpop.permute.xlu1 %5016  ;;  %v5019_v41 = vpop.permute.xlu2 %5018 }
 0x758   :  { %5046 = vst.msk [vmem:[#allocation4 + $0x48] sm:$0xf] %vm1778_vm10, %v5017_v13  ;;  %v5599_v30 = vpop.f32.mrf.mxu1 }
 0x759   :  { %v5585_v7 = vadd.f32 %v5584_v3, %v5542_v39 }
 0x75b   :  { %5618 = vst.msk [vmem:[%s8508_s12] sm:$0xff] %vm910_vm3, %v5585_v7 }
 0x75e   :  { %v5543_v22 = vpop.f32.mrf.mxu2 }
 0x75f   :  { %v5544_v33 = vadd.f32 %v8401_v47, %v5543_v22  ;;  %v5197_v12 = vpop.permute.xlu1 %5196  ;;  %v5108_v18 = vpop.permute.xlu0 %5107 }
 0x760   :  { %5227 = vst.msk [vmem:[#allocation4 + $0x40] sm:$0xf] %vm1964_vm1, %v5197_v12  ;;  %v4839_v60 = vpop.permute.xlu2 %4838  ;;  %v5601_v7 = vpop.f32.mrf.mxu1 }
 0x761   :  { %v5587_v15 = vadd.f32 %v5586_v11, %v5544_v33  ;;  %5318 = vst.msk [vmem:[#allocation4 + $0x40] sm:$0xf] %vm2057_vm0, %v5288_v42 }
 0x762   :  { %5137 = vst.msk [vmem:[#allocation4 + $0x48] sm:$0xf] %vm1871_vm2, %v5108_v18 }
 0x763   :  { %5619 = vst.msk [vmem:[%s8508_s12 + $0x8] sm:$0xff] %vm910_vm3, %v5587_v15 }
 0x764   :  { %5228 = vst.msk [vmem:[#allocation4 + $0x48] sm:$0xf] %vm1964_vm1, %v5199_v0 }
 0x767   :  { %v5290_v45 = vpop.permute.xlu1 %5289  ;;  %v4928_v52 = vpop.permute.xlu0 %4927 }
 0x768   :  { %5319 = vst.msk [vmem:[#allocation4 + $0x48] sm:$0xf] %vm2057_vm0, %v5290_v45  ;;  %v5292_v9 = vpop.permute.xlu2 %5291  ;;  %v6226_v31 = vld [vmem:[#allocation4 + $0x40] sm:$0xf] }
 0x76f   :  { %v4837_v25 = vpop.permute.xlu1 %4836  ;;  %v6412_v10 = vld [vmem:[#allocation4 + $0x44] sm:$0xf0]  ;;  %v4748_v21 = vpop.permute.xlu0 %4747 }
 0x770   :  { %4865 = vst.msk [vmem:[#allocation4 + $0x50] sm:$0xf] %vm1592_vm8, %v4837_v25  ;;  %v6227_v2 = vor.u32 %v6412_v10, %v6226_v31  ;;  %v5112_v55 = vpop.permute.xlu2 %5111 }
 0x771   :  { %4956 = vst.msk [vmem:[#allocation4 + $0x50] sm:$0xf] %vm1685_vm9, %v4928_v52 }
 0x772   :  { %5047 = vst.msk [vmem:[#allocation4 + $0x50] sm:$0xf] %vm1778_vm10, %v5019_v41  ;;  %5560 = vmatmul.bf16.gmra.mxu2 %v6227_v2 }
 0x773   :  { %4775 = vst.msk [vmem:[#allocation4 + $0x58] sm:$0xf] %vm1499_vm7, %v4748_v21  ;;  %vm8538_vm7 = vcmask 516480  }
 0x774   :  { %4866 = vst.msk [vmem:[#allocation4 + $0x58] sm:$0xf] %vm1592_vm8, %v4839_v60  ;;  %vm8540_vm8 = vmmov %vm8527_vm13 }
 0x775   :  { %v5604_v22 = vpop.f32.mrf.mxu1 }
 0x777   :  { %v4930_v43 = vpop.permute.xlu1 %4929  ;;  %v5021_v23 = vpop.permute.xlu0 %5020 }
 0x778   :  { %4957 = vst.msk [vmem:[#allocation4 + $0x58] sm:$0xf] %vm1685_vm9, %v4930_v43  ;;  %v4841_v19 = vpop.permute.xlu2 %4840 }
 0x779   :  { %5048 = vst.msk [vmem:[#allocation4 + $0x58] sm:$0xf] %vm1778_vm10, %v5021_v23 }
 0x77a   :  { %5139 = vst.msk [vmem:[#allocation4 + $0x58] sm:$0xf] %vm1871_vm2, %v5112_v55 }
 0x77d   :  { %v5606_v60 = vpop.f32.mrf.mxu1 }
 0x77f   :  { %v5546_v20 = vpop.f32.mrf.mxu2  ;;  %v5110_v54 = vpop.permute.xlu1 %5109 }
 0x780   :  { %v5547_v24 = vadd.f32 %v8401_v47, %v5546_v20  ;;  %v5201_v59 = vpop.permute.xlu0 %5200  ;;  %5138 = vst.msk [vmem:[#allocation4 + $0x50] sm:$0xf] %vm1871_vm2, %v5110_v54  ;;  %v5114_v16 = vpop.permute.xlu2 %5113 }
 0x781   :  { %5229 = vst.msk [vmem:[#allocation4 + $0x50] sm:$0xf] %vm1964_vm1, %v5201_v59 }
 0x782   :  { %v5590_v1 = vadd.f32 %v5589_v58, %v5547_v24  ;;  %5320 = vst.msk [vmem:[#allocation4 + $0x50] sm:$0xf] %vm2057_vm0, %v5292_v9 }
 0x784   :  { %5620 = vst.msk [vmem:[%s8508_s12 + $0x10] sm:$0xff] %vm910_vm3, %v5590_v1 }
 0x785   :  { %v5609_v52 = vpop.f32.mrf.mxu1 }
 0x787   :  { %v5548_v46 = vpop.f32.mrf.mxu2  ;;  %v4750_v8 = vpop.permute.xlu1 %4749 }
 0x788   :  { %v5549_v61 = vadd.f32 %v8401_v47, %v5548_v46  ;;  %v5294_v50 = vpop.permute.xlu0 %5293  ;;  %4776 = vst.msk [vmem:[#allocation4 + $0x60] sm:$0x1] %vm1512_vm11, %v4750_v8 }
 0x789   :  { %4867 = vst.msk [vmem:[#allocation4 + $0x60] sm:$0x1] %vm8537_vm5, %v4841_v19  ;;  %v6234_v17 = vld [vmem:[#allocation4 + $0x50] sm:$0xf] }
 0x78a   :  { %v5592_v56 = vadd.f32 %v5591_v37, %v5549_v61 }
 0x78c   :  { %5621 = vst.msk [vmem:[%s8508_s12 + $0x18] sm:$0xff] %vm910_vm3, %v5592_v56 }
 0x78d   :  { %v5611_v31 = vpop.f32.mrf.mxu1 }
 0x78f   :  { %v5203_v5 = vpop.permute.xlu1 %5202 }
 0x790   :  { %v4932_v14 = vpop.permute.xlu0 %4931  ;;  %5230 = vst.msk [vmem:[#allocation4 + $0x58] sm:$0xf] %vm1964_vm1, %v5203_v5 }
 0x791   :  { %5321 = vst.msk [vmem:[#allocation4 + $0x58] sm:$0xf] %vm2057_vm0, %v5294_v50 }
 0x792   :  { %4958 = vst.msk [vmem:[#allocation4 + $0x60] sm:$0x1] %vm8538_vm7, %v4932_v14 }
 0x797   :  { %v5023_v32 = vpop.permute.xlu1 %5022 }
 0x798   :  { %v5205_v62 = vpop.permute.xlu0 %5204  ;;  %5049 = vst.msk [vmem:[#allocation4 + $0x60] sm:$0x1] %vm1791_vm14, %v5023_v32  ;;  %v6414_v28 = vld [vmem:[#allocation4 + $0x54] sm:$0xf0] }
 0x799   :  { %5140 = vst.msk [vmem:[#allocation4 + $0x60] sm:$0x1] %vm1884_vm15, %v5114_v16  ;;  %v6235_v38 = vor.u32 %v6414_v28, %v6234_v17 }
 0x79a   :  { %5231 = vst.msk [vmem:[#allocation4 + $0x60] sm:$0x1] %vm8539_vm6, %v5205_v62 }
 0x79b   :  { %5565 = vmatmul.bf16.gmra.mxu2 %v6235_v38 }
 0x79f   :  { %v5296_v44 = vpop.permute.xlu1 %5295 }
 0x7a0   :  { %5322 = vst.msk [vmem:[#allocation4 + $0x60] sm:$0x1] %vm8540_vm8, %v5296_v44 }
 0x7a6   :  { %v5551_v48 = vpop.f32.mrf.mxu2 }
 0x7a7   :  { %v5552_v4 = vadd.f32 %v8401_v47, %v5551_v48  ;;  %v5374_v49 = vld [vmem:[#allocation4 + $0x60] sm:$0x11] }
 0x7a8   :  { %v5434_v29 = vunpack.c.l.b16 %v5374_v49  ;;  %v5435_v0 = vunpack.c.h.b16 %v5374_v49 }
 0x7a9   :  { %v5595_v40 = vadd.f32 %v5594_v51, %v5552_v4 }
 0x7aa   :  { %v5448_v63 = vpack.c.b16 %v5434_v29, %v5434_v29  ;;  %v5449_v35 = vpack.c.b16 %v5435_v0, %v5435_v0 }
 0x7ab   :  { %5622 = vst.msk [vmem:[%s8508_s12 + $0x20] sm:$0xff] %vm910_vm3, %v5595_v40 }
 0x7ac   :  { %5570 = vmatmul.bf16.gmra.mxu2 %v5448_v63  ;;  %6282 = vmatmul.msk.bf16.gmra.mxu1 %vm910_vm3, %v5449_v35 }
 0x7ae   :  { %v5553_v27 = vpop.f32.mrf.mxu2 }
 0x7af   :  { %v5554_v53 = vadd.f32 %v8401_v47, %v5553_v27 }
 0x7b1   :  { %v5597_v34 = vadd.f32 %v5596_v6, %v5554_v53 }
 0x7b3   :  { %5623 = vst.msk [vmem:[%s8508_s12 + $0x28] sm:$0xff] %vm910_vm3, %v5597_v34 }
 0x7cf   :  { %v5556_v3 = vpop.f32.mrf.mxu2 }
 0x7d0   :  { %v5557_v26 = vadd.f32 %v8401_v47, %v5556_v3 }
 0x7d2   :  { %v5600_v39 = vadd.f32 %v5599_v30, %v5557_v26 }
 0x7d4   :  { %5624 = vst.msk [vmem:[%s8508_s12 + $0x30] sm:$0xff] %vm910_vm3, %v5600_v39 }
 0x7d7   :  { %v5558_v13 = vpop.f32.mrf.mxu2 }
 0x7d8   :  { %v5559_v42 = vadd.f32 %v8401_v47, %v5558_v13 }
 0x7da   :  { %v5602_v41 = vadd.f32 %v5601_v7, %v5559_v42 }
 0x7dc   :  { %5625 = vst.msk [vmem:[%s8508_s12 + $0x38] sm:$0xff] %vm910_vm3, %v5602_v41 }
 0x7f5   :  { %v5561_v33 = vpop.f32.mrf.mxu2 }
 0x7f6   :  { %v5562_v12 = vadd.f32 %v8401_v47, %v5561_v33 }
 0x7f8   :  { %v5605_v11 = vadd.f32 %v5604_v22, %v5562_v12 }
 0x7fa   :  { %5626 = vst.msk [vmem:[%s8508_s12 + $0x40] sm:$0xff] %vm910_vm3, %v5605_v11 }
 0x7fd   :  { %v5563_v18 = vpop.f32.mrf.mxu2 }
 0x7fe   :  { %v5564_v15 = vadd.f32 %v8401_v47, %v5563_v18 }
 0x800   :  { %v5607_v45 = vadd.f32 %v5606_v60, %v5564_v15 }
 0x802   :  { %5627 = vst.msk [vmem:[%s8508_s12 + $0x48] sm:$0xff] %vm910_vm3, %v5607_v45 }
 0x81e   :  { %v5566_v9 = vpop.f32.mrf.mxu2 }
 0x81f   :  { %v5567_v25 = vadd.f32 %v8401_v47, %v5566_v9 }
 0x821   :  { %v5610_v10 = vadd.f32 %v5609_v52, %v5567_v25 }
 0x823   :  { %5628 = vst.msk [vmem:[%s8508_s12 + $0x50] sm:$0xff] %vm910_vm3, %v5610_v10 }
 0x826   :  { %v5568_v21 = vpop.f32.mrf.mxu2 }
 0x827   :  { %v5569_v2 = vadd.f32 %v8401_v47, %v5568_v21 }
 0x829   :  { %v5612_v43 = vadd.f32 %v5611_v31, %v5569_v2  ;;  %v5614_v23 = vpop.f32.mrf.mxu1 }
 0x82b   :  { %5629 = vst.msk [vmem:[%s8508_s12 + $0x58] sm:$0xff] %vm910_vm3, %v5612_v43 }
 0x82f   :  { %v5571_v55 = vpop.f32.mrf.mxu2 }
 0x830   :  { %v5572_v58 = vadd.f32 %v8401_v47, %v5571_v55 }
 0x831   :  { %v5616_v20 = vpop.f32.mrf.mxu1 }
 0x832   :  { %v5615_v24 = vadd.f32 %v5614_v23, %v5572_v58 }
 0x834   :  { %5630 = vst.msk [vmem:[%s8508_s12 + $0x60] sm:$0x3] %vm1021_vm4, %v5615_v24 }
 0x837   :  { %v5573_v54 = vpop.f32.mrf.mxu2 }

</bundles_post_ra>
